<compile_context>
chip_gen: v7x
topology: tpu7x:2x2x1
jax: 0.10.0
libtpu: 0.0.40
codegen_flags: <defaults>
</compile_context>

<pallas_src>
import jax
import jax.numpy as jnp
from jax import lax
from jax.experimental import pallas as pl
from jax.experimental.pallas import tpu as pltpu


# Large finite negative instead of -inf: avoids any inf-inf -> NaN risk if the
# masking is ever generalized (padding / segment masks).
_MASK_VALUE = -1e30


# ---------------------------------------------------------------------------
# Kernel 1: fused QKV projection  x @ [Wq*scale | Wk | Wv]  -> head-major Q,K,V
# ---------------------------------------------------------------------------
def _qkv_proj_kernel(x_ref, w_ref, q_ref, k_ref, v_ref):
    # x_ref : (tm, C)        bf16
    # w_ref : (C, 3*H*hs)    bf16   fused [Wq*scale | Wk | Wv]
    # q/k/v_ref : (H, tm, hs) bf16  head-major outputs (no wrapper transpose)
    H, _, hs = q_ref.shape
    res = jnp.dot(x_ref[...], w_ref[...], preferred_element_type=jnp.float32)
    for h in range(H):  # static loop: per-head lane slice + store
        q_ref[h] = res[:, h * hs:(h + 1) * hs].astype(q_ref.dtype)
        k_ref[h] = res[:, (H + h) * hs:(H + h + 1) * hs].astype(k_ref.dtype)
        v_ref[h] = res[:, (2 * H + h) * hs:(2 * H + h + 1) * hs].astype(v_ref.dtype)


def _qkv_projection(x2d, w_qkv, num_heads, head_size, *, tm):
    M, C = x2d.shape
    HHS = num_heads * head_size
    assert M % tm == 0
    qkv_sds = jax.ShapeDtypeStruct((num_heads, M, head_size), jnp.bfloat16)
    out_spec = pl.BlockSpec((num_heads, tm, head_size), lambda i: (0, i, 0))
    return pl.pallas_call(
        _qkv_proj_kernel,
        out_shape=(qkv_sds, qkv_sds, qkv_sds),
        grid_spec=pltpu.PrefetchScalarGridSpec(
            num_scalar_prefetch=0,
            grid=(M // tm,),
            in_specs=[
                pl.BlockSpec((tm, C), lambda i: (i, 0)),          # x row tile
                pl.BlockSpec((C, 3 * HHS), lambda i: (0, 0)),     # fused W (resident)
            ],
            out_specs=[out_spec, out_spec, out_spec],
        ),
        compiler_params=pltpu.CompilerParams(
            dimension_semantics=("parallel",)),
    )(x2d, w_qkv)


# ---------------------------------------------------------------------------
# Kernel 2: flash attention (online softmax) + fused output projection
# ---------------------------------------------------------------------------
def _flash_attn_proj_kernel(q_ref, k_ref, v_ref, wp_ref, bp_ref, o_ref,
                            m_scr, l_scr, acc_h, acc_o):
    # q_ref : (tq, hs)  bf16   head h, query tile qi (Wq pre-scaled by C**-0.5)
    # k_ref : (tkv, hs) bf16   head h, kv tile ki (index clamped causally)
    # v_ref : (tkv, hs) bf16
    # wp_ref: (hs, C)   bf16   rows of Wproj belonging to head h
    # bp_ref: (1, C)    f32
    # o_ref : (tq, C)          output tile (b, qi); revisited across (h, ki)
    qi = pl.program_id(1)
    h = pl.program_id(2)
    ki = pl.program_id(3)
    nh = pl.num_programs(2)
    nkv = pl.num_programs(3)

    tq = q_ref.shape[0]
    tkv = k_ref.shape[0]
    q_start = qi * tq
    kv_start = ki * tkv

    # once per output tile (b, qi): zero the output-projection accumulator
    @pl.when(jnp.logical_and(h == 0, ki == 0))
    def _():
        acc_o[...] = jnp.zeros(acc_o.shape, acc_o.dtype)

    # once per (b, qi, h): reset the online-softmax state
    @pl.when(ki == 0)
    def _():
        m_scr[...] = jnp.full(m_scr.shape, _MASK_VALUE, m_scr.dtype)
        l_scr[...] = jnp.zeros(l_scr.shape, l_scr.dtype)
        acc_h[...] = jnp.zeros(acc_h.shape, acc_h.dtype)

    def _scores():
        # contract the last dims of q and k directly (no k.T relayout)
        return lax.dot_general(
            q_ref[...], k_ref[...],
            dimension_numbers=(((1,), (1,)), ((), ())),
            preferred_element_type=jnp.float32)            # (tq, tkv)

    def _online_softmax_update(s):
        m_prev = m_scr[...]
        m_new = jnp.maximum(m_prev, jnp.max(s, axis=-1, keepdims=True))
        alpha = jnp.exp(m_prev - m_new)
        p = jnp.exp(s - m_new)
        l_scr[...] = alpha * l_scr[...] + jnp.sum(p, axis=-1, keepdims=True)
        acc_h[...] = alpha * acc_h[...] + jnp.dot(
            p.astype(jnp.bfloat16), v_ref[...],
            preferred_element_type=jnp.float32)
        m_scr[...] = m_new

    # Fully visible block (entirely at/below the causal diagonal): no mask work.
    @pl.when(kv_start + (tkv - 1) <= q_start)
    def _():
        _online_softmax_update(_scores())

    # Diagonal-straddling block: the only block that needs the causal mask.
    @pl.when(jnp.logical_and(kv_start <= q_start + (tq - 1),
                             kv_start + (tkv - 1) > q_start))
    def _():
        s = _scores()
        row = q_start + lax.broadcasted_iota(jnp.int32, (tq, tkv), 0)
        col = kv_start + lax.broadcasted_iota(jnp.int32, (tq, tkv), 1)
        _online_softmax_update(jnp.where(row >= col, s, _MASK_VALUE))

    # Blocks fully above the diagonal run neither branch, and (thanks to the
    # clamped K/V index_map) also trigger no K/V DMA.

    # per (b, qi, h) epilogue: normalize and fold this head into the projection
    @pl.when(ki == nkv - 1)
    def _():
        out_h = acc_h[...] * pl.reciprocal(l_scr[...], approx=True)  # (tq, hs)
        acc_o[...] += jnp.dot(out_h.astype(jnp.bfloat16), wp_ref[...],
                              preferred_element_type=jnp.float32)

    # per (b, qi) epilogue: add bias and store the lane-dense output tile
    @pl.when(jnp.logical_and(ki == nkv - 1, h == nh - 1))
    def _():
        o_ref[...] = (acc_o[...] + bp_ref[...]).astype(o_ref.dtype)


def _flash_attention_proj(q, k, v, wp3, bp, out_dtype, *, seq_len,
                          block_q, block_kv):
    H, M, hs = q.shape
    T = seq_len
    B = M // T
    C = wp3.shape[-1]
    tq = min(block_q, T)
    tkv = min(block_kv, T)
    assert T % tq == 0 and T % tkv == 0
    nq = T // tq
    nkv = T // tkv

    def q_map(b, qi, h, ki):
        return (h, b * nq + qi, 0)

    def kv_map(b, qi, h, ki):
        # Clamp above-diagonal (compute-skipped) steps onto the last block this
        # query tile actually needs, so the pipeline reuses the resident block
        # instead of issuing a dead DMA (~2x less K/V HBM traffic).
        last_needed = (qi * tq + (tq - 1)) // tkv
        return (h, b * nkv + jnp.minimum(ki, last_needed), 0)

    return pl.pallas_call(
        _flash_attn_proj_kernel,
        out_shape=jax.ShapeDtypeStruct((B, T, C), out_dtype),
        grid_spec=pltpu.PrefetchScalarGridSpec(
            num_scalar_prefetch=0,
            grid=(B, nq, H, nkv),
            in_specs=[
                pl.BlockSpec((None, tq, hs), q_map),                      # q
                pl.BlockSpec((None, tkv, hs), kv_map),                    # k
                pl.BlockSpec((None, tkv, hs), kv_map),                    # v
                pl.BlockSpec((None, hs, C),
                             lambda b, qi, h, ki: (h, 0, 0)),             # Wproj rows
                pl.BlockSpec((1, C), lambda b, qi, h, ki: (0, 0)),        # bias
            ],
            out_specs=pl.BlockSpec((None, tq, C),
                                   lambda b, qi, h, ki: (b, qi, 0)),
            scratch_shapes=[
                pltpu.VMEM((tq, 1), jnp.float32),    # m (running max)
                pltpu.VMEM((tq, 1), jnp.float32),    # l (running denom)
                pltpu.VMEM((tq, hs), jnp.float32),   # per-head attention acc
                pltpu.VMEM((tq, C), jnp.float32),    # output-projection acc
            ],
        ),
        compiler_params=pltpu.CompilerParams(
            dimension_semantics=("parallel", "parallel", "arbitrary", "arbitrary")),
    )(q, k, v, wp3, bp)


# ---------------------------------------------------------------------------
# Public wrapper
# ---------------------------------------------------------------------------
def multi_head_attention(x, wq, wk, wv, wproj, bproj, *, num_heads, head_size,
                         block_q=256, block_kv=256, block_m=512):
    """y = MultiHeadAttention(x); weights stored as (in_features, out_features).

    block_kv=256 targets the 256-wide MXU of v6e/v7x; use block_kv=128 on v5e.
    """
    B, T, C = x.shape
    HHS = num_heads * head_size
    assert wq.shape == (C, HHS) and wk.shape == (C, HHS) and wv.shape == (C, HHS)
    assert wproj.shape == (HHS, C)

    # Fold the (reference-faithful) 1/sqrt(n_embed) score scale into Wq, fuse
    # Q/K/V into one weight, and cast MXU operands to bf16 (f32 accumulation
    # happens inside the kernels).
    scale = C ** (-0.5)
    w_qkv = jnp.concatenate([wq * scale, wk, wv], axis=1).astype(jnp.bfloat16)
    x2d = x.reshape(B * T, C).astype(jnp.bfloat16)   # free reshape, no transpose

    # Large M tile (amortizes ~0.35us/step pipeline overhead); fall back to
    # per-sequence tiles if B*T is not divisible by block_m.
    M = B * T
    tm = min(block_m, M)
    if M % tm != 0:
        tm = T

    # Kernel 1: fused QKV projection, emitted head-major (H, B*T, hs).
    q, k, v = _qkv_projection(x2d, w_qkv, num_heads, head_size, tm=tm)

    wp3 = wproj.reshape(num_heads, head_size, C).astype(jnp.bfloat16)
    bp = bproj.reshape(1, C).astype(jnp.float32)

    # Kernel 2: flash attention + fused output projection.
    return _flash_attention_proj(q, k, v, wp3, bp, x.dtype, seq_len=T,
                                 block_q=block_q, block_kv=block_kv)


# ---------------------------------------------------------------------------
# Pure-JAX reference (f32) for correctness checking
# ---------------------------------------------------------------------------
def _reference(x, wq, wk, wv, wproj, bproj, *, num_heads, head_size):
    B, T, C = x.shape
    scale = C ** (-0.5)
    causal = jnp.tril(jnp.ones((T, T), dtype=bool))
    outs = []
    for h in range(num_heads):
        sl = slice(h * head_size, (h + 1) * head_size)
        q = x @ wq[:, sl]
        k = x @ wk[:, sl]
        v = x @ wv[:, sl]
        wei = jnp.einsum("btd,bsd->bts", q, k) * scale
        wei = jnp.where(causal[None], wei, -jnp.inf)
        wei = jax.nn.softmax(wei, axis=-1)
        outs.append(jnp.einsum("bts,bsd->btd", wei, v))
    cat = jnp.concatenate(outs, axis=-1)
    return cat @ wproj + bproj


if __name__ == "__main__":
    # Small shapes, lane-dense (C multiple of 128) and consistent with the
    # module (T == block_size = 256); n_embed scaled down from 384 -> 128.
    B = 2
    T = 256
    n_embed = 128
    num_heads = 4
    head_size = n_embed // num_heads   # 32 (the real model's 96 also works:
                                       # head_size only ever appears as a full
                                       # trailing BlockSpec dim)

    key = jax.random.PRNGKey(0)
    kx, kq, kk, kv, kp, kb = jax.random.split(key, 6)
    x = jax.random.normal(kx, (B, T, n_embed), dtype=jnp.float32)
    wq = 0.02 * jax.random.normal(kq, (n_embed, num_heads * head_size), jnp.float32)
    wk = 0.02 * jax.random.normal(kk, (n_embed, num_heads * head_size), jnp.float32)
    wv = 0.02 * jax.random.normal(kv, (n_embed, num_heads * head_size), jnp.float32)
    wproj = 0.02 * jax.random.normal(kp, (n_embed, n_embed), jnp.float32)
    bproj = 0.02 * jax.random.normal(kb, (1, n_embed), jnp.float32)

    out = multi_head_attention(x, wq, wk, wv, wproj, bproj,
                               num_heads=num_heads, head_size=head_size)
    out = jax.block_until_ready(out)

    ref = _reference(x, wq, wk, wv, wproj, bproj,
                     num_heads=num_heads, head_size=head_size)
    assert out.shape == (B, T, n_embed)
    # bf16 MXU operands with f32 accumulation vs. an all-f32 reference.
    assert jnp.allclose(out, ref, atol=2e-2, rtol=2e-2), "mismatch vs reference"

    print("KERNEL_OK")
</pallas_src>

<mosaic_0001>
module attributes {stable_mosaic.version = 11 : i64} {
  func.func @_qkv_proj_kernel(%arg0: i32, %arg1: memref<512x128xbf16, #tpu.memory_space<vmem>>, %arg2: memref<128x384xbf16, #tpu.memory_space<vmem>>, %arg3: memref<4x512x32xbf16, #tpu.memory_space<vmem>>, %arg4: memref<4x512x32xbf16, #tpu.memory_space<vmem>>, %arg5: memref<4x512x32xbf16, #tpu.memory_space<vmem>>) attributes {dimension_semantics = [#tpu.dimension_semantics<parallel>], iteration_bounds = array<i64: 1>, scalar_prefetch = 0 : i64, scratch_operands = 0 : i64, tpu.core_type = #tpu.core_type<tc>, window_params = [{transform_indices = @transform_0, window_bounds = array<i64: 512, 128>}, {pipeline_mode = #tpu.pipeline_mode<synchronous>, transform_indices = @transform_1, window_bounds = array<i64: 128, 384>}, {transform_indices = @transform_2, window_bounds = array<i64: 4, 512, 32>}, {transform_indices = @transform_3, window_bounds = array<i64: 4, 512, 32>}, {transform_indices = @transform_4, window_bounds = array<i64: 4, 512, 32>}]} {
    %c0 = arith.constant 0 : index
    %c0_0 = arith.constant 0 : index
    %0 = vector.load %arg1[%c0, %c0_0] : memref<512x128xbf16, #tpu.memory_space<vmem>>, vector<512x128xbf16>
    %c0_1 = arith.constant 0 : index
    %c0_2 = arith.constant 0 : index
    %1 = vector.load %arg2[%c0_1, %c0_2] : memref<128x384xbf16, #tpu.memory_space<vmem>>, vector<128x384xbf16>
    %cst = arith.constant dense<0.000000e+00> : vector<512x384xf32>
    %2 = tpu.matmul %0, %1, %cst {dimension_numbers = #tpu.dot_dimension_numbers<[1], [0], [0], [1], [0, 0, 1, 1], [], []>} : vector<512x128xbf16>, vector<128x384xbf16>, vector<512x384xf32> -> vector<512x384xf32>
    %3 = vector.extract_strided_slice %2 {offsets = [0, 0], sizes = [512, 32], strides = [1, 1]} : vector<512x384xf32> to vector<512x32xf32>
    %4 = arith.truncf %3 : vector<512x32xf32> to vector<512x32xbf16>
    %c0_3 = arith.constant 0 : index
    %c0_4 = arith.constant 0 : index
    %c0_5 = arith.constant 0 : index
    %5 = vector.load %arg3[%c0_3, %c0_4, %c0_5] : memref<4x512x32xbf16, #tpu.memory_space<vmem>>, vector<1x512x32xbf16>
    %6 = vector.shape_cast %5 : vector<1x512x32xbf16> to vector<512x32xbf16>
    %7 = vector.shape_cast %4 : vector<512x32xbf16> to vector<1x512x32xbf16>
    tpu.vector_store %arg3[%c0_3, %c0_4, %c0_5], %7 {strides = array<i32>} : memref<4x512x32xbf16, #tpu.memory_space<vmem>>, vector<1x512x32xbf16>,
    %8 = vector.extract_strided_slice %2 {offsets = [0, 128], sizes = [512, 32], strides = [1, 1]} : vector<512x384xf32> to vector<512x32xf32>
    %9 = arith.truncf %8 : vector<512x32xf32> to vector<512x32xbf16>
    %c0_6 = arith.constant 0 : index
    %c0_7 = arith.constant 0 : index
    %c0_8 = arith.constant 0 : index
    %10 = vector.load %arg4[%c0_6, %c0_7, %c0_8] : memref<4x512x32xbf16, #tpu.memory_space<vmem>>, vector<1x512x32xbf16>
    %11 = vector.shape_cast %10 : vector<1x512x32xbf16> to vector<512x32xbf16>
    %12 = vector.shape_cast %9 : vector<512x32xbf16> to vector<1x512x32xbf16>
    tpu.vector_store %arg4[%c0_6, %c0_7, %c0_8], %12 {strides = array<i32>} : memref<4x512x32xbf16, #tpu.memory_space<vmem>>, vector<1x512x32xbf16>,
    %13 = vector.extract_strided_slice %2 {offsets = [0, 256], sizes = [512, 32], strides = [1, 1]} : vector<512x384xf32> to vector<512x32xf32>
    %14 = arith.truncf %13 : vector<512x32xf32> to vector<512x32xbf16>
    %c0_9 = arith.constant 0 : index
    %c0_10 = arith.constant 0 : index
    %c0_11 = arith.constant 0 : index
    %15 = vector.load %arg5[%c0_9, %c0_10, %c0_11] : memref<4x512x32xbf16, #tpu.memory_space<vmem>>, vector<1x512x32xbf16>
    %16 = vector.shape_cast %15 : vector<1x512x32xbf16> to vector<512x32xbf16>
    %17 = vector.shape_cast %14 : vector<512x32xbf16> to vector<1x512x32xbf16>
    tpu.vector_store %arg5[%c0_9, %c0_10, %c0_11], %17 {strides = array<i32>} : memref<4x512x32xbf16, #tpu.memory_space<vmem>>, vector<1x512x32xbf16>,
    %18 = vector.extract_strided_slice %2 {offsets = [0, 32], sizes = [512, 32], strides = [1, 1]} : vector<512x384xf32> to vector<512x32xf32>
    %19 = arith.truncf %18 : vector<512x32xf32> to vector<512x32xbf16>
    %c1 = arith.constant 1 : index
    %c0_12 = arith.constant 0 : index
    %c0_13 = arith.constant 0 : index
    %20 = vector.load %arg3[%c1, %c0_12, %c0_13] : memref<4x512x32xbf16, #tpu.memory_space<vmem>>, vector<1x512x32xbf16>
    %21 = vector.shape_cast %20 : vector<1x512x32xbf16> to vector<512x32xbf16>
    %22 = vector.shape_cast %19 : vector<512x32xbf16> to vector<1x512x32xbf16>
    tpu.vector_store %arg3[%c1, %c0_12, %c0_13], %22 {strides = array<i32>} : memref<4x512x32xbf16, #tpu.memory_space<vmem>>, vector<1x512x32xbf16>,
    %23 = vector.extract_strided_slice %2 {offsets = [0, 160], sizes = [512, 32], strides = [1, 1]} : vector<512x384xf32> to vector<512x32xf32>
    %24 = arith.truncf %23 : vector<512x32xf32> to vector<512x32xbf16>
    %c1_14 = arith.constant 1 : index
    %c0_15 = arith.constant 0 : index
    %c0_16 = arith.constant 0 : index
    %25 = vector.load %arg4[%c1_14, %c0_15, %c0_16] : memref<4x512x32xbf16, #tpu.memory_space<vmem>>, vector<1x512x32xbf16>
    %26 = vector.shape_cast %25 : vector<1x512x32xbf16> to vector<512x32xbf16>
    %27 = vector.shape_cast %24 : vector<512x32xbf16> to vector<1x512x32xbf16>
    tpu.vector_store %arg4[%c1_14, %c0_15, %c0_16], %27 {strides = array<i32>} : memref<4x512x32xbf16, #tpu.memory_space<vmem>>, vector<1x512x32xbf16>,
    %28 = vector.extract_strided_slice %2 {offsets = [0, 288], sizes = [512, 32], strides = [1, 1]} : vector<512x384xf32> to vector<512x32xf32>
    %29 = arith.truncf %28 : vector<512x32xf32> to vector<512x32xbf16>
    %c1_17 = arith.constant 1 : index
    %c0_18 = arith.constant 0 : index
    %c0_19 = arith.constant 0 : index
    %30 = vector.load %arg5[%c1_17, %c0_18, %c0_19] : memref<4x512x32xbf16, #tpu.memory_space<vmem>>, vector<1x512x32xbf16>
    %31 = vector.shape_cast %30 : vector<1x512x32xbf16> to vector<512x32xbf16>
    %32 = vector.shape_cast %29 : vector<512x32xbf16> to vector<1x512x32xbf16>
    tpu.vector_store %arg5[%c1_17, %c0_18, %c0_19], %32 {strides = array<i32>} : memref<4x512x32xbf16, #tpu.memory_space<vmem>>, vector<1x512x32xbf16>,
    %33 = vector.extract_strided_slice %2 {offsets = [0, 64], sizes = [512, 32], strides = [1, 1]} : vector<512x384xf32> to vector<512x32xf32>
    %34 = arith.truncf %33 : vector<512x32xf32> to vector<512x32xbf16>
    %c2 = arith.constant 2 : index
    %c0_20 = arith.constant 0 : index
    %c0_21 = arith.constant 0 : index
    %35 = vector.load %arg3[%c2, %c0_20, %c0_21] : memref<4x512x32xbf16, #tpu.memory_space<vmem>>, vector<1x512x32xbf16>
    %36 = vector.shape_cast %35 : vector<1x512x32xbf16> to vector<512x32xbf16>
    %37 = vector.shape_cast %34 : vector<512x32xbf16> to vector<1x512x32xbf16>
    tpu.vector_store %arg3[%c2, %c0_20, %c0_21], %37 {strides = array<i32>} : memref<4x512x32xbf16, #tpu.memory_space<vmem>>, vector<1x512x32xbf16>,
    %38 = vector.extract_strided_slice %2 {offsets = [0, 192], sizes = [512, 32], strides = [1, 1]} : vector<512x384xf32> to vector<512x32xf32>
    %39 = arith.truncf %38 : vector<512x32xf32> to vector<512x32xbf16>
    %c2_22 = arith.constant 2 : index
    %c0_23 = arith.constant 0 : index
    %c0_24 = arith.constant 0 : index
    %40 = vector.load %arg4[%c2_22, %c0_23, %c0_24] : memref<4x512x32xbf16, #tpu.memory_space<vmem>>, vector<1x512x32xbf16>
    %41 = vector.shape_cast %40 : vector<1x512x32xbf16> to vector<512x32xbf16>
    %42 = vector.shape_cast %39 : vector<512x32xbf16> to vector<1x512x32xbf16>
    tpu.vector_store %arg4[%c2_22, %c0_23, %c0_24], %42 {strides = array<i32>} : memref<4x512x32xbf16, #tpu.memory_space<vmem>>, vector<1x512x32xbf16>,
    %43 = vector.extract_strided_slice %2 {offsets = [0, 320], sizes = [512, 32], strides = [1, 1]} : vector<512x384xf32> to vector<512x32xf32>
    %44 = arith.truncf %43 : vector<512x32xf32> to vector<512x32xbf16>
    %c2_25 = arith.constant 2 : index
    %c0_26 = arith.constant 0 : index
    %c0_27 = arith.constant 0 : index
    %45 = vector.load %arg5[%c2_25, %c0_26, %c0_27] : memref<4x512x32xbf16, #tpu.memory_space<vmem>>, vector<1x512x32xbf16>
    %46 = vector.shape_cast %45 : vector<1x512x32xbf16> to vector<512x32xbf16>
    %47 = vector.shape_cast %44 : vector<512x32xbf16> to vector<1x512x32xbf16>
    tpu.vector_store %arg5[%c2_25, %c0_26, %c0_27], %47 {strides = array<i32>} : memref<4x512x32xbf16, #tpu.memory_space<vmem>>, vector<1x512x32xbf16>,
    %48 = vector.extract_strided_slice %2 {offsets = [0, 96], sizes = [512, 32], strides = [1, 1]} : vector<512x384xf32> to vector<512x32xf32>
    %49 = arith.truncf %48 : vector<512x32xf32> to vector<512x32xbf16>
    %c3 = arith.constant 3 : index
    %c0_28 = arith.constant 0 : index
    %c0_29 = arith.constant 0 : index
    %50 = vector.load %arg3[%c3, %c0_28, %c0_29] : memref<4x512x32xbf16, #tpu.memory_space<vmem>>, vector<1x512x32xbf16>
    %51 = vector.shape_cast %50 : vector<1x512x32xbf16> to vector<512x32xbf16>
    %52 = vector.shape_cast %49 : vector<512x32xbf16> to vector<1x512x32xbf16>
    tpu.vector_store %arg3[%c3, %c0_28, %c0_29], %52 {strides = array<i32>} : memref<4x512x32xbf16, #tpu.memory_space<vmem>>, vector<1x512x32xbf16>,
    %53 = vector.extract_strided_slice %2 {offsets = [0, 224], sizes = [512, 32], strides = [1, 1]} : vector<512x384xf32> to vector<512x32xf32>
    %54 = arith.truncf %53 : vector<512x32xf32> to vector<512x32xbf16>
    %c3_30 = arith.constant 3 : index
    %c0_31 = arith.constant 0 : index
    %c0_32 = arith.constant 0 : index
    %55 = vector.load %arg4[%c3_30, %c0_31, %c0_32] : memref<4x512x32xbf16, #tpu.memory_space<vmem>>, vector<1x512x32xbf16>
    %56 = vector.shape_cast %55 : vector<1x512x32xbf16> to vector<512x32xbf16>
    %57 = vector.shape_cast %54 : vector<512x32xbf16> to vector<1x512x32xbf16>
    tpu.vector_store %arg4[%c3_30, %c0_31, %c0_32], %57 {strides = array<i32>} : memref<4x512x32xbf16, #tpu.memory_space<vmem>>, vector<1x512x32xbf16>,
    %58 = vector.extract_strided_slice %2 {offsets = [0, 352], sizes = [512, 32], strides = [1, 1]} : vector<512x384xf32> to vector<512x32xf32>
    %59 = arith.truncf %58 : vector<512x32xf32> to vector<512x32xbf16>
    %c3_33 = arith.constant 3 : index
    %c0_34 = arith.constant 0 : index
    %c0_35 = arith.constant 0 : index
    %60 = vector.load %arg5[%c3_33, %c0_34, %c0_35] : memref<4x512x32xbf16, #tpu.memory_space<vmem>>, vector<1x512x32xbf16>
    %61 = vector.shape_cast %60 : vector<1x512x32xbf16> to vector<512x32xbf16>
    %62 = vector.shape_cast %59 : vector<512x32xbf16> to vector<1x512x32xbf16>
    tpu.vector_store %arg5[%c3_33, %c0_34, %c0_35], %62 {strides = array<i32>} : memref<4x512x32xbf16, #tpu.memory_space<vmem>>, vector<1x512x32xbf16>,
    return
  }
  func.func @transform_0(%arg0: i32) -> (i32, i32) {
    %c0_i32 = arith.constant 0 : i32
    %c0_i32_0 = arith.constant 0 : i32
    return %arg0, %c0_i32 : i32, i32
  }
  func.func @transform_1(%arg0: i32) -> (i32, i32) {
    %c0_i32 = arith.constant 0 : i32
    %c0_i32_0 = arith.constant 0 : i32
    %c0_i32_1 = arith.constant 0 : i32
    return %c0_i32, %c0_i32_0 : i32, i32
  }
  func.func @transform_2(%arg0: i32) -> (i32, i32, i32) {
    %c0_i32 = arith.constant 0 : i32
    %c0_i32_0 = arith.constant 0 : i32
    %c0_i32_1 = arith.constant 0 : i32
    return %c0_i32, %arg0, %c0_i32_0 : i32, i32, i32
  }
  func.func @transform_3(%arg0: i32) -> (i32, i32, i32) {
    %c0_i32 = arith.constant 0 : i32
    %c0_i32_0 = arith.constant 0 : i32
    %c0_i32_1 = arith.constant 0 : i32
    return %c0_i32, %arg0, %c0_i32_0 : i32, i32, i32
  }
  func.func @transform_4(%arg0: i32) -> (i32, i32, i32) {
    %c0_i32 = arith.constant 0 : i32
    %c0_i32_0 = arith.constant 0 : i32
    %c0_i32_1 = arith.constant 0 : i32
    return %c0_i32, %arg0, %c0_i32_0 : i32, i32, i32
  }
}

</mosaic_0001>

<bundles_post_ra>
// kernel: tpu_custom_call.1
= control target key start
LH: loop header
LB: loop body
LE: loop exit
PB: predicated region body
PF: predicated region fallthrough
CT: control target
= control target key end

     0   :  { %10 = vsyncpa [#allocation3], 0  ;;  %s10594_s0 = inlined_call_operand.hbm [shape: bf16[512,128], index: 0, kind: input, shape index: {}]   ;;  %s10595_s1 = inlined_call_operand.hbm [shape: bf16[128,384], index: 1, kind: input, shape index: {}]   ;;  %s10596_s2 = inlined_call_operand.vmem [shape: bf16[4,512,32], index: 2, kind: output, shape index: {0}]   ;;  %s10597_s3 = inlined_call_operand.vmem [shape: bf16[4,512,32], index: 3, kind: output, shape index: {1}]   ;;  %s10598_s4 = inlined_call_operand.vmem [shape: bf16[4,512,32], index: 4, kind: output, shape index: {2}]  }
   0x1   :  { %11 = vsyncpa [#allocation5], 0  ;;  %s5662_s15 = smov [#allocation2]   ;;  %s5614_s19 = scalar_lea.hbm %s10594_s0, 4096 }
   0x2   :  { %s17_s16 = sshll.u32 %s5662_s15, 4  ;;  %p5615_p0 = scmp.ne.s32.totalorder %s10594_s0, %s5614_s19  ;;  %s18_s16 = int_to_ptr.vmem [resolvable:$true] %s17_s16 }
   0x3   :  { %p5618_p1 = scmp.lt.u32.totalorder %s5614_s19, %s10594_s0 }
   0x5   :  { %p5620_p2 = pnand %p5618_p1, %p5615_p0 }
   0x7   :  { %5623 = shalt.err (!%p5620_p2)
}
   0x8   :  { %s5624_s24 = scalar_lea.vmem %s18_s16, 4096  ;;  %p5629_p4 = scmp.lt.s32.totalorder %s18_s16, %s18_s16 }
   0x9   :  { %p5625_p3 = scmp.ne.s32.totalorder %s18_s16, %s5624_s24  ;;  %p5630_p5 = scmp.lt.s32.totalorder %s5624_s24, %s5624_s24 }
   0xb   :  { %p5631_p6 = por %p5630_p5, %p5629_p4 }
   0xd   :  { %p5632_p7 = pnand %p5631_p6, %p5625_p3 }
   0xf   :  { %5635 = shalt.err (!%p5632_p7)
}
  0x10   :  { %s5663_s25 = smov 64   ;;  %s5664_s26 = smov 4  }
  0x11   :  { %23 = dma.hbm_to_vmem [thread:$0]  %s10594_s0, 4096, %s18_s16, [#allocation3], %s5663_s25, %s5663_s25, %s5664_s26  }
  0x12   :  { %s5665_s29 = smov [#allocation4]   ;;  %s5636_s7 = scalar_lea.hbm %s10595_s1, 3072 }
  0x13   :  { %s29_s30 = sshll.u32 %s5665_s29, 4  ;;  %p5637_p8 = scmp.ne.s32.totalorder %s10595_s1, %s5636_s7  ;;  %s30_s30 = int_to_ptr.vmem [resolvable:$true] %s29_s30 }
  0x14   :  { %p5640_p9 = scmp.lt.u32.totalorder %s5636_s7, %s10595_s1 }
  0x16   :  { %p5642_p10 = pnand %p5640_p9, %p5637_p8 }
  0x18   :  { %5645 = shalt.err (!%p5642_p10)
}
  0x19   :  { %s5646_s12 = scalar_lea.vmem %s30_s30, 3072  ;;  %p5651_p12 = scmp.lt.s32.totalorder %s30_s30, %s30_s30 }
  0x1a   :  { %p5647_p11 = scmp.ne.s32.totalorder %s30_s30, %s5646_s12  ;;  %p5652_p13 = scmp.lt.s32.totalorder %s5646_s12, %s5646_s12 }
  0x1c   :  { %p5653_p0 = por %p5652_p13, %p5651_p12 }
  0x1e   :  { %p5654_p1 = pnand %p5653_p0, %p5647_p11 }
  0x20   :  { %5657 = shalt.err (!%p5654_p1)
}
  0x21   :  { %s5666_s0 = smov 192   ;;  %s5667_s13 = smov 12  }
  0x22   :  { %35 = dma.hbm_to_vmem [thread:$0]  %s10595_s1, 3072, %s30_s30, [#allocation5], %s5666_s0, %s5666_s0, %s5667_s13  }
  0x23   :  { %5658 = dma.done.wait [#allocation3], 4096  }
  0x24   :  { %5659 = vsyncadd [#allocation3], 4294963200 }
  0x25   :  { %5660 = dma.done.wait [#allocation5], 3072  }
  0x26   :  { %5661 = vsyncadd [#allocation5], 4294964224  ;;  %v5668_v0 = vmov 0   ;;  %v5550_v1 = vld [vmem:[#allocation4 + $0x4] ss:$12 sps:$4 sm:$0xff]   ;;  %v5732_v21 = vld [vmem:[#allocation2 + $0x8] sm:$0xff]  }
  0x27   :  { %491 = vmatprep.mubr.bf16.mxu0 %v5668_v0  ;;  %731 = vmatprep.mubr.bf16.mxu1 %v5668_v0  ;;  %v5552_v2 = vld [vmem:[#allocation4] ss:$12 sps:$4 sm:$0xff]   ;;  %v5553_v3 = vld [vmem:[#allocation4 + $0x1c] ss:$12 sps:$4 sm:$0xff]   ;;  %v5555_v4 = vld [vmem:[#allocation4 + $0x18] ss:$12 sps:$4 sm:$0xff]  }
  0x28   :  { %459 = vmatprep.subr.bf16.mxu0 %v5550_v1  ;;  %5525 = vmatprep.subr.bf16.mxu1 %v5550_v1  ;;  %v5556_v5 = vld [vmem:[#allocation4 + $0x34] ss:$12 sps:$4 sm:$0xff]   ;;  %v5558_v6 = vld [vmem:[#allocation4 + $0x30] ss:$12 sps:$4 sm:$0xff]   ;;  %v5559_v7 = vld [vmem:[#allocation4 + $0x4c] ss:$12 sps:$4 sm:$0xff]  }
  0x29   :  { %460 = vmatpush1.bf16.msra.mxu0 %v5552_v2  ;;  %5533 = vmatpush1.bf16.msra.mxu1 %v5552_v2  ;;  %v5561_v8 = vld [vmem:[#allocation4 + $0x48] ss:$12 sps:$4 sm:$0xff]   ;;  %v5562_v9 = vld [vmem:[#allocation4 + $0x64] ss:$12 sps:$4 sm:$0xff]   ;;  %v5564_v10 = vld [vmem:[#allocation4 + $0x60] ss:$12 sps:$4 sm:$0xff]  }
  0x2a   :  { %461 = vmatprep.subr.bf16.mxu0 %v5553_v3  ;;  %5526 = vmatprep.subr.bf16.mxu1 %v5553_v3  ;;  %v5565_v11 = vld [vmem:[#allocation4 + $0x7c] ss:$12 sps:$4 sm:$0xff]   ;;  %v5567_v12 = vld [vmem:[#allocation4 + $0x78] ss:$12 sps:$4 sm:$0xff]   ;;  %v5568_v13 = vld [vmem:[#allocation4 + $0x94] ss:$12 sps:$4 sm:$0xff]  }
  0x2b   :  { %v5570_v14 = vld [vmem:[#allocation4 + $0x90] ss:$12 sps:$4 sm:$0xff]   ;;  %v5571_v15 = vld [vmem:[#allocation4 + $0xac] ss:$12 sps:$4 sm:$0xff]   ;;  %v5573_v16 = vld [vmem:[#allocation4 + $0xa8] ss:$12 sps:$4 sm:$0xff]  }
  0x2c   :  { %v5585_v17 = vld [vmem:[#allocation4 + $0x8] ss:$12 sps:$4 sm:$0xff]   ;;  %v5724_v18 = vld [vmem:[#allocation2] sm:$0xff]   ;;  %v5591_v24 = vld [vmem:[#allocation4 + $0x50] ss:$12 sps:$4 sm:$0xff]   ;;  %vm1357_vm0 = vcmask 257024  }
  0x2d   :  { %462 = vmatpush1.bf16.msra.mxu0 %v5555_v4  ;;  %5534 = vmatpush1.bf16.msra.mxu1 %v5555_v4  ;;  %v5726_v19 = vld [vmem:[#allocation2 + $0xc0] sm:$0xff]   ;;  %v5734_v22 = vld [vmem:[#allocation2 + $0xc8] sm:$0xff]   ;;  %v5578_v26 = vld [vmem:[#allocation2 + $0x10] sm:$0xff]   ;;  %s5669_s19 = smov 96   ;;  %s5670_s29 = smov 32  }
  0x2e   :  { %463 = vmatprep.subr.bf16.mxu0 %v5556_v5  ;;  %5527 = vmatprep.subr.bf16.mxu1 %v5556_v5  ;;  %v5587_v20 = vld [vmem:[#allocation4 + $0x20] ss:$12 sps:$4 sm:$0xff]   ;;  %v5588_v23 = vld [vmem:[#allocation4 + $0x38] ss:$12 sps:$4 sm:$0xff]   ;;  %v5592_v25 = vld [vmem:[#allocation4 + $0x68] ss:$12 sps:$4 sm:$0xff]  }
  0x2f   :  { %v5740_v27 = vld [vmem:[#allocation2 + $0xd0] sm:$0xff]   ;;  %v5594_v28 = vld [vmem:[#allocation4 + $0x80] ss:$12 sps:$4 sm:$0xff]   ;;  %v5596_v29 = vld [vmem:[#allocation4 + $0x98] ss:$12 sps:$4 sm:$0xff]  }
  0x30   :  { %v5580_v30 = vld [vmem:[#allocation2 + $0x18] sm:$0xff]   ;;  %v5582_v33 = vld [vmem:[#allocation2 + $0x20] sm:$0xff]   ;;  %v5584_v35 = vld [vmem:[#allocation2 + $0x28] sm:$0xff]  }
  0x31   :  { %464 = vmatpush1.bf16.msra.mxu0 %v5558_v6  ;;  %5535 = vmatpush1.bf16.msra.mxu1 %v5558_v6  ;;  %v5745_v31 = vld [vmem:[#allocation2 + $0xd8] sm:$0xff]   ;;  %v5750_v34 = vld [vmem:[#allocation2 + $0xe0] sm:$0xff]   ;;  %v5755_v36 = vld [vmem:[#allocation2 + $0xe8] sm:$0xff]  }
  0x32   :  { %465 = vmatprep.subr.bf16.mxu0 %v5559_v7  ;;  %5528 = vmatprep.subr.bf16.mxu1 %v5559_v7  ;;  %v5597_v32 = vld [vmem:[#allocation4 + $0xb0] ss:$12 sps:$4 sm:$0xff]   ;;  %v5598_v41 = vld [vmem:[#allocation2 + $0x40] sm:$0xff]   ;;  %v5599_v42 = vld [vmem:[#allocation2 + $0x48] sm:$0xff]  }
  0x33   :  { %v5589_v37 = vld [vmem:[#allocation2 + $0x30] sm:$0xff]   ;;  %v5593_v39 = vld [vmem:[#allocation2 + $0x38] sm:$0xff]   ;;  %v5602_v45 = vld [vmem:[#allocation2 + $0x60] sm:$0xff]  }
  0x34   :  { %v5760_v38 = vld [vmem:[#allocation2 + $0xf0] sm:$0xff]   ;;  %v5765_v40 = vld [vmem:[#allocation2 + $0xf8] sm:$0xff]   ;;  %v5603_v46 = vld [vmem:[#allocation2 + $0x68] sm:$0xff]  }
  0x35   :  { %466 = vmatpush1.bf16.msra.mxu0 %v5561_v8  ;;  %5536 = vmatpush1.bf16.msra.mxu1 %v5561_v8  ;;  %v5600_v43 = vld [vmem:[#allocation2 + $0x50] sm:$0xff]   ;;  %v5601_v44 = vld [vmem:[#allocation2 + $0x58] sm:$0xff]   ;;  %v5606_v49 = vld [vmem:[#allocation2 + $0x80] sm:$0xff]  }
  0x36   :  { %467 = vmatprep.subr.bf16.mxu0 %v5562_v9  ;;  %5529 = vmatprep.subr.bf16.mxu1 %v5562_v9  ;;  %v5604_v47 = vld [vmem:[#allocation2 + $0x70] sm:$0xff]   ;;  %v5605_v48 = vld [vmem:[#allocation2 + $0x78] sm:$0xff]   ;;  %v5607_v50 = vld [vmem:[#allocation2 + $0x88] sm:$0xff]  }
  0x37   :  { %v5608_v51 = vld [vmem:[#allocation2 + $0x90] sm:$0xff]   ;;  %v5609_v52 = vld [vmem:[#allocation2 + $0x98] sm:$0xff]   ;;  %v5610_v6 = vld [vmem:[#allocation2 + $0xa0] sm:$0xff]  }
  0x38   :  { %v5611_v9 = vld [vmem:[#allocation2 + $0xa8] sm:$0xff]  }
  0x39   :  { %468 = vmatpush1.bf16.msra.mxu0 %v5564_v10  ;;  %5537 = vmatpush1.bf16.msra.mxu1 %v5564_v10 }
  0x3a   :  { %469 = vmatprep.subr.bf16.mxu0 %v5565_v11  ;;  %5530 = vmatprep.subr.bf16.mxu1 %v5565_v11 }
  0x3d   :  { %470 = vmatpush1.bf16.msra.mxu0 %v5567_v12  ;;  %5538 = vmatpush1.bf16.msra.mxu1 %v5567_v12 }
  0x3e   :  { %471 = vmatprep.subr.bf16.mxu0 %v5568_v13  ;;  %5531 = vmatprep.subr.bf16.mxu1 %v5568_v13 }
  0x41   :  { %472 = vmatpush1.bf16.msra.mxu0 %v5570_v14  ;;  %5539 = vmatpush1.bf16.msra.mxu1 %v5570_v14 }
  0x42   :  { %473 = vmatprep.subr.bf16.mxu0 %v5571_v15  ;;  %5532 = vmatprep.subr.bf16.mxu1 %v5571_v15 }
  0x45   :  { %474 = vmatpush1.bf16.msra.mxu0 %v5573_v16  ;;  %5540 = vmatpush1.bf16.msra.mxu1 %v5573_v16 }
  0x46   :  { %5445 = vmatprep.subr.bf16.mxu1 %v5585_v17 }
  0x48   :  { %492 = vmatmul.mubr.bf16.vlgmr.msra.gmra.mrb[0].mxu0 %v5724_v18  ;;  %732 = vmatmul.mubr.bf16.vlgmr.msra.gmra.mrb[0].mxu1 %v5726_v19 }
  0x49   :  { %501 = vmatprep.mubr.bf16.mxu0 %v5668_v0  ;;  %741 = vmatprep.mubr.bf16.mxu1 %v5668_v0 }
  0x4a   :  { %5446 = vmatpush3.bf16.msra.mxu1 %v5585_v17 }
  0x4b   :  { %5447 = vmatprep.subr.bf16.mxu1 %v5587_v20 }
  0x4e   :  { %5448 = vmatpush3.bf16.msra.mxu1 %v5587_v20 }
  0x4f   :  { %5449 = vmatprep.subr.bf16.mxu1 %v5588_v23 }
  0x50   :  { %502 = vmatmul.mubr.bf16.gmra.mrb[4].mxu0 %v5732_v21  ;;  %742 = vmatmul.mubr.bf16.gmra.mrb[4].mxu1 %v5734_v22 }
  0x51   :  { %511 = vmatprep.mubr.bf16.mxu0 %v5668_v0  ;;  %751 = vmatprep.mubr.bf16.mxu1 %v5668_v0 }
  0x52   :  { %5450 = vmatpush3.bf16.msra.mxu1 %v5588_v23 }
  0x53   :  { %5451 = vmatprep.subr.bf16.mxu1 %v5591_v24 }
  0x56   :  { %5452 = vmatpush3.bf16.msra.mxu1 %v5591_v24 }
  0x57   :  { %5453 = vmatprep.subr.bf16.mxu1 %v5592_v25 }
  0x58   :  { %512 = vmatmul.mubr.bf16.gmra.mrb[8].mxu0 %v5578_v26  ;;  %752 = vmatmul.mubr.bf16.gmra.mrb[8].mxu1 %v5740_v27 }
  0x59   :  { %521 = vmatprep.mubr.bf16.mxu0 %v5668_v0  ;;  %761 = vmatprep.mubr.bf16.mxu1 %v5668_v0 }
  0x5a   :  { %5454 = vmatpush3.bf16.msra.mxu1 %v5592_v25 }
  0x5b   :  { %5455 = vmatprep.subr.bf16.mxu1 %v5594_v28 }
  0x5e   :  { %5456 = vmatpush3.bf16.msra.mxu1 %v5594_v28 }
  0x5f   :  { %5457 = vmatprep.subr.bf16.mxu1 %v5596_v29 }
  0x60   :  { %522 = vmatmul.mubr.bf16.gmra.mrb[12].mxu0 %v5580_v30  ;;  %762 = vmatmul.mubr.bf16.gmra.mrb[12].mxu1 %v5745_v31 }
  0x61   :  { %531 = vmatprep.mubr.bf16.mxu0 %v5668_v0  ;;  %771 = vmatprep.mubr.bf16.mxu1 %v5668_v0 }
  0x62   :  { %5458 = vmatpush3.bf16.msra.mxu1 %v5596_v29 }
  0x63   :  { %5459 = vmatprep.subr.bf16.mxu1 %v5597_v32 }
  0x66   :  { %5460 = vmatpush3.bf16.msra.mxu1 %v5597_v32 }
  0x68   :  { %532 = vmatmul.mubr.bf16.gmra.mrb[16].mxu0 %v5582_v33  ;;  %772 = vmatmul.mubr.bf16.gmra.mrb[16].mxu1 %v5750_v34 }
  0x69   :  { %541 = vmatprep.mubr.bf16.mxu0 %v5668_v0  ;;  %781 = vmatprep.mubr.bf16.mxu1 %v5668_v0 }
  0x70   :  { %542 = vmatmul.mubr.bf16.gmra.mrb[20].mxu0 %v5584_v35  ;;  %782 = vmatmul.mubr.bf16.gmra.mrb[20].mxu1 %v5755_v36 }
  0x71   :  { %551 = vmatprep.mubr.bf16.mxu0 %v5668_v0  ;;  %791 = vmatprep.mubr.bf16.mxu1 %v5668_v0 }
  0x78   :  { %552 = vmatmul.mubr.bf16.gmra.mrb[24].mxu0 %v5589_v37  ;;  %792 = vmatmul.mubr.bf16.gmra.mrb[24].mxu1 %v5760_v38 }
  0x79   :  { %561 = vmatprep.mubr.bf16.mxu0 %v5668_v0  ;;  %801 = vmatprep.mubr.bf16.mxu1 %v5668_v0 }
  0x80   :  { %562 = vmatmul.mubr.bf16.gmra.mrb[28].mxu0 %v5593_v39  ;;  %802 = vmatmul.mubr.bf16.gmra.mrb[28].mxu1 %v5765_v40 }
  0x81   :  { %571 = vmatprep.mubr.bf16.mxu0 %v5668_v0  ;;  %5461 = vmatprep.mubr.bf16.mxu1 %v5724_v18 }
  0x88   :  { %572 = vmatmul.mubr.bf16.gmra.mrb[32].mxu0 %v5598_v41  ;;  %5462 = vmatmul.mubr.bf16.vlgmr.msra.gmra.mrb[32].mxu1 %v5732_v21 }
  0x89   :  { %581 = vmatprep.mubr.bf16.mxu0 %v5668_v0  ;;  %5465 = vmatprep.mubr.bf16.mxu1 %v5578_v26 }
  0x90   :  { %582 = vmatmul.mubr.bf16.gmra.mrb[36].mxu0 %v5599_v42  ;;  %5466 = vmatmul.mubr.bf16.gmra.mrb[36].mxu1 %v5580_v30 }
  0x91   :  { %591 = vmatprep.mubr.bf16.mxu0 %v5668_v0  ;;  %5469 = vmatprep.mubr.bf16.mxu1 %v5582_v33 }
  0x98   :  { %592 = vmatmul.mubr.bf16.gmra.mrb[40].mxu0 %v5600_v43  ;;  %5470 = vmatmul.mubr.bf16.gmra.mrb[40].mxu1 %v5584_v35 }
  0x99   :  { %601 = vmatprep.mubr.bf16.mxu0 %v5668_v0  ;;  %5473 = vmatprep.mubr.bf16.mxu1 %v5589_v37 }
  0xa0   :  { %5474 = vmatmul.mubr.bf16.gmra.mrb[44].mxu1 %v5593_v39  ;;  %602 = vmatmul.mubr.bf16.gmra.mrb[44].mxu0 %v5601_v44 }
  0xa1   :  { %5477 = vmatprep.mubr.bf16.mxu1 %v5598_v41  ;;  %611 = vmatprep.mubr.bf16.mxu0 %v5668_v0 }
  0xa8   :  { %5478 = vmatmul.mubr.bf16.gmra.mrb[48].mxu1 %v5599_v42  ;;  %612 = vmatmul.mubr.bf16.gmra.mrb[48].mxu0 %v5602_v45 }
  0xa9   :  { %5481 = vmatprep.mubr.bf16.mxu1 %v5600_v43  ;;  %621 = vmatprep.mubr.bf16.mxu0 %v5668_v0 }
  0xb0   :  { %5482 = vmatmul.mubr.bf16.gmra.mrb[52].mxu1 %v5601_v44  ;;  %622 = vmatmul.mubr.bf16.gmra.mrb[52].mxu0 %v5603_v46 }
  0xb1   :  { %5485 = vmatprep.mubr.bf16.mxu1 %v5602_v45  ;;  %631 = vmatprep.mubr.bf16.mxu0 %v5668_v0 }
  0xb8   :  { %5486 = vmatmul.mubr.bf16.gmra.mrb[56].mxu1 %v5603_v46  ;;  %632 = vmatmul.mubr.bf16.gmra.mrb[56].mxu0 %v5604_v47 }
  0xb9   :  { %5489 = vmatprep.mubr.bf16.mxu1 %v5604_v47  ;;  %641 = vmatprep.mubr.bf16.mxu0 %v5668_v0 }
  0xc0   :  { %642 = vmatmul.mubr.bf16.gmra.mrb[60].mxu0 %v5605_v48  ;;  %5490 = vmatmul.mubr.bf16.gmra.mrb[60].mxu1 %v5605_v48  ;;  %v5612_v48 = vld [vmem:[#allocation2 + $0xb0] sm:$0xff]  }
  0xc1   :  { %651 = vmatprep.mubr.bf16.mxu0 %v5668_v0  ;;  %5493 = vmatprep.mubr.bf16.mxu1 %v5606_v49 }
  0xc8   :  { %652 = vmatmul.mubr.bf16.gmra.mrb[64].mxu0 %v5606_v49  ;;  %5494 = vmatmul.mubr.bf16.gmra.mrb[64].mxu1 %v5607_v50 }
  0xc9   :  { %661 = vmatprep.mubr.bf16.mxu0 %v5668_v0  ;;  %5497 = vmatprep.mubr.bf16.mxu1 %v5608_v51 }
  0xd0   :  { %662 = vmatmul.mubr.bf16.gmra.mrb[68].mxu0 %v5607_v50  ;;  %5498 = vmatmul.mubr.bf16.gmra.mrb[68].mxu1 %v5609_v52 }
  0xd1   :  { %671 = vmatprep.mubr.bf16.mxu0 %v5668_v0  ;;  %5501 = vmatprep.mubr.bf16.mxu1 %v5610_v6 }
  0xd8   :  { %672 = vmatmul.mubr.bf16.gmra.mrb[72].mxu0 %v5608_v51  ;;  %5502 = vmatmul.mubr.bf16.gmra.mrb[72].mxu1 %v5611_v9  ;;  %v5613_v51 = vld [vmem:[#allocation2 + $0xb8] sm:$0xff]  }
  0xd9   :  { %681 = vmatprep.mubr.bf16.mxu0 %v5668_v0  ;;  %5505 = vmatprep.mubr.bf16.mxu1 %v5612_v48 }
  0xe0   :  { %682 = vmatmul.mubr.bf16.gmra.mrb[76].mxu0 %v5609_v52  ;;  %5506 = vmatmul.mubr.bf16.gmra.mrb[76].mxu1 %v5613_v51 }
  0xe1   :  { %691 = vmatprep.mubr.bf16.mxu0 %v5668_v0  ;;  %5509 = vmatprep.mubr.bf16.mxu1 %v5726_v19 }
  0xe8   :  { %692 = vmatmul.mubr.bf16.gmra.mrb[80].mxu0 %v5610_v6  ;;  %5510 = vmatmul.mubr.bf16.gmra.mrb[80].mxu1 %v5734_v22 }
  0xe9   :  { %701 = vmatprep.mubr.bf16.mxu0 %v5668_v0  ;;  %5513 = vmatprep.mubr.bf16.mxu1 %v5740_v27 }
  0xf0   :  { %702 = vmatmul.mubr.bf16.gmra.mrb[84].mxu0 %v5611_v9  ;;  %5514 = vmatmul.mubr.bf16.gmra.mrb[84].mxu1 %v5745_v31 }
  0xf1   :  { %711 = vmatprep.mubr.bf16.mxu0 %v5668_v0  ;;  %5517 = vmatprep.mubr.bf16.mxu1 %v5750_v34 }
  0xf8   :  { %712 = vmatmul.mubr.bf16.gmra.mrb[88].mxu0 %v5612_v48  ;;  %5518 = vmatmul.mubr.bf16.gmra.mrb[88].mxu1 %v5755_v36 }
  0xf9   :  { %721 = vmatprep.mubr.bf16.mxu0 %v5668_v0  ;;  %5521 = vmatprep.mubr.bf16.mxu1 %v5760_v38 }
 0x100   :  { %722 = vmatmul.mubr.bf16.gmra.mrb[92].mxu0 %v5613_v51  ;;  %5522 = vmatmul.mubr.bf16.gmra.mrb[92].mxu1 %v5765_v40 }
 0x11b   :  { %v493_v53 = vpop.f32.mrb[0].mxu0  ;;  %v733_v54 = vpop.f32.mrb[0].mxu1 }
 0x11c   :  { %v5782_v55 = vpack.c.bf16 %v493_v53, %v493_v53  ;;  %v5784_v56 = vpack.c.bf16 %v733_v54, %v733_v54  ;;  %v495_v57 = vpop.f32.mrb[1].mxu0  ;;  %v735_v58 = vpop.f32.mrb[1].mxu1 }
 0x11d   :  { %v5786_v59 = vpack.c.bf16 %v495_v57, %v495_v57  ;;  %v5788_v60 = vpack.c.bf16 %v735_v58, %v735_v58  ;;  %v497_v61 = vpop.f32.mrb[2].mxu0  ;;  %v737_v62 = vpop.f32.mrb[2].mxu1 }
 0x11e   :  { %10870 = vst [vmem:[#allocation8_spill] sm:$0xff] %v5782_v55  ;;  %10871 = vst [vmem:[#allocation9_spill] sm:$0xff] %v5784_v56  ;;  %v5801_v63 = vpack.c.bf16 %v497_v61, %v497_v61  ;;  %v5803_v1 = vpack.c.bf16 %v737_v62, %v737_v62  ;;  %v739_v2 = vpop.f32.mrb[3].mxu1  ;;  %2062 = vrot.lane.b32.xlu0 %v5782_v55, %s5669_s19  ;;  %v499_v3 = vpop.f32.mrb[3].mxu0 }
 0x11f   :  { %10872 = vst [vmem:[#allocation10_spill] sm:$0xff] %v5786_v59  ;;  %10873 = vst [vmem:[#allocation11_spill] sm:$0xff] %v5788_v60  ;;  %v5817_v4 = vpack.c.bf16 %v739_v2, %v739_v2  ;;  %v5819_v5 = vpack.c.bf16 %v499_v3, %v499_v3 }
 0x120   :  { %1358 = vst.msk [vmem:[%s10596_s2] sm:$0xf] %vm1357_vm0, %v5782_v55  ;;  %1406 = vst.msk [vmem:[%s10596_s2 + $0xc0] sm:$0xf] %vm1357_vm0, %v5784_v56  ;;  %2160 = vrot.lane.b32.xlu1 %v5803_v1, %s5669_s19 }
 0x121   :  { %10874 = vst [vmem:[#allocation12_spill] sm:$0xff] %v5801_v63  ;;  %10875 = vst [vmem:[#allocation13_spill] sm:$0xff] %v5803_v1 }
 0x122   :  { %1678 = vst.msk [vmem:[%s10597_s3] sm:$0xf] %vm1357_vm0, %v5786_v59  ;;  %1726 = vst.msk [vmem:[%s10597_s3 + $0xc0] sm:$0xf] %vm1357_vm0, %v5788_v60  ;;  %2158 = vrot.lane.b32.xlu0 %v5784_v56, %s5669_s19 }
 0x123   :  { %10876 = vst [vmem:[#allocation14_spill] sm:$0xff] %v5817_v4  ;;  %10877 = vst [vmem:[#allocation15_spill] sm:$0xff] %v5819_v5  ;;  %v503_v7 = vpop.f32.mrb[4].mxu0  ;;  %v743_v8 = vpop.f32.mrb[4].mxu1 }
 0x124   :  { %1359 = vst.msk [vmem:[%s10596_s2 + $0x4] sm:$0xf] %vm1357_vm0, %v5801_v63  ;;  %1407 = vst.msk [vmem:[%s10596_s2 + $0xc4] sm:$0xf] %vm1357_vm0, %v5803_v1  ;;  %2835 = vrot.lane.b32.xlu1 %v5801_v63, %s5663_s25  ;;  %v5847_v10 = vpack.c.bf16 %v503_v7, %v503_v7  ;;  %v505_v11 = vpop.f32.mrb[5].mxu0  ;;  %v5849_v12 = vpack.c.bf16 %v743_v8, %v743_v8  ;;  %v745_v13 = vpop.f32.mrb[5].mxu1 }
 0x125   :  { %1727 = vst.msk [vmem:[%s10597_s3 + $0xc4] sm:$0xf] %vm1357_vm0, %v5817_v4  ;;  %1679 = vst.msk [vmem:[%s10597_s3 + $0x4] sm:$0xf] %vm1357_vm0, %v5819_v5  ;;  %v5851_v14 = vpack.c.bf16 %v505_v11, %v505_v11  ;;  %v507_v15 = vpop.f32.mrb[6].mxu0  ;;  %v5853_v16 = vpack.c.bf16 %v745_v13, %v745_v13  ;;  %v747_v17 = vpop.f32.mrb[6].mxu1 }
 0x126   :  { %10878 = vst [vmem:[#allocation16_spill] sm:$0xff] %v5847_v10  ;;  %10879 = vst [vmem:[#allocation17_spill] sm:$0xff] %v5849_v12  ;;  %2833 = vrot.lane.b32.xlu0 %v5782_v55, %s5663_s25  ;;  %v5862_v18 = vpack.c.bf16 %v507_v15, %v507_v15  ;;  %v509_v20 = vpop.f32.mrb[7].mxu0  ;;  %v5869_v21 = vpack.c.bf16 %v747_v17, %v747_v17  ;;  %v749_v23 = vpop.f32.mrb[7].mxu1 }
 0x127   :  { %10880 = vst [vmem:[#allocation18_spill] sm:$0xff] %v5851_v14  ;;  %10881 = vst [vmem:[#allocation19_spill] sm:$0xff] %v5853_v16  ;;  %v5877_v24 = vpack.c.bf16 %v509_v20, %v509_v20  ;;  %v5884_v25 = vpack.c.bf16 %v749_v23, %v749_v23 }
 0x128   :  { %1360 = vst.msk [vmem:[%s10596_s2 + $0x8] sm:$0xf] %vm1357_vm0, %v5847_v10  ;;  %10882 = vst [vmem:[#allocation20_spill] sm:$0xff] %v5862_v18  ;;  %2321 = vrot.lane.b32.xlu1 %v5819_v5, %s5669_s19 }
 0x129   :  { %1408 = vst.msk [vmem:[%s10596_s2 + $0xc8] sm:$0xf] %vm1357_vm0, %v5849_v12  ;;  %10883 = vst [vmem:[#allocation21_spill] sm:$0xff] %v5869_v21 }
 0x12a   :  { %1680 = vst.msk [vmem:[%s10597_s3 + $0x8] sm:$0xf] %vm1357_vm0, %v5851_v14  ;;  %10884 = vst [vmem:[#allocation22_spill] sm:$0xff] %v5877_v24  ;;  %2319 = vrot.lane.b32.xlu0 %v5786_v59, %s5669_s19 }
 0x12b   :  { %1728 = vst.msk [vmem:[%s10597_s3 + $0xc8] sm:$0xf] %vm1357_vm0, %v5853_v16  ;;  %10885 = vst [vmem:[#allocation23_spill] sm:$0xff] %v5884_v25  ;;  %v513_v26 = vpop.f32.mrb[8].mxu0  ;;  %v753_v28 = vpop.f32.mrb[8].mxu1 }
 0x12c   :  { %1361 = vst.msk [vmem:[%s10596_s2 + $0xc] sm:$0xf] %vm1357_vm0, %v5862_v18  ;;  %1409 = vst.msk [vmem:[%s10596_s2 + $0xcc] sm:$0xf] %vm1357_vm0, %v5869_v21  ;;  %2417 = vrot.lane.b32.xlu1 %v5817_v4, %s5669_s19  ;;  %v5912_v29 = vpack.c.bf16 %v513_v26, %v513_v26  ;;  %v515_v30 = vpop.f32.mrb[9].mxu0  ;;  %v5914_v32 = vpack.c.bf16 %v753_v28, %v753_v28  ;;  %v755_v33 = vpop.f32.mrb[9].mxu1 }
 0x12d   :  { %1681 = vst.msk [vmem:[%s10597_s3 + $0xc] sm:$0xf] %vm1357_vm0, %v5877_v24  ;;  %1729 = vst.msk [vmem:[%s10597_s3 + $0xcc] sm:$0xf] %vm1357_vm0, %v5884_v25  ;;  %v5916_v35 = vpack.c.bf16 %v515_v30, %v515_v30  ;;  %v517_v37 = vpop.f32.mrb[10].mxu0  ;;  %v5918_v39 = vpack.c.bf16 %v755_v33, %v755_v33  ;;  %v757_v41 = vpop.f32.mrb[10].mxu1 }
 0x12e   :  { %10886 = vst [vmem:[#allocation24_spill] sm:$0xff] %v5912_v29  ;;  %10887 = vst [vmem:[#allocation25_spill] sm:$0xff] %v5914_v32  ;;  %2415 = vrot.lane.b32.xlu0 %v5788_v60, %s5669_s19  ;;  %v5927_v42 = vpack.c.bf16 %v517_v37, %v517_v37  ;;  %v519_v43 = vpop.f32.mrb[11].mxu0  ;;  %v5934_v44 = vpack.c.bf16 %v757_v41, %v757_v41  ;;  %v759_v45 = vpop.f32.mrb[11].mxu1 }
 0x12f   :  { %10888 = vst [vmem:[#allocation26_spill] sm:$0xff] %v5916_v35  ;;  %10889 = vst [vmem:[#allocation27_spill] sm:$0xff] %v5918_v39  ;;  %v5942_v46 = vpack.c.bf16 %v519_v43, %v519_v43  ;;  %v5949_v47 = vpack.c.bf16 %v759_v45, %v759_v45 }
 0x130   :  { %1362 = vst.msk [vmem:[%s10596_s2 + $0x10] sm:$0xf] %vm1357_vm0, %v5912_v29  ;;  %10890 = vst [vmem:[#allocation28_spill] sm:$0xff] %v5927_v42  ;;  %2066 = vrot.lane.b32.xlu1 %v5847_v10, %s5669_s19 }
 0x131   :  { %1410 = vst.msk [vmem:[%s10596_s2 + $0xd0] sm:$0xf] %vm1357_vm0, %v5914_v32  ;;  %10891 = vst [vmem:[#allocation29_spill] sm:$0xff] %v5934_v44 }
 0x132   :  { %1682 = vst.msk [vmem:[%s10597_s3 + $0x10] sm:$0xf] %vm1357_vm0, %v5916_v35  ;;  %10892 = vst [vmem:[#allocation30_spill] sm:$0xff] %v5942_v46  ;;  %2064 = vrot.lane.b32.xlu0 %v5801_v63, %s5669_s19 }
 0x133   :  { %1730 = vst.msk [vmem:[%s10597_s3 + $0xd0] sm:$0xf] %vm1357_vm0, %v5918_v39  ;;  %10893 = vst [vmem:[#allocation31_spill] sm:$0xff] %v5949_v47  ;;  %v523_v49 = vpop.f32.mrb[12].mxu0  ;;  %v763_v50 = vpop.f32.mrb[12].mxu1 }
 0x134   :  { %1363 = vst.msk [vmem:[%s10596_s2 + $0x14] sm:$0xf] %vm1357_vm0, %v5927_v42  ;;  %1411 = vst.msk [vmem:[%s10596_s2 + $0xd4] sm:$0xf] %vm1357_vm0, %v5934_v44  ;;  %2068 = vrot.lane.b32.xlu1 %v5862_v18, %s5669_s19  ;;  %v5977_v52 = vpack.c.bf16 %v523_v49, %v523_v49  ;;  %v525_v53 = vpop.f32.mrb[13].mxu0  ;;  %v5979_v54 = vpack.c.bf16 %v763_v50, %v763_v50  ;;  %v765_v57 = vpop.f32.mrb[13].mxu1 }
 0x135   :  { %1683 = vst.msk [vmem:[%s10597_s3 + $0x14] sm:$0xf] %vm1357_vm0, %v5942_v46  ;;  %1731 = vst.msk [vmem:[%s10597_s3 + $0xd4] sm:$0xf] %vm1357_vm0, %v5949_v47  ;;  %v5981_v58 = vpack.c.bf16 %v525_v53, %v525_v53  ;;  %v527_v61 = vpop.f32.mrb[14].mxu0  ;;  %v5983_v62 = vpack.c.bf16 %v765_v57, %v765_v57  ;;  %v767_v2 = vpop.f32.mrb[14].mxu1 }
 0x136   :  { %10894 = vst [vmem:[#allocation32_spill] sm:$0xff] %v5977_v52  ;;  %10895 = vst [vmem:[#allocation33_spill] sm:$0xff] %v5979_v54  ;;  %2162 = vrot.lane.b32.xlu0 %v5849_v12, %s5669_s19  ;;  %v5992_v3 = vpack.c.bf16 %v527_v61, %v527_v61  ;;  %v529_v6 = vpop.f32.mrb[15].mxu0  ;;  %v5999_v7 = vpack.c.bf16 %v767_v2, %v767_v2  ;;  %v769_v8 = vpop.f32.mrb[15].mxu1 }
 0x137   :  { %10896 = vst [vmem:[#allocation34_spill] sm:$0xff] %v5981_v58  ;;  %10897 = vst [vmem:[#allocation35_spill] sm:$0xff] %v5983_v62  ;;  %v6007_v9 = vpack.c.bf16 %v529_v6, %v529_v6  ;;  %v6014_v11 = vpack.c.bf16 %v769_v8, %v769_v8 }
 0x138   :  { %1364 = vst.msk [vmem:[%s10596_s2 + $0x18] sm:$0xf] %vm1357_vm0, %v5977_v52  ;;  %10898 = vst [vmem:[#allocation36_spill] sm:$0xff] %v5992_v3  ;;  %2164 = vrot.lane.b32.xlu1 %v5869_v21, %s5669_s19 }
 0x139   :  { %1412 = vst.msk [vmem:[%s10596_s2 + $0xd8] sm:$0xf] %vm1357_vm0, %v5979_v54  ;;  %10899 = vst [vmem:[#allocation37_spill] sm:$0xff] %v5999_v7 }
 0x13a   :  { %1684 = vst.msk [vmem:[%s10597_s3 + $0x18] sm:$0xf] %vm1357_vm0, %v5981_v58  ;;  %10900 = vst [vmem:[#allocation38_spill] sm:$0xff] %v6007_v9  ;;  %2837 = vrot.lane.b32.xlu0 %v5847_v10, %s5663_s25 }
 0x13b   :  { %1732 = vst.msk [vmem:[%s10597_s3 + $0xd8] sm:$0xf] %vm1357_vm0, %v5983_v62  ;;  %10901 = vst [vmem:[#allocation39_spill] sm:$0xff] %v6014_v11  ;;  %v533_v0 = vpop.f32.mrb[16].mxu0  ;;  %v773_v19 = vpop.f32.mrb[16].mxu1 }
 0x13c   :  { %1365 = vst.msk [vmem:[%s10596_s2 + $0x1c] sm:$0xf] %vm1357_vm0, %v5992_v3  ;;  %1413 = vst.msk [vmem:[%s10596_s2 + $0xdc] sm:$0xf] %vm1357_vm0, %v5999_v7  ;;  %2839 = vrot.lane.b32.xlu1 %v5862_v18, %s5663_s25  ;;  %v6043_v13 = vpack.c.bf16 %v533_v0, %v533_v0  ;;  %v535_v15 = vpop.f32.mrb[17].mxu0  ;;  %v6045_v17 = vpack.c.bf16 %v773_v19, %v773_v19  ;;  %v775_v20 = vpop.f32.mrb[17].mxu1 }
 0x13d   :  { %1685 = vst.msk [vmem:[%s10597_s3 + $0x1c] sm:$0xf] %vm1357_vm0, %v6007_v9  ;;  %1733 = vst.msk [vmem:[%s10597_s3 + $0xdc] sm:$0xf] %vm1357_vm0, %v6014_v11  ;;  %v6047_v23 = vpack.c.bf16 %v535_v15, %v535_v15  ;;  %v537_v26 = vpop.f32.mrb[18].mxu0  ;;  %v6049_v28 = vpack.c.bf16 %v775_v20, %v775_v20  ;;  %v777_v30 = vpop.f32.mrb[18].mxu1 }
 0x13e   :  { %10902 = vst [vmem:[#allocation40_spill] sm:$0xff] %v6043_v13  ;;  %10903 = vst [vmem:[#allocation41_spill] sm:$0xff] %v6045_v17  ;;  %2323 = vrot.lane.b32.xlu0 %v5851_v14, %s5669_s19  ;;  %v6059_v33 = vpack.c.bf16 %v537_v26, %v537_v26  ;;  %v539_v37 = vpop.f32.mrb[19].mxu0  ;;  %v6066_v22 = vpack.c.bf16 %v777_v30, %v777_v30  ;;  %v779_v41 = vpop.f32.mrb[19].mxu1 }
 0x13f   :  { %10904 = vst [vmem:[#allocation42_spill] sm:$0xff] %v6047_v23  ;;  %10905 = vst [vmem:[#allocation43_spill] sm:$0xff] %v6049_v28  ;;  %v6074_v43 = vpack.c.bf16 %v539_v37, %v539_v37  ;;  %v6081_v45 = vpack.c.bf16 %v779_v41, %v779_v41 }
 0x140   :  { %1366 = vst.msk [vmem:[%s10596_s2 + $0x20] sm:$0xf] %vm1357_vm0, %v6043_v13  ;;  %10906 = vst [vmem:[#allocation44_spill] sm:$0xff] %v6059_v33  ;;  %2325 = vrot.lane.b32.xlu1 %v5877_v24, %s5669_s19 }
 0x141   :  { %1414 = vst.msk [vmem:[%s10596_s2 + $0xe0] sm:$0xf] %vm1357_vm0, %v6045_v17  ;;  %10907 = vst [vmem:[#allocation45_spill] sm:$0xff] %v6066_v22 }
 0x142   :  { %1686 = vst.msk [vmem:[%s10597_s3 + $0x20] sm:$0xf] %vm1357_vm0, %v6047_v23  ;;  %10908 = vst [vmem:[#allocation46_spill] sm:$0xff] %v6074_v43  ;;  %2419 = vrot.lane.b32.xlu0 %v5853_v16, %s5669_s19 }
 0x143   :  { %1734 = vst.msk [vmem:[%s10597_s3 + $0xe0] sm:$0xf] %vm1357_vm0, %v6049_v28  ;;  %10909 = vst [vmem:[#allocation47_spill] sm:$0xff] %v6081_v45  ;;  %v543_v27 = vpop.f32.mrb[20].mxu0  ;;  %v783_v48 = vpop.f32.mrb[20].mxu1 }
 0x144   :  { %1367 = vst.msk [vmem:[%s10596_s2 + $0x24] sm:$0xf] %vm1357_vm0, %v6059_v33  ;;  %1415 = vst.msk [vmem:[%s10596_s2 + $0xe4] sm:$0xf] %vm1357_vm0, %v6066_v22  ;;  %2421 = vrot.lane.b32.xlu1 %v5884_v25, %s5669_s19  ;;  %v6109_v49 = vpack.c.bf16 %v543_v27, %v543_v27  ;;  %v545_v50 = vpop.f32.mrb[21].mxu0  ;;  %v6111_v51 = vpack.c.bf16 %v783_v48, %v783_v48  ;;  %v785_v53 = vpop.f32.mrb[21].mxu1 }
 0x145   :  { %1687 = vst.msk [vmem:[%s10597_s3 + $0x24] sm:$0xf] %vm1357_vm0, %v6074_v43  ;;  %1735 = vst.msk [vmem:[%s10597_s3 + $0xe4] sm:$0xf] %vm1357_vm0, %v6081_v45  ;;  %v6113_v57 = vpack.c.bf16 %v545_v50, %v545_v50  ;;  %v547_v61 = vpop.f32.mrb[22].mxu0  ;;  %v6115_v2 = vpack.c.bf16 %v785_v53, %v785_v53  ;;  %v787_v6 = vpop.f32.mrb[22].mxu1 }
 0x146   :  { %10910 = vst [vmem:[#allocation48_spill] sm:$0xff] %v6109_v49  ;;  %10911 = vst [vmem:[#allocation49_spill] sm:$0xff] %v6111_v51  ;;  %2070 = vrot.lane.b32.xlu0 %v5912_v29, %s5669_s19  ;;  %v6125_v8 = vpack.c.bf16 %v547_v61, %v547_v61  ;;  %v549_v0 = vpop.f32.mrb[23].mxu0  ;;  %v6132_v19 = vpack.c.bf16 %v787_v6, %v787_v6  ;;  %v789_v31 = vpop.f32.mrb[23].mxu1 }
 0x147   :  { %10912 = vst [vmem:[#allocation50_spill] sm:$0xff] %v6113_v57  ;;  %10913 = vst [vmem:[#allocation51_spill] sm:$0xff] %v6115_v2  ;;  %v6140_v15 = vpack.c.bf16 %v549_v0, %v549_v0  ;;  %v6147_v20 = vpack.c.bf16 %v789_v31, %v789_v31 }
 0x148   :  { %1368 = vst.msk [vmem:[%s10596_s2 + $0x28] sm:$0xf] %vm1357_vm0, %v6109_v49  ;;  %10914 = vst [vmem:[#allocation52_spill] sm:$0xff] %v6125_v8  ;;  %2072 = vrot.lane.b32.xlu1 %v5927_v42, %s5669_s19 }
 0x149   :  { %1416 = vst.msk [vmem:[%s10596_s2 + $0xe8] sm:$0xf] %vm1357_vm0, %v6111_v51  ;;  %10915 = vst [vmem:[#allocation53_spill] sm:$0xff] %v6132_v19 }
 0x14a   :  { %1688 = vst.msk [vmem:[%s10597_s3 + $0x28] sm:$0xf] %vm1357_vm0, %v6113_v57  ;;  %10916 = vst [vmem:[#allocation54_spill] sm:$0xff] %v6140_v15  ;;  %2166 = vrot.lane.b32.xlu0 %v5914_v32, %s5669_s19 }
 0x14b   :  { %1736 = vst.msk [vmem:[%s10597_s3 + $0xe8] sm:$0xf] %vm1357_vm0, %v6115_v2  ;;  %10917 = vst [vmem:[#allocation55_spill] sm:$0xff] %v6147_v20  ;;  %v553_v34 = vpop.f32.mrb[24].mxu0  ;;  %v793_v26 = vpop.f32.mrb[24].mxu1 }
 0x14c   :  { %1369 = vst.msk [vmem:[%s10596_s2 + $0x2c] sm:$0xf] %vm1357_vm0, %v6125_v8  ;;  %1417 = vst.msk [vmem:[%s10596_s2 + $0xec] sm:$0xf] %vm1357_vm0, %v6132_v19  ;;  %2168 = vrot.lane.b32.xlu1 %v5934_v44, %s5669_s19  ;;  %v6175_v30 = vpack.c.bf16 %v553_v34, %v553_v34  ;;  %v555_v37 = vpop.f32.mrb[25].mxu0  ;;  %v6177_v41 = vpack.c.bf16 %v793_v26, %v793_v26  ;;  %v795_v27 = vpop.f32.mrb[25].mxu1 }
 0x14d   :  { %1689 = vst.msk [vmem:[%s10597_s3 + $0x2c] sm:$0xf] %vm1357_vm0, %v6140_v15  ;;  %1737 = vst.msk [vmem:[%s10597_s3 + $0xec] sm:$0xf] %vm1357_vm0, %v6147_v20  ;;  %v6179_v48 = vpack.c.bf16 %v555_v37, %v555_v37  ;;  %v557_v50 = vpop.f32.mrb[26].mxu0  ;;  %v6181_v53 = vpack.c.bf16 %v795_v27, %v795_v27  ;;  %v797_v61 = vpop.f32.mrb[26].mxu1 }
 0x14e   :  { %10918 = vst [vmem:[#allocation56_spill] sm:$0xff] %v6175_v30  ;;  %10919 = vst [vmem:[#allocation57_spill] sm:$0xff] %v6177_v41  ;;  %2841 = vrot.lane.b32.xlu0 %v5912_v29, %s5663_s25  ;;  %v6191_v6 = vpack.c.bf16 %v557_v50, %v557_v50  ;;  %v559_v0 = vpop.f32.mrb[27].mxu0  ;;  %v6198_v31 = vpack.c.bf16 %v797_v61, %v797_v61  ;;  %v799_v36 = vpop.f32.mrb[27].mxu1 }
 0x14f   :  { %10920 = vst [vmem:[#allocation58_spill] sm:$0xff] %v6179_v48  ;;  %10921 = vst [vmem:[#allocation59_spill] sm:$0xff] %v6181_v53  ;;  %v6206_v34 = vpack.c.bf16 %v559_v0, %v559_v0  ;;  %v6213_v26 = vpack.c.bf16 %v799_v36, %v799_v36 }
 0x150   :  { %1370 = vst.msk [vmem:[%s10596_s2 + $0x30] sm:$0xf] %vm1357_vm0, %v6175_v30  ;;  %10922 = vst [vmem:[#allocation60_spill] sm:$0xff] %v6191_v6  ;;  %2843 = vrot.lane.b32.xlu1 %v5927_v42, %s5663_s25 }
 0x151   :  { %1418 = vst.msk [vmem:[%s10596_s2 + $0xf0] sm:$0xf] %vm1357_vm0, %v6177_v41  ;;  %10923 = vst [vmem:[#allocation61_spill] sm:$0xff] %v6198_v31 }
 0x152   :  { %1690 = vst.msk [vmem:[%s10597_s3 + $0x30] sm:$0xf] %vm1357_vm0, %v6179_v48  ;;  %10924 = vst [vmem:[#allocation62_spill] sm:$0xff] %v6206_v34  ;;  %2327 = vrot.lane.b32.xlu0 %v5916_v35, %s5669_s19 }
 0x153   :  { %1738 = vst.msk [vmem:[%s10597_s3 + $0xf0] sm:$0xf] %vm1357_vm0, %v6181_v53  ;;  %10925 = vst [vmem:[#allocation63_spill] sm:$0xff] %v6213_v26  ;;  %v563_v38 = vpop.f32.mrb[28].mxu0  ;;  %v803_v37 = vpop.f32.mrb[28].mxu1 }
 0x154   :  { %1371 = vst.msk [vmem:[%s10596_s2 + $0x34] sm:$0xf] %vm1357_vm0, %v6191_v6  ;;  %1419 = vst.msk [vmem:[%s10596_s2 + $0xf4] sm:$0xf] %vm1357_vm0, %v6198_v31  ;;  %2329 = vrot.lane.b32.xlu1 %v5942_v46, %s5669_s19  ;;  %v6241_v27 = vpack.c.bf16 %v563_v38, %v563_v38  ;;  %v565_v50 = vpop.f32.mrb[29].mxu0  ;;  %v6243_v61 = vpack.c.bf16 %v803_v37, %v803_v37  ;;  %v805_v0 = vpop.f32.mrb[29].mxu1 }
 0x155   :  { %1691 = vst.msk [vmem:[%s10597_s3 + $0x34] sm:$0xf] %vm1357_vm0, %v6206_v34  ;;  %1739 = vst.msk [vmem:[%s10597_s3 + $0xf4] sm:$0xf] %vm1357_vm0, %v6213_v26  ;;  %v6245_v36 = vpack.c.bf16 %v565_v50, %v565_v50  ;;  %v567_v42 = vpop.f32.mrb[30].mxu0  ;;  %v6247_v29 = vpack.c.bf16 %v805_v0, %v805_v0  ;;  %v807_v18 = vpop.f32.mrb[30].mxu1 }
 0x156   :  { %10926 = vst [vmem:[#allocation64_spill] sm:$0xff] %v6241_v27  ;;  %10927 = vst [vmem:[#allocation65_spill] sm:$0xff] %v6243_v61  ;;  %2423 = vrot.lane.b32.xlu0 %v5918_v39, %s5669_s19  ;;  %v6257_v38 = vpack.c.bf16 %v567_v42, %v567_v42  ;;  %v569_v37 = vpop.f32.mrb[31].mxu0  ;;  %v6264_v50 = vpack.c.bf16 %v807_v18, %v807_v18  ;;  %v809_v40 = vpop.f32.mrb[31].mxu1 }
 0x157   :  { %10928 = vst [vmem:[#allocation66_spill] sm:$0xff] %v6245_v36  ;;  %10929 = vst [vmem:[#allocation67_spill] sm:$0xff] %v6247_v29  ;;  %v6271_v0 = vpack.c.bf16 %v569_v37, %v569_v37  ;;  %v6278_v42 = vpack.c.bf16 %v809_v40, %v809_v40 }
 0x158   :  { %1372 = vst.msk [vmem:[%s10596_s2 + $0x38] sm:$0xf] %vm1357_vm0, %v6241_v27  ;;  %10930 = vst [vmem:[#allocation68_spill] sm:$0xff] %v6257_v38  ;;  %2425 = vrot.lane.b32.xlu1 %v5949_v47, %s5669_s19 }
 0x159   :  { %1420 = vst.msk [vmem:[%s10596_s2 + $0xf8] sm:$0xf] %vm1357_vm0, %v6243_v61  ;;  %10931 = vst [vmem:[#allocation69_spill] sm:$0xff] %v6264_v50 }
 0x15a   :  { %1692 = vst.msk [vmem:[%s10597_s3 + $0x38] sm:$0xf] %vm1357_vm0, %v6245_v36  ;;  %10932 = vst [vmem:[#allocation70_spill] sm:$0xff] %v6271_v0  ;;  %2074 = vrot.lane.b32.xlu0 %v5977_v52, %s5669_s19 }
 0x15b   :  { %1740 = vst.msk [vmem:[%s10597_s3 + $0xf8] sm:$0xf] %vm1357_vm0, %v6247_v29  ;;  %10933 = vst [vmem:[#allocation71_spill] sm:$0xff] %v6278_v42  ;;  %v573_v18 = vpop.f32.mrb[32].mxu0  ;;  %v5463_v37 = vpop.f32.mrb[32].mxu1 }
 0x15c   :  { %1373 = vst.msk [vmem:[%s10596_s2 + $0x3c] sm:$0xf] %vm1357_vm0, %v6257_v38  ;;  %1421 = vst.msk [vmem:[%s10596_s2 + $0xfc] sm:$0xf] %vm1357_vm0, %v6264_v50  ;;  %2076 = vrot.lane.b32.xlu1 %v5992_v3, %s5669_s19  ;;  %v6306_v40 = vpack.c.bf16 %v573_v18, %v573_v18  ;;  %v575_v10 = vpop.f32.mrb[33].mxu0  ;;  %v6308_v63 = vpack.c.bf16 %v5463_v37, %v5463_v37  ;;  %v846_v55 = vpop.f32.mrb[33].mxu1 }
 0x15d   :  { %1693 = vst.msk [vmem:[%s10597_s3 + $0x3c] sm:$0xf] %vm1357_vm0, %v6271_v0  ;;  %1741 = vst.msk [vmem:[%s10597_s3 + $0xfc] sm:$0xf] %vm1357_vm0, %v6278_v42  ;;  %v6310_v47 = vpack.c.bf16 %v575_v10, %v575_v10  ;;  %v577_v39 = vpop.f32.mrb[34].mxu0  ;;  %v6312_v25 = vpack.c.bf16 %v846_v55, %v846_v55  ;;  %v5464_v16 = vpop.f32.mrb[34].mxu1 }
 0x15e   :  { %10934 = vst [vmem:[#allocation72_spill] sm:$0xff] %v6306_v40  ;;  %10935 = vst [vmem:[#allocation73_spill] sm:$0xff] %v6308_v63  ;;  %2170 = vrot.lane.b32.xlu0 %v5979_v54, %s5669_s19  ;;  %v6321_v18 = vpack.c.bf16 %v577_v39, %v577_v39  ;;  %v579_v37 = vpop.f32.mrb[35].mxu0  ;;  %v6328_v55 = vpack.c.bf16 %v5464_v16, %v5464_v16  ;;  %v849_v10 = vpop.f32.mrb[35].mxu1 }
 0x15f   :  { %10936 = vst [vmem:[#allocation74_spill] sm:$0xff] %v6310_v47  ;;  %10937 = vst [vmem:[#allocation75_spill] sm:$0xff] %v6312_v25  ;;  %v6335_v4 = vpack.c.bf16 %v579_v37, %v579_v37  ;;  %v6342_v39 = vpack.c.bf16 %v849_v10, %v849_v10 }
 0x160   :  { %1374 = vst.msk [vmem:[%s10596_s2 + $0x40] sm:$0xf] %vm1357_vm0, %v6306_v40  ;;  %10938 = vst [vmem:[#allocation76_spill] sm:$0xff] %v6321_v18  ;;  %2172 = vrot.lane.b32.xlu1 %v5999_v7, %s5669_s19 }
 0x161   :  { %2000 = vst.msk [vmem:[%s10598_s4 + $0x8] sm:$0xf] %vm1357_vm0, %v6308_v63  ;;  %10939 = vst [vmem:[#allocation77_spill] sm:$0xff] %v6328_v55 }
 0x162   :  { %1694 = vst.msk [vmem:[%s10597_s3 + $0x40] sm:$0xf] %vm1357_vm0, %v6310_v47  ;;  %10940 = vst [vmem:[#allocation78_spill] sm:$0xff] %v6335_v4  ;;  %2845 = vrot.lane.b32.xlu0 %v5977_v52, %s5663_s25 }
 0x163   :  { %1998 = vst.msk [vmem:[%s10598_s4] sm:$0xf] %vm1357_vm0, %v6312_v25  ;;  %10941 = vst [vmem:[#allocation79_spill] sm:$0xff] %v6342_v39  ;;  %v583_v16 = vpop.f32.mrb[36].mxu0  ;;  %v5467_v37 = vpop.f32.mrb[36].mxu1 }
 0x164   :  { %1375 = vst.msk [vmem:[%s10596_s2 + $0x44] sm:$0xf] %vm1357_vm0, %v6321_v18  ;;  %2001 = vst.msk [vmem:[%s10598_s4 + $0xc] sm:$0xf] %vm1357_vm0, %v6328_v55  ;;  %2847 = vrot.lane.b32.xlu1 %v5992_v3, %s5663_s25  ;;  %v6370_v10 = vpack.c.bf16 %v583_v16, %v583_v16  ;;  %v585_v60 = vpop.f32.mrb[37].mxu0  ;;  %v6372_v46 = vpack.c.bf16 %v5467_v37, %v5467_v37  ;;  %v862_v35 = vpop.f32.mrb[37].mxu1 }
 0x165   :  { %1695 = vst.msk [vmem:[%s10597_s3 + $0x44] sm:$0xf] %vm1357_vm0, %v6335_v4  ;;  %1999 = vst.msk [vmem:[%s10598_s4 + $0x4] sm:$0xf] %vm1357_vm0, %v6342_v39  ;;  %v6374_v24 = vpack.c.bf16 %v585_v60, %v585_v60  ;;  %v587_v14 = vpop.f32.mrb[38].mxu0  ;;  %v6376_v5 = vpack.c.bf16 %v862_v35, %v862_v35  ;;  %v5468_v59 = vpop.f32.mrb[38].mxu1 }
 0x166   :  { %10942 = vst [vmem:[#allocation80_spill] sm:$0xff] %v6370_v10  ;;  %10943 = vst [vmem:[#allocation81_spill] sm:$0xff] %v6372_v46  ;;  %2331 = vrot.lane.b32.xlu0 %v5981_v58, %s5669_s19  ;;  %v6385_v16 = vpack.c.bf16 %v587_v14, %v587_v14  ;;  %v589_v37 = vpop.f32.mrb[39].mxu0  ;;  %v6392_v60 = vpack.c.bf16 %v5468_v59, %v5468_v59  ;;  %v865_v35 = vpop.f32.mrb[39].mxu1 }
 0x167   :  { %10944 = vst [vmem:[#allocation82_spill] sm:$0xff] %v6374_v24  ;;  %10945 = vst [vmem:[#allocation83_spill] sm:$0xff] %v6376_v5  ;;  %v6399_v3 = vpack.c.bf16 %v589_v37, %v589_v37  ;;  %v6406_v14 = vpack.c.bf16 %v865_v35, %v865_v35 }
 0x168   :  { %1376 = vst.msk [vmem:[%s10596_s2 + $0x48] sm:$0xf] %vm1357_vm0, %v6370_v10  ;;  %10946 = vst [vmem:[#allocation84_spill] sm:$0xff] %v6385_v16  ;;  %2333 = vrot.lane.b32.xlu1 %v6007_v9, %s5669_s19 }
 0x169   :  { %2004 = vst.msk [vmem:[%s10598_s4 + $0x18] sm:$0xf] %vm1357_vm0, %v6372_v46  ;;  %10947 = vst [vmem:[#allocation85_spill] sm:$0xff] %v6392_v60 }
 0x16a   :  { %1696 = vst.msk [vmem:[%s10597_s3 + $0x48] sm:$0xf] %vm1357_vm0, %v6374_v24  ;;  %10948 = vst [vmem:[#allocation86_spill] sm:$0xff] %v6399_v3  ;;  %2427 = vrot.lane.b32.xlu0 %v5983_v62, %s5669_s19 }
 0x16b   :  { %2002 = vst.msk [vmem:[%s10598_s4 + $0x10] sm:$0xf] %vm1357_vm0, %v6376_v5  ;;  %10949 = vst [vmem:[#allocation87_spill] sm:$0xff] %v6406_v14  ;;  %v593_v59 = vpop.f32.mrb[40].mxu0  ;;  %v5471_v37 = vpop.f32.mrb[40].mxu1 }
 0x16c   :  { %1377 = vst.msk [vmem:[%s10596_s2 + $0x4c] sm:$0xf] %vm1357_vm0, %v6385_v16  ;;  %2005 = vst.msk [vmem:[%s10598_s4 + $0x1c] sm:$0xf] %vm1357_vm0, %v6392_v60  ;;  %2429 = vrot.lane.b32.xlu1 %v6014_v11, %s5669_s19  ;;  %v6434_v35 = vpack.c.bf16 %v593_v59, %v593_v59  ;;  %v595_v52 = vpop.f32.mrb[41].mxu0  ;;  %v6436_v9 = vpack.c.bf16 %v5471_v37, %v5471_v37  ;;  %v878_v58 = vpop.f32.mrb[41].mxu1 }
 0x16d   :  { %1697 = vst.msk [vmem:[%s10597_s3 + $0x4c] sm:$0xf] %vm1357_vm0, %v6399_v3  ;;  %2003 = vst.msk [vmem:[%s10598_s4 + $0x14] sm:$0xf] %vm1357_vm0, %v6406_v14  ;;  %v6438_v7 = vpack.c.bf16 %v595_v52, %v595_v52  ;;  %v597_v54 = vpop.f32.mrb[42].mxu0  ;;  %v6440_v44 = vpack.c.bf16 %v878_v58, %v878_v58  ;;  %v5472_v32 = vpop.f32.mrb[42].mxu1 }
 0x16e   :  { %10950 = vst [vmem:[#allocation88_spill] sm:$0xff] %v6434_v35  ;;  %10951 = vst [vmem:[#allocation89_spill] sm:$0xff] %v6436_v9  ;;  %2078 = vrot.lane.b32.xlu0 %v6043_v13, %s5669_s19  ;;  %v6449_v59 = vpack.c.bf16 %v597_v54, %v597_v54  ;;  %v599_v37 = vpop.f32.mrb[43].mxu0  ;;  %v6456_v52 = vpack.c.bf16 %v5472_v32, %v5472_v32  ;;  %v881_v58 = vpop.f32.mrb[43].mxu1 }
 0x16f   :  { %10952 = vst [vmem:[#allocation90_spill] sm:$0xff] %v6438_v7  ;;  %10953 = vst [vmem:[#allocation91_spill] sm:$0xff] %v6440_v44  ;;  %v6463_v11 = vpack.c.bf16 %v599_v37, %v599_v37  ;;  %v6470_v54 = vpack.c.bf16 %v881_v58, %v881_v58 }
 0x170   :  { %1378 = vst.msk [vmem:[%s10596_s2 + $0x50] sm:$0xf] %vm1357_vm0, %v6434_v35  ;;  %10954 = vst [vmem:[#allocation92_spill] sm:$0xff] %v6449_v59  ;;  %2080 = vrot.lane.b32.xlu1 %v6059_v33, %s5669_s19 }
 0x171   :  { %2008 = vst.msk [vmem:[%s10598_s4 + $0x28] sm:$0xf] %vm1357_vm0, %v6436_v9  ;;  %10955 = vst [vmem:[#allocation93_spill] sm:$0xff] %v6456_v52 }
 0x172   :  { %1698 = vst.msk [vmem:[%s10597_s3 + $0x50] sm:$0xf] %vm1357_vm0, %v6438_v7  ;;  %10956 = vst [vmem:[#allocation94_spill] sm:$0xff] %v6463_v11  ;;  %2174 = vrot.lane.b32.xlu0 %v6045_v17, %s5669_s19 }
 0x173   :  { %2006 = vst.msk [vmem:[%s10598_s4 + $0x20] sm:$0xf] %vm1357_vm0, %v6440_v44  ;;  %10957 = vst [vmem:[#allocation95_spill] sm:$0xff] %v6470_v54  ;;  %v603_v32 = vpop.f32.mrb[44].mxu0 }
 0x174   :  { %1379 = vst.msk [vmem:[%s10596_s2 + $0x54] sm:$0xf] %vm1357_vm0, %v6449_v59  ;;  %2009 = vst.msk [vmem:[%s10598_s4 + $0x2c] sm:$0xf] %vm1357_vm0, %v6456_v52  ;;  %2176 = vrot.lane.b32.xlu1 %v6066_v22, %s5669_s19  ;;  %v6498_v37 = vpack.c.bf16 %v603_v32, %v603_v32  ;;  %v605_v58 = vpop.f32.mrb[45].mxu0  ;;  %v5475_v22 = vpop.f32.mrb[44].mxu1 }
 0x175   :  { %1699 = vst.msk [vmem:[%s10597_s3 + $0x54] sm:$0xf] %vm1357_vm0, %v6463_v11  ;;  %2007 = vst.msk [vmem:[%s10598_s4 + $0x24] sm:$0xf] %vm1357_vm0, %v6470_v54  ;;  %v6502_v62 = vpack.c.bf16 %v605_v58, %v605_v58  ;;  %v607_v21 = vpop.f32.mrb[46].mxu0  ;;  %v6520_v58 = vpack.c.bf16 %v5475_v22, %v5475_v22 }
 0x176   :  { %10958 = vst [vmem:[#allocation96_spill] sm:$0xff] %v6498_v37  ;;  %2849 = vrot.lane.b32.xlu0 %v6043_v13, %s5663_s25  ;;  %1380 = vst.msk [vmem:[%s10596_s2 + $0x58] sm:$0xf] %vm1357_vm0, %v6498_v37  ;;  %v6509_v17 = vpack.c.bf16 %v607_v21, %v607_v21  ;;  %v609_v12 = vpop.f32.mrb[47].mxu0  ;;  %v894_v21 = vpop.f32.mrb[45].mxu1 }
 0x177   :  { %10959 = vst [vmem:[#allocation97_spill] sm:$0xff] %v6502_v62  ;;  %1700 = vst.msk [vmem:[%s10597_s3 + $0x58] sm:$0xf] %vm1357_vm0, %v6502_v62  ;;  %v6518_v32 = vpack.c.bf16 %v609_v12, %v609_v12  ;;  %v6539_v12 = vpack.c.bf16 %v894_v21, %v894_v21  ;;  %v5476_v22 = vpop.f32.mrb[46].mxu1 }
 0x178   :  { %10960 = vst [vmem:[#allocation98_spill] sm:$0xff] %v6509_v17  ;;  %2851 = vrot.lane.b32.xlu1 %v6059_v33, %s5663_s25  ;;  %10962 = vst [vmem:[#allocation100_spill] sm:$0xff] %v6520_v58  ;;  %v6541_v33 = vpack.c.bf16 %v5476_v22, %v5476_v22  ;;  %v897_v13 = vpop.f32.mrb[47].mxu1 }
 0x179   :  { %10961 = vst [vmem:[#allocation99_spill] sm:$0xff] %v6518_v32  ;;  %1381 = vst.msk [vmem:[%s10596_s2 + $0x5c] sm:$0xf] %vm1357_vm0, %v6509_v17 }
 0x17a   :  { %2335 = vrot.lane.b32.xlu0 %v6047_v23, %s5669_s19  ;;  %1701 = vst.msk [vmem:[%s10597_s3 + $0x5c] sm:$0xf] %vm1357_vm0, %v6518_v32  ;;  %2012 = vst.msk [vmem:[%s10598_s4 + $0x38] sm:$0xf] %vm1357_vm0, %v6520_v58  ;;  %v6550_v23 = vpack.c.bf16 %v897_v13, %v897_v13 }
 0x17b   :  { %10963 = vst [vmem:[#allocation101_spill] sm:$0xff] %v6539_v12  ;;  %10964 = vst [vmem:[#allocation102_spill] sm:$0xff] %v6541_v33  ;;  %v613_v13 = vpop.f32.mrb[48].mxu0 }
 0x17c   :  { %2337 = vrot.lane.b32.xlu1 %v6074_v43, %s5669_s19  ;;  %2010 = vst.msk [vmem:[%s10598_s4 + $0x30] sm:$0xf] %vm1357_vm0, %v6539_v12  ;;  %10965 = vst [vmem:[#allocation103_spill] sm:$0xff] %v6550_v23  ;;  %v6574_v21 = vpack.c.bf16 %v613_v13, %v613_v13  ;;  %v615_v22 = vpop.f32.mrb[49].mxu0 }
 0x17d   :  { %2013 = vst.msk [vmem:[%s10598_s4 + $0x3c] sm:$0xf] %vm1357_vm0, %v6541_v33  ;;  %2011 = vst.msk [vmem:[%s10598_s4 + $0x34] sm:$0xf] %vm1357_vm0, %v6550_v23 }
 0x17e   :  { %2431 = vrot.lane.b32.xlu0 %v6049_v28, %s5669_s19  ;;  %10966 = vst [vmem:[#allocation104_spill] sm:$0xff] %v6574_v21  ;;  %v617_v28 = vpop.f32.mrb[50].mxu0  ;;  %1382 = vst.msk [vmem:[%s10596_s2 + $0x60] sm:$0xf] %vm1357_vm0, %v6574_v21 }
 0x17f   :  { %v6585_v43 = vpack.c.bf16 %v617_v28, %v617_v28 }
 0x180   :  { %2433 = vrot.lane.b32.xlu1 %v6081_v45, %s5669_s19  ;;  %v6578_v45 = vpack.c.bf16 %v615_v22, %v615_v22 }
 0x181   :  { %10968 = vst [vmem:[#allocation106_spill] sm:$0xff] %v6585_v43  ;;  %1383 = vst.msk [vmem:[%s10596_s2 + $0x64] sm:$0xf] %vm1357_vm0, %v6585_v43 }
 0x182   :  { %2082 = vrot.lane.b32.xlu0 %v6109_v49, %s5669_s19  ;;  %10967 = vst [vmem:[#allocation105_spill] sm:$0xff] %v6578_v45  ;;  %1702 = vst.msk [vmem:[%s10597_s3 + $0x60] sm:$0xf] %vm1357_vm0, %v6578_v45 }
 0x184   :  { %2084 = vrot.lane.b32.xlu1 %v6125_v8, %s5669_s19 }
 0x186   :  { %2178 = vrot.lane.b32.xlu0 %v6111_v51, %s5669_s19  ;;  %v619_v51 = vpop.f32.mrb[51].mxu0 }
 0x187   :  { %v6594_v13 = vpack.c.bf16 %v619_v51, %v619_v51 }
 0x188   :  { %2180 = vrot.lane.b32.xlu1 %v6132_v19, %s5669_s19  ;;  %v5479_v19 = vpop.f32.mrb[48].mxu1 }
 0x189   :  { %10969 = vst [vmem:[#allocation107_spill] sm:$0xff] %v6594_v13  ;;  %v6596_v22 = vpack.c.bf16 %v5479_v19, %v5479_v19  ;;  %v910_v28 = vpop.f32.mrb[49].mxu1  ;;  %1703 = vst.msk [vmem:[%s10597_s3 + $0x64] sm:$0xf] %vm1357_vm0, %v6594_v13 }
 0x18a   :  { %2853 = vrot.lane.b32.xlu0 %v6109_v49, %s5663_s25  ;;  %v6615_v51 = vpack.c.bf16 %v910_v28, %v910_v28  ;;  %v5480_v19 = vpop.f32.mrb[50].mxu1 }
 0x18b   :  { %10970 = vst [vmem:[#allocation108_spill] sm:$0xff] %v6596_v22  ;;  %2016 = vst.msk [vmem:[%s10598_s4 + $0x48] sm:$0xf] %vm1357_vm0, %v6596_v22  ;;  %v913_v49 = vpop.f32.mrb[51].mxu1 }
 0x18c   :  { %2855 = vrot.lane.b32.xlu1 %v6125_v8, %s5663_s25  ;;  %10971 = vst [vmem:[#allocation109_spill] sm:$0xff] %v6615_v51  ;;  %v6617_v8 = vpack.c.bf16 %v5480_v19, %v5480_v19  ;;  %2014 = vst.msk [vmem:[%s10598_s4 + $0x40] sm:$0xf] %vm1357_vm0, %v6615_v51 }
 0x18e   :  { %2339 = vrot.lane.b32.xlu0 %v6113_v57, %s5669_s19  ;;  %10972 = vst [vmem:[#allocation110_spill] sm:$0xff] %v6617_v8  ;;  %v6626_v57 = vpack.c.bf16 %v913_v49, %v913_v49  ;;  %2017 = vst.msk [vmem:[%s10598_s4 + $0x4c] sm:$0xf] %vm1357_vm0, %v6617_v8 }
 0x190   :  { %v2063_v1 = vpop.permute.xlu0 %2062  ;;  %2341 = vrot.lane.b32.xlu1 %v6140_v15, %s5669_s19  ;;  %10973 = vst [vmem:[#allocation111_spill] sm:$0xff] %v6626_v57  ;;  %2015 = vst.msk [vmem:[%s10598_s4 + $0x44] sm:$0xf] %vm1357_vm0, %v6626_v57 }
 0x191   :  { %4637 = vst.msk [vmem:[%s10596_s2 + $0x100] sm:$0xf] %vm1357_vm0, %v2063_v1 }
 0x192   :  { %v2161_v28 = vpop.permute.xlu1 %2160  ;;  %2435 = vrot.lane.b32.xlu0 %v6115_v2, %s5669_s19 }
 0x193   :  { %4686 = vst.msk [vmem:[%s10596_s2 + $0x1c4] sm:$0xf] %vm1357_vm0, %v2161_v28 }
 0x194   :  { %v2159_v1 = vpop.permute.xlu0 %2158  ;;  %2437 = vrot.lane.b32.xlu1 %v6147_v20, %s5669_s19 }
 0x195   :  { %4685 = vst.msk [vmem:[%s10596_s2 + $0x1c0] sm:$0xf] %vm1357_vm0, %v2159_v1 }
 0x196   :  { %v2836_v49 = vpop.permute.xlu1 %2835  ;;  %2086 = vrot.lane.b32.xlu0 %v6175_v30, %s5669_s19 }
 0x197   :  { %4830 = vst.msk [vmem:[%s10596_s2 + $0x204] sm:$0xf] %vm1357_vm0, %v2836_v49  ;;  %v623_v49 = vpop.f32.mrb[52].mxu0 }
 0x198   :  { %v2834_v19 = vpop.permute.xlu0 %2833  ;;  %2088 = vrot.lane.b32.xlu1 %v6191_v6, %s5669_s19  ;;  %v625_v20 = vpop.f32.mrb[53].mxu0 }
 0x199   :  { %4829 = vst.msk [vmem:[%s10596_s2 + $0x200] sm:$0xf] %vm1357_vm0, %v2834_v19  ;;  %v6678_v19 = vpack.c.bf16 %v623_v49, %v623_v49  ;;  %v6682_v15 = vpack.c.bf16 %v625_v20, %v625_v20 }
 0x19a   :  { %v2322_v28 = vpop.permute.xlu1 %2321  ;;  %2182 = vrot.lane.b32.xlu0 %v6177_v41, %s5669_s19 }
 0x19b   :  { %4702 = vst.msk [vmem:[%s10597_s3 + $0x104] sm:$0xf] %vm1357_vm0, %v2322_v28  ;;  %10974 = vst [vmem:[#allocation112_spill] sm:$0xff] %v6678_v19  ;;  %v627_v28 = vpop.f32.mrb[54].mxu0 }
 0x19c   :  { %v2320_v1 = vpop.permute.xlu0 %2319  ;;  %2184 = vrot.lane.b32.xlu1 %v6198_v31, %s5669_s19  ;;  %10975 = vst [vmem:[#allocation113_spill] sm:$0xff] %v6682_v15  ;;  %1384 = vst.msk [vmem:[%s10596_s2 + $0x68] sm:$0xf] %vm1357_vm0, %v6678_v19  ;;  %v629_v49 = vpop.f32.mrb[55].mxu0 }
 0x19d   :  { %4701 = vst.msk [vmem:[%s10597_s3 + $0x100] sm:$0xf] %vm1357_vm0, %v2320_v1  ;;  %v6693_v1 = vpack.c.bf16 %v627_v28, %v627_v28  ;;  %v5483_v31 = vpop.f32.mrb[52].mxu1  ;;  %1704 = vst.msk [vmem:[%s10597_s3 + $0x68] sm:$0xf] %vm1357_vm0, %v6682_v15 }
 0x19e   :  { %v2418_v2 = vpop.permute.xlu1 %2417  ;;  %2857 = vrot.lane.b32.xlu0 %v6175_v30, %s5663_s25  ;;  %v6704_v20 = vpack.c.bf16 %v5483_v31, %v5483_v31  ;;  %v926_v28 = vpop.f32.mrb[53].mxu1 }
 0x19f   :  { %4750 = vst.msk [vmem:[%s10597_s3 + $0x1c4] sm:$0xf] %vm1357_vm0, %v2418_v2  ;;  %10976 = vst [vmem:[#allocation114_spill] sm:$0xff] %v6693_v1  ;;  %v6702_v2 = vpack.c.bf16 %v629_v49, %v629_v49  ;;  %v5484_v31 = vpop.f32.mrb[54].mxu1 }
 0x1a0   :  { %v2416_v41 = vpop.permute.xlu0 %2415  ;;  %2859 = vrot.lane.b32.xlu1 %v6191_v6, %s5663_s25  ;;  %10978 = vst [vmem:[#allocation116_spill] sm:$0xff] %v6704_v20  ;;  %1385 = vst.msk [vmem:[%s10596_s2 + $0x6c] sm:$0xf] %vm1357_vm0, %v6693_v1  ;;  %v6733_v49 = vpack.c.bf16 %v5484_v31, %v5484_v31  ;;  %v929_v30 = vpop.f32.mrb[55].mxu1 }
 0x1a1   :  { %10977 = vst [vmem:[#allocation115_spill] sm:$0xff] %v6702_v2  ;;  %4749 = vst.msk [vmem:[%s10597_s3 + $0x1c0] sm:$0xf] %vm1357_vm0, %v2416_v41  ;;  %v6727_v41 = vpack.c.bf16 %v926_v28, %v926_v28  ;;  %v6742_v28 = vpack.c.bf16 %v929_v30, %v929_v30 }
 0x1a2   :  { %v2067_v6 = vpop.permute.xlu1 %2066  ;;  %2343 = vrot.lane.b32.xlu0 %v6179_v48, %s5669_s19  ;;  %1705 = vst.msk [vmem:[%s10597_s3 + $0x6c] sm:$0xf] %vm1357_vm0, %v6702_v2  ;;  %2020 = vst.msk [vmem:[%s10598_s4 + $0x58] sm:$0xf] %vm1357_vm0, %v6704_v20 }
 0x1a3   :  { %10979 = vst [vmem:[#allocation117_spill] sm:$0xff] %v6727_v41  ;;  %4639 = vst.msk [vmem:[%s10596_s2 + $0x108] sm:$0xf] %vm1357_vm0, %v2067_v6 }
 0x1a4   :  { %10980 = vst [vmem:[#allocation118_spill] sm:$0xff] %v6733_v49  ;;  %v2065_v48 = vpop.permute.xlu0 %2064  ;;  %2345 = vrot.lane.b32.xlu1 %v6206_v34, %s5669_s19  ;;  %2018 = vst.msk [vmem:[%s10598_s4 + $0x50] sm:$0xf] %vm1357_vm0, %v6727_v41 }
 0x1a5   :  { %10981 = vst [vmem:[#allocation119_spill] sm:$0xff] %v6742_v28  ;;  %4638 = vst.msk [vmem:[%s10596_s2 + $0x104] sm:$0xf] %vm1357_vm0, %v2065_v48 }
 0x1a6   :  { %2021 = vst.msk [vmem:[%s10598_s4 + $0x5c] sm:$0xf] %vm1357_vm0, %v6733_v49  ;;  %v2069_v6 = vpop.permute.xlu1 %2068  ;;  %2439 = vrot.lane.b32.xlu0 %v6181_v53, %s5669_s19  ;;  %2019 = vst.msk [vmem:[%s10598_s4 + $0x54] sm:$0xf] %vm1357_vm0, %v6742_v28 }
 0x1a7   :  { %4640 = vst.msk [vmem:[%s10596_s2 + $0x10c] sm:$0xf] %vm1357_vm0, %v2069_v6 }
 0x1a8   :  { %v2163_v30 = vpop.permute.xlu0 %2162  ;;  %2441 = vrot.lane.b32.xlu1 %v6213_v26, %s5669_s19 }
 0x1a9   :  { %4687 = vst.msk [vmem:[%s10596_s2 + $0x1c8] sm:$0xf] %vm1357_vm0, %v2163_v30 }
 0x1aa   :  { %v2165_v48 = vpop.permute.xlu1 %2164  ;;  %2090 = vrot.lane.b32.xlu0 %v6241_v27, %s5669_s19 }
 0x1ab   :  { %4688 = vst.msk [vmem:[%s10596_s2 + $0x1cc] sm:$0xf] %vm1357_vm0, %v2165_v48  ;;  %v633_v48 = vpop.f32.mrb[56].mxu0 }
 0x1ac   :  { %v2838_v31 = vpop.permute.xlu0 %2837  ;;  %2092 = vrot.lane.b32.xlu1 %v6257_v38, %s5669_s19  ;;  %v635_v26 = vpop.f32.mrb[57].mxu0 }
 0x1ad   :  { %4831 = vst.msk [vmem:[%s10596_s2 + $0x208] sm:$0xf] %vm1357_vm0, %v2838_v31  ;;  %v6794_v31 = vpack.c.bf16 %v633_v48, %v633_v48  ;;  %v6798_v34 = vpack.c.bf16 %v635_v26, %v635_v26 }
 0x1ae   :  { %v2840_v6 = vpop.permute.xlu1 %2839  ;;  %2186 = vrot.lane.b32.xlu0 %v6243_v61, %s5669_s19 }
 0x1af   :  { %4832 = vst.msk [vmem:[%s10596_s2 + $0x20c] sm:$0xf] %vm1357_vm0, %v2840_v6  ;;  %10982 = vst [vmem:[#allocation120_spill] sm:$0xff] %v6794_v31  ;;  %v637_v6 = vpop.f32.mrb[58].mxu0 }
 0x1b0   :  { %v2324_v30 = vpop.permute.xlu0 %2323  ;;  %2188 = vrot.lane.b32.xlu1 %v6264_v50, %s5669_s19  ;;  %10983 = vst [vmem:[#allocation121_spill] sm:$0xff] %v6798_v34  ;;  %1386 = vst.msk [vmem:[%s10596_s2 + $0x70] sm:$0xf] %vm1357_vm0, %v6794_v31  ;;  %v639_v48 = vpop.f32.mrb[59].mxu0 }
 0x1b1   :  { %4703 = vst.msk [vmem:[%s10597_s3 + $0x108] sm:$0xf] %vm1357_vm0, %v2324_v30  ;;  %v6809_v30 = vpack.c.bf16 %v637_v6, %v637_v6  ;;  %v5487_v50 = vpop.f32.mrb[56].mxu1  ;;  %1706 = vst.msk [vmem:[%s10597_s3 + $0x70] sm:$0xf] %vm1357_vm0, %v6798_v34 }
 0x1b2   :  { %v2326_v53 = vpop.permute.xlu1 %2325  ;;  %2861 = vrot.lane.b32.xlu0 %v6241_v27, %s5663_s25  ;;  %v6820_v26 = vpack.c.bf16 %v5487_v50, %v5487_v50  ;;  %v942_v6 = vpop.f32.mrb[57].mxu1 }
 0x1b3   :  { %4704 = vst.msk [vmem:[%s10597_s3 + $0x10c] sm:$0xf] %vm1357_vm0, %v2326_v53  ;;  %10984 = vst [vmem:[#allocation122_spill] sm:$0xff] %v6809_v30  ;;  %v6818_v53 = vpack.c.bf16 %v639_v48, %v639_v48  ;;  %v5488_v50 = vpop.f32.mrb[58].mxu1 }
 0x1b4   :  { %v2420_v61 = vpop.permute.xlu0 %2419  ;;  %2863 = vrot.lane.b32.xlu1 %v6257_v38, %s5663_s25  ;;  %10986 = vst [vmem:[#allocation124_spill] sm:$0xff] %v6820_v26  ;;  %1387 = vst.msk [vmem:[%s10596_s2 + $0x74] sm:$0xf] %vm1357_vm0, %v6809_v30  ;;  %v6849_v48 = vpack.c.bf16 %v5488_v50, %v5488_v50  ;;  %v945_v27 = vpop.f32.mrb[59].mxu1 }
 0x1b5   :  { %10985 = vst [vmem:[#allocation123_spill] sm:$0xff] %v6818_v53  ;;  %4751 = vst.msk [vmem:[%s10597_s3 + $0x1c8] sm:$0xf] %vm1357_vm0, %v2420_v61  ;;  %v6843_v61 = vpack.c.bf16 %v942_v6, %v942_v6  ;;  %v6858_v6 = vpack.c.bf16 %v945_v27, %v945_v27 }
 0x1b6   :  { %v2422_v38 = vpop.permute.xlu1 %2421  ;;  %2347 = vrot.lane.b32.xlu0 %v6245_v36, %s5669_s19  ;;  %1707 = vst.msk [vmem:[%s10597_s3 + $0x74] sm:$0xf] %vm1357_vm0, %v6818_v53  ;;  %2024 = vst.msk [vmem:[%s10598_s4 + $0x68] sm:$0xf] %vm1357_vm0, %v6820_v26 }
 0x1b7   :  { %10987 = vst [vmem:[#allocation125_spill] sm:$0xff] %v6843_v61  ;;  %4752 = vst.msk [vmem:[%s10597_s3 + $0x1cc] sm:$0xf] %vm1357_vm0, %v2422_v38 }
 0x1b8   :  { %10988 = vst [vmem:[#allocation126_spill] sm:$0xff] %v6849_v48  ;;  %v2071_v36 = vpop.permute.xlu0 %2070  ;;  %2349 = vrot.lane.b32.xlu1 %v6271_v0, %s5669_s19  ;;  %2022 = vst.msk [vmem:[%s10598_s4 + $0x60] sm:$0xf] %vm1357_vm0, %v6843_v61 }
 0x1b9   :  { %10989 = vst [vmem:[#allocation127_spill] sm:$0xff] %v6858_v6  ;;  %4641 = vst.msk [vmem:[%s10596_s2 + $0x110] sm:$0xf] %vm1357_vm0, %v2071_v36 }
 0x1ba   :  { %2025 = vst.msk [vmem:[%s10598_s4 + $0x6c] sm:$0xf] %vm1357_vm0, %v6849_v48  ;;  %v2073_v38 = vpop.permute.xlu1 %2072  ;;  %2443 = vrot.lane.b32.xlu0 %v6247_v29, %s5669_s19  ;;  %2023 = vst.msk [vmem:[%s10598_s4 + $0x64] sm:$0xf] %vm1357_vm0, %v6858_v6 }
 0x1bb   :  { %4642 = vst.msk [vmem:[%s10596_s2 + $0x114] sm:$0xf] %vm1357_vm0, %v2073_v38 }
 0x1bc   :  { %v2167_v27 = vpop.permute.xlu0 %2166  ;;  %2445 = vrot.lane.b32.xlu1 %v6278_v42, %s5669_s19 }
 0x1bd   :  { %4689 = vst.msk [vmem:[%s10596_s2 + $0x1d0] sm:$0xf] %vm1357_vm0, %v2167_v27 }
 0x1be   :  { %v2169_v36 = vpop.permute.xlu1 %2168  ;;  %2094 = vrot.lane.b32.xlu0 %v6306_v40, %s5669_s19 }
 0x1bf   :  { %4690 = vst.msk [vmem:[%s10596_s2 + $0x1d4] sm:$0xf] %vm1357_vm0, %v2169_v36  ;;  %v643_v36 = vpop.f32.mrb[60].mxu0 }
 0x1c0   :  { %v2842_v50 = vpop.permute.xlu0 %2841  ;;  %2096 = vrot.lane.b32.xlu1 %v6321_v18, %s5669_s19  ;;  %v645_v42 = vpop.f32.mrb[61].mxu0 }
 0x1c1   :  { %4833 = vst.msk [vmem:[%s10596_s2 + $0x210] sm:$0xf] %vm1357_vm0, %v2842_v50  ;;  %v6910_v50 = vpack.c.bf16 %v643_v36, %v643_v36 }
 0x1c2   :  { %v2844_v38 = vpop.permute.xlu1 %2843  ;;  %2580 = vrot.lane.b32.xlu0 %v6308_v63, %s5669_s19  ;;  %v6914_v63 = vpack.c.bf16 %v645_v42, %v645_v42 }
 0x1c3   :  { %4834 = vst.msk [vmem:[%s10596_s2 + $0x214] sm:$0xf] %vm1357_vm0, %v2844_v38  ;;  %10990 = vst [vmem:[#allocation128_spill] sm:$0xff] %v6910_v50  ;;  %v647_v38 = vpop.f32.mrb[62].mxu0 }
 0x1c4   :  { %v2328_v27 = vpop.permute.xlu0 %2327  ;;  %2582 = vrot.lane.b32.xlu1 %v6328_v55, %s5669_s19  ;;  %1388 = vst.msk [vmem:[%s10596_s2 + $0x78] sm:$0xf] %vm1357_vm0, %v6910_v50  ;;  %v649_v36 = vpop.f32.mrb[63].mxu0  ;;  %1708 = vst.msk [vmem:[%s10597_s3 + $0x78] sm:$0xf] %vm1357_vm0, %v6914_v63 }
 0x1c5   :  { %4705 = vst.msk [vmem:[%s10597_s3 + $0x110] sm:$0xf] %vm1357_vm0, %v2328_v27  ;;  %v6925_v27 = vpack.c.bf16 %v647_v38, %v647_v38  ;;  %v5491_v55 = vpop.f32.mrb[60].mxu1 }
 0x1c6   :  { %v2330_v29 = vpop.permute.xlu1 %2329  ;;  %2865 = vrot.lane.b32.xlu0 %v6306_v40, %s5663_s25  ;;  %v6936_v42 = vpack.c.bf16 %v5491_v55, %v5491_v55  ;;  %v958_v38 = vpop.f32.mrb[61].mxu1 }
 0x1c7   :  { %4706 = vst.msk [vmem:[%s10597_s3 + $0x114] sm:$0xf] %vm1357_vm0, %v2330_v29  ;;  %v6934_v29 = vpack.c.bf16 %v649_v36, %v649_v36  ;;  %1389 = vst.msk [vmem:[%s10596_s2 + $0x7c] sm:$0xf] %vm1357_vm0, %v6925_v27  ;;  %v5492_v55 = vpop.f32.mrb[62].mxu1 }
 0x1c8   :  { %v2424_v0 = vpop.permute.xlu0 %2423  ;;  %2867 = vrot.lane.b32.xlu1 %v6321_v18, %s5663_s25  ;;  %2028 = vst.msk [vmem:[%s10598_s4 + $0x78] sm:$0xf] %vm1357_vm0, %v6936_v42  ;;  %v6965_v36 = vpack.c.bf16 %v5492_v55, %v5492_v55  ;;  %v961_v40 = vpop.f32.mrb[63].mxu1 }
 0x1c9   :  { %4753 = vst.msk [vmem:[%s10597_s3 + $0x1d0] sm:$0xf] %vm1357_vm0, %v2424_v0  ;;  %1709 = vst.msk [vmem:[%s10597_s3 + $0x7c] sm:$0xf] %vm1357_vm0, %v6934_v29  ;;  %v6959_v0 = vpack.c.bf16 %v958_v38, %v958_v38  ;;  %v6974_v38 = vpack.c.bf16 %v961_v40, %v961_v40 }
 0x1ca   :  { %v2426_v18 = vpop.permute.xlu1 %2425  ;;  %2351 = vrot.lane.b32.xlu0 %v6310_v47, %s5669_s19  ;;  %2029 = vst.msk [vmem:[%s10598_s4 + $0x7c] sm:$0xf] %vm1357_vm0, %v6965_v36 }
 0x1cb   :  { %4754 = vst.msk [vmem:[%s10597_s3 + $0x1d4] sm:$0xf] %vm1357_vm0, %v2426_v18  ;;  %2026 = vst.msk [vmem:[%s10598_s4 + $0x70] sm:$0xf] %vm1357_vm0, %v6959_v0 }
 0x1cc   :  { %v2075_v47 = vpop.permute.xlu0 %2074  ;;  %2353 = vrot.lane.b32.xlu1 %v6335_v4, %s5669_s19  ;;  %2027 = vst.msk [vmem:[%s10598_s4 + $0x74] sm:$0xf] %vm1357_vm0, %v6974_v38 }
 0x1cd   :  { %4643 = vst.msk [vmem:[%s10596_s2 + $0x118] sm:$0xf] %vm1357_vm0, %v2075_v47 }
 0x1ce   :  { %v2077_v18 = vpop.permute.xlu1 %2076  ;;  %2576 = vrot.lane.b32.xlu0 %v6312_v25, %s5669_s19 }
 0x1cf   :  { %4644 = vst.msk [vmem:[%s10596_s2 + $0x11c] sm:$0xf] %vm1357_vm0, %v2077_v18  ;;  %v653_v18 = vpop.f32.mrb[64].mxu0 }
 0x1d0   :  { %v2171_v47 = vpop.permute.xlu0 %2170  ;;  %2578 = vrot.lane.b32.xlu1 %v6342_v39, %s5669_s19  ;;  %v655_v39 = vpop.f32.mrb[65].mxu0 }
 0x1d1   :  { %4691 = vst.msk [vmem:[%s10596_s2 + $0x1d8] sm:$0xf] %vm1357_vm0, %v2171_v47  ;;  %v7014_v47 = vpack.c.bf16 %v653_v18, %v653_v18  ;;  %v7018_v4 = vpack.c.bf16 %v655_v39, %v655_v39  ;;  %v5495_v39 = vpop.f32.mrb[64].mxu1 }
 0x1d2   :  { %v2173_v40 = vpop.permute.xlu1 %2172  ;;  %2098 = vrot.lane.b32.xlu0 %v6370_v10, %s5669_s19 }
 0x1d3   :  { %4692 = vst.msk [vmem:[%s10596_s2 + $0x1dc] sm:$0xf] %vm1357_vm0, %v2173_v40  ;;  %10991 = vst [vmem:[#allocation129_spill] sm:$0xff] %v7018_v4  ;;  %v657_v40 = vpop.f32.mrb[66].mxu0 }
 0x1d4   :  { %v2846_v55 = vpop.permute.xlu0 %2845  ;;  %2100 = vrot.lane.b32.xlu1 %v6385_v16, %s5669_s19  ;;  %1390 = vst.msk [vmem:[%s10596_s2 + $0x80] sm:$0xf] %vm1357_vm0, %v7014_v47  ;;  %v659_v18 = vpop.f32.mrb[67].mxu0  ;;  %1710 = vst.msk [vmem:[%s10597_s3 + $0x80] sm:$0xf] %vm1357_vm0, %v7018_v4 }
 0x1d5   :  { %4835 = vst.msk [vmem:[%s10596_s2 + $0x218] sm:$0xf] %vm1357_vm0, %v2846_v55  ;;  %v7029_v55 = vpack.c.bf16 %v657_v40, %v657_v40  ;;  %v7049_v40 = vpack.c.bf16 %v5495_v39, %v5495_v39 }
 0x1d6   :  { %v2848_v25 = vpop.permute.xlu1 %2847  ;;  %2588 = vrot.lane.b32.xlu0 %v6372_v46, %s5669_s19 }
 0x1d7   :  { %4836 = vst.msk [vmem:[%s10596_s2 + $0x21c] sm:$0xf] %vm1357_vm0, %v2848_v25  ;;  %v7038_v25 = vpack.c.bf16 %v659_v18, %v659_v18  ;;  %1391 = vst.msk [vmem:[%s10596_s2 + $0x84] sm:$0xf] %vm1357_vm0, %v7029_v55 }
 0x1d8   :  { %v2332_v56 = vpop.permute.xlu0 %2331  ;;  %2590 = vrot.lane.b32.xlu1 %v6392_v60, %s5669_s19  ;;  %10992 = vst [vmem:[#allocation130_spill] sm:$0xff] %v7049_v40  ;;  %v974_v60 = vpop.f32.mrb[65].mxu1  ;;  %2032 = vst.msk [vmem:[%s10598_s4 + $0x88] sm:$0xf] %vm1357_vm0, %v7049_v40 }
 0x1d9   :  { %4707 = vst.msk [vmem:[%s10597_s3 + $0x118] sm:$0xf] %vm1357_vm0, %v2332_v56  ;;  %1711 = vst.msk [vmem:[%s10597_s3 + $0x84] sm:$0xf] %vm1357_vm0, %v7038_v25  ;;  %v7058_v56 = vpack.c.bf16 %v974_v60, %v974_v60  ;;  %v5496_v18 = vpop.f32.mrb[66].mxu1 }
 0x1da   :  { %v2334_v46 = vpop.permute.xlu1 %2333  ;;  %2869 = vrot.lane.b32.xlu0 %v6370_v10, %s5663_s25  ;;  %v7069_v39 = vpack.c.bf16 %v5496_v18, %v5496_v18  ;;  %v977_v10 = vpop.f32.mrb[67].mxu1 }
 0x1db   :  { %10993 = vst [vmem:[#allocation131_spill] sm:$0xff] %v7058_v56  ;;  %4708 = vst.msk [vmem:[%s10597_s3 + $0x11c] sm:$0xf] %vm1357_vm0, %v2334_v46  ;;  %v7078_v46 = vpack.c.bf16 %v977_v10, %v977_v10 }
 0x1dc   :  { %10994 = vst [vmem:[#allocation132_spill] sm:$0xff] %v7069_v39  ;;  %v2428_v4 = vpop.permute.xlu0 %2427  ;;  %2871 = vrot.lane.b32.xlu1 %v6385_v16, %s5663_s25  ;;  %2030 = vst.msk [vmem:[%s10598_s4 + $0x80] sm:$0xf] %vm1357_vm0, %v7058_v56 }
 0x1dd   :  { %4755 = vst.msk [vmem:[%s10597_s3 + $0x1d8] sm:$0xf] %vm1357_vm0, %v2428_v4  ;;  %2033 = vst.msk [vmem:[%s10598_s4 + $0x8c] sm:$0xf] %vm1357_vm0, %v7069_v39 }
 0x1de   :  { %v2430_v60 = vpop.permute.xlu1 %2429  ;;  %2355 = vrot.lane.b32.xlu0 %v6374_v24, %s5669_s19  ;;  %2031 = vst.msk [vmem:[%s10598_s4 + $0x84] sm:$0xf] %vm1357_vm0, %v7078_v46 }
 0x1df   :  { %4756 = vst.msk [vmem:[%s10597_s3 + $0x1dc] sm:$0xf] %vm1357_vm0, %v2430_v60  ;;  %v663_v60 = vpop.f32.mrb[68].mxu0 }
 0x1e0   :  { %v2079_v4 = vpop.permute.xlu0 %2078  ;;  %2357 = vrot.lane.b32.xlu1 %v6399_v3, %s5669_s19  ;;  %v665_v16 = vpop.f32.mrb[69].mxu0 }
 0x1e1   :  { %4645 = vst.msk [vmem:[%s10596_s2 + $0x120] sm:$0xf] %vm1357_vm0, %v2079_v4  ;;  %v7118_v4 = vpack.c.bf16 %v663_v60, %v663_v60 }
 0x1e2   :  { %v2081_v10 = vpop.permute.xlu1 %2080  ;;  %2584 = vrot.lane.b32.xlu0 %v6376_v5, %s5669_s19  ;;  %v7122_v5 = vpack.c.bf16 %v665_v16, %v665_v16  ;;  %v5499_v16 = vpop.f32.mrb[68].mxu1 }
 0x1e3   :  { %4646 = vst.msk [vmem:[%s10596_s2 + $0x124] sm:$0xf] %vm1357_vm0, %v2081_v10  ;;  %10995 = vst [vmem:[#allocation133_spill] sm:$0xff] %v7118_v4  ;;  %v667_v10 = vpop.f32.mrb[70].mxu0  ;;  %v990_v24 = vpop.f32.mrb[69].mxu1 }
 0x1e4   :  { %v2175_v18 = vpop.permute.xlu0 %2174  ;;  %2586 = vrot.lane.b32.xlu1 %v6406_v14, %s5669_s19  ;;  %10996 = vst [vmem:[#allocation134_spill] sm:$0xff] %v7122_v5  ;;  %1392 = vst.msk [vmem:[%s10596_s2 + $0x88] sm:$0xf] %vm1357_vm0, %v7118_v4  ;;  %v669_v60 = vpop.f32.mrb[71].mxu0 }
 0x1e5   :  { %4693 = vst.msk [vmem:[%s10596_s2 + $0x1e0] sm:$0xf] %vm1357_vm0, %v2175_v18  ;;  %v7133_v18 = vpack.c.bf16 %v667_v10, %v667_v10  ;;  %1712 = vst.msk [vmem:[%s10597_s3 + $0x88] sm:$0xf] %vm1357_vm0, %v7122_v5  ;;  %v7153_v10 = vpack.c.bf16 %v5499_v16, %v5499_v16 }
 0x1e6   :  { %v2177_v3 = vpop.permute.xlu1 %2176  ;;  %2102 = vrot.lane.b32.xlu0 %v6434_v35, %s5669_s19 }
 0x1e7   :  { %4694 = vst.msk [vmem:[%s10596_s2 + $0x1e4] sm:$0xf] %vm1357_vm0, %v2177_v3  ;;  %v7142_v3 = vpack.c.bf16 %v669_v60, %v669_v60  ;;  %1393 = vst.msk [vmem:[%s10596_s2 + $0x8c] sm:$0xf] %vm1357_vm0, %v7133_v18  ;;  %v5500_v60 = vpop.f32.mrb[70].mxu1 }
 0x1e8   :  { %v2850_v14 = vpop.permute.xlu0 %2849  ;;  %2104 = vrot.lane.b32.xlu1 %v6449_v59, %s5669_s19  ;;  %10997 = vst [vmem:[#allocation135_spill] sm:$0xff] %v7153_v10  ;;  %2036 = vst.msk [vmem:[%s10598_s4 + $0x98] sm:$0xf] %vm1357_vm0, %v7153_v10  ;;  %v7173_v16 = vpack.c.bf16 %v5500_v60, %v5500_v60 }
 0x1e9   :  { %4837 = vst.msk [vmem:[%s10596_s2 + $0x220] sm:$0xf] %vm1357_vm0, %v2850_v14  ;;  %1713 = vst.msk [vmem:[%s10597_s3 + $0x8c] sm:$0xf] %vm1357_vm0, %v7142_v3  ;;  %v7162_v14 = vpack.c.bf16 %v990_v24, %v990_v24 }
 0x1ea   :  { %v2852_v4 = vpop.permute.xlu1 %2851  ;;  %2596 = vrot.lane.b32.xlu0 %v6436_v9, %s5669_s19  ;;  %v993_v9 = vpop.f32.mrb[71].mxu1  ;;  %2037 = vst.msk [vmem:[%s10598_s4 + $0x9c] sm:$0xf] %vm1357_vm0, %v7173_v16 }
 0x1eb   :  { %10998 = vst [vmem:[#allocation136_spill] sm:$0xff] %v7162_v14  ;;  %4838 = vst.msk [vmem:[%s10596_s2 + $0x224] sm:$0xf] %vm1357_vm0, %v2852_v4  ;;  %v7182_v24 = vpack.c.bf16 %v993_v9, %v993_v9 }
 0x1ec   :  { %v2336_v5 = vpop.permute.xlu0 %2335  ;;  %2598 = vrot.lane.b32.xlu1 %v6456_v52, %s5669_s19  ;;  %2034 = vst.msk [vmem:[%s10598_s4 + $0x90] sm:$0xf] %vm1357_vm0, %v7162_v14 }
 0x1ed   :  { %4709 = vst.msk [vmem:[%s10597_s3 + $0x120] sm:$0xf] %vm1357_vm0, %v2336_v5  ;;  %2035 = vst.msk [vmem:[%s10598_s4 + $0x94] sm:$0xf] %vm1357_vm0, %v7182_v24 }
 0x1ee   :  { %v2338_v4 = vpop.permute.xlu1 %2337  ;;  %2873 = vrot.lane.b32.xlu0 %v6434_v35, %s5663_s25 }
 0x1ef   :  { %4710 = vst.msk [vmem:[%s10597_s3 + $0x124] sm:$0xf] %vm1357_vm0, %v2338_v4  ;;  %v673_v4 = vpop.f32.mrb[72].mxu0 }
 0x1f0   :  { %v2432_v5 = vpop.permute.xlu0 %2431  ;;  %2875 = vrot.lane.b32.xlu1 %v6449_v59, %s5663_s25  ;;  %v675_v59 = vpop.f32.mrb[73].mxu0 }
 0x1f1   :  { %4757 = vst.msk [vmem:[%s10597_s3 + $0x1e0] sm:$0xf] %vm1357_vm0, %v2432_v5  ;;  %v7222_v5 = vpack.c.bf16 %v673_v4, %v673_v4  ;;  %v7226_v52 = vpack.c.bf16 %v675_v59, %v675_v59  ;;  %v5503_v59 = vpop.f32.mrb[72].mxu1 }
 0x1f2   :  { %v2434_v9 = vpop.permute.xlu1 %2433  ;;  %2359 = vrot.lane.b32.xlu0 %v6438_v7, %s5669_s19 }
 0x1f3   :  { %4758 = vst.msk [vmem:[%s10597_s3 + $0x1e4] sm:$0xf] %vm1357_vm0, %v2434_v9  ;;  %10999 = vst [vmem:[#allocation137_spill] sm:$0xff] %v7226_v52  ;;  %v677_v9 = vpop.f32.mrb[74].mxu0 }
 0x1f4   :  { %v2083_v60 = vpop.permute.xlu0 %2082  ;;  %2361 = vrot.lane.b32.xlu1 %v6463_v11, %s5669_s19  ;;  %1394 = vst.msk [vmem:[%s10596_s2 + $0x90] sm:$0xf] %vm1357_vm0, %v7222_v5  ;;  %v679_v4 = vpop.f32.mrb[75].mxu0  ;;  %1714 = vst.msk [vmem:[%s10597_s3 + $0x90] sm:$0xf] %vm1357_vm0, %v7226_v52 }
 0x1f5   :  { %4647 = vst.msk [vmem:[%s10596_s2 + $0x128] sm:$0xf] %vm1357_vm0, %v2083_v60  ;;  %v7237_v60 = vpack.c.bf16 %v677_v9, %v677_v9  ;;  %v7257_v9 = vpack.c.bf16 %v5503_v59, %v5503_v59 }
 0x1f6   :  { %v2085_v35 = vpop.permute.xlu1 %2084  ;;  %2592 = vrot.lane.b32.xlu0 %v6440_v44, %s5669_s19 }
 0x1f7   :  { %4648 = vst.msk [vmem:[%s10596_s2 + $0x12c] sm:$0xf] %vm1357_vm0, %v2085_v35  ;;  %v7246_v35 = vpack.c.bf16 %v679_v4, %v679_v4  ;;  %1395 = vst.msk [vmem:[%s10596_s2 + $0x94] sm:$0xf] %vm1357_vm0, %v7237_v60 }
 0x1f8   :  { %v2179_v11 = vpop.permute.xlu0 %2178  ;;  %2594 = vrot.lane.b32.xlu1 %v6470_v54, %s5669_s19  ;;  %11000 = vst [vmem:[#allocation138_spill] sm:$0xff] %v7257_v9  ;;  %v1006_v54 = vpop.f32.mrb[73].mxu1  ;;  %2040 = vst.msk [vmem:[%s10598_s4 + $0xa8] sm:$0xf] %vm1357_vm0, %v7257_v9 }
 0x1f9   :  { %4695 = vst.msk [vmem:[%s10596_s2 + $0x1e8] sm:$0xf] %vm1357_vm0, %v2179_v11  ;;  %1715 = vst.msk [vmem:[%s10597_s3 + $0x94] sm:$0xf] %vm1357_vm0, %v7246_v35  ;;  %v7266_v11 = vpack.c.bf16 %v1006_v54, %v1006_v54  ;;  %v5504_v4 = vpop.f32.mrb[74].mxu1 }
 0x1fa   :  { %v2181_v44 = vpop.permute.xlu1 %2180  ;;  %2106 = vrot.lane.b32.xlu0 %v6498_v37, %s5669_s19  ;;  %v7277_v59 = vpack.c.bf16 %v5504_v4, %v5504_v4  ;;  %v1009_v7 = vpop.f32.mrb[75].mxu1 }
 0x1fb   :  { %11001 = vst [vmem:[#allocation139_spill] sm:$0xff] %v7266_v11  ;;  %4696 = vst.msk [vmem:[%s10596_s2 + $0x1ec] sm:$0xf] %vm1357_vm0, %v2181_v44  ;;  %v7286_v44 = vpack.c.bf16 %v1009_v7, %v1009_v7 }
 0x1fc   :  { %11002 = vst [vmem:[#allocation140_spill] sm:$0xff] %v7277_v59  ;;  %v2854_v52 = vpop.permute.xlu0 %2853  ;;  %2108 = vrot.lane.b32.xlu1 %v6509_v17, %s5669_s19  ;;  %2038 = vst.msk [vmem:[%s10598_s4 + $0xa0] sm:$0xf] %vm1357_vm0, %v7266_v11 }
 0x1fd   :  { %4839 = vst.msk [vmem:[%s10596_s2 + $0x228] sm:$0xf] %vm1357_vm0, %v2854_v52  ;;  %2041 = vst.msk [vmem:[%s10598_s4 + $0xac] sm:$0xf] %vm1357_vm0, %v7277_v59 }
 0x1fe   :  { %v2856_v54 = vpop.permute.xlu1 %2855  ;;  %2604 = vrot.lane.b32.xlu0 %v6520_v58, %s5669_s19  ;;  %2039 = vst.msk [vmem:[%s10598_s4 + $0xa4] sm:$0xf] %vm1357_vm0, %v7286_v44 }
 0x1ff   :  { %4840 = vst.msk [vmem:[%s10596_s2 + $0x22c] sm:$0xf] %vm1357_vm0, %v2856_v54  ;;  %v683_v54 = vpop.f32.mrb[76].mxu0 }
 0x200   :  { %v2340_v7 = vpop.permute.xlu0 %2339  ;;  %2606 = vrot.lane.b32.xlu1 %v6541_v33, %s5669_s19  ;;  %v685_v33 = vpop.f32.mrb[77].mxu0 }
 0x201   :  { %4711 = vst.msk [vmem:[%s10597_s3 + $0x128] sm:$0xf] %vm1357_vm0, %v2340_v7  ;;  %v7326_v7 = vpack.c.bf16 %v683_v54, %v683_v54 }
 0x202   :  { %v2342_v52 = vpop.permute.xlu1 %2341  ;;  %2877 = vrot.lane.b32.xlu0 %v6498_v37, %s5663_s25  ;;  %v7330_v37 = vpack.c.bf16 %v685_v33, %v685_v33 }
 0x203   :  { %4712 = vst.msk [vmem:[%s10597_s3 + $0x12c] sm:$0xf] %vm1357_vm0, %v2342_v52  ;;  %v687_v52 = vpop.f32.mrb[78].mxu0  ;;  %1396 = vst.msk [vmem:[%s10596_s2 + $0x98] sm:$0xf] %vm1357_vm0, %v7326_v7 }
 0x204   :  { %v2436_v4 = vpop.permute.xlu0 %2435  ;;  %2879 = vrot.lane.b32.xlu1 %v6509_v17, %s5663_s25  ;;  %11003 = vst [vmem:[#allocation141_spill] sm:$0xff] %v7330_v37  ;;  %v689_v54 = vpop.f32.mrb[79].mxu0  ;;  %1716 = vst.msk [vmem:[%s10597_s3 + $0x98] sm:$0xf] %vm1357_vm0, %v7330_v37 }
 0x205   :  { %4759 = vst.msk [vmem:[%s10597_s3 + $0x1e8] sm:$0xf] %vm1357_vm0, %v2436_v4  ;;  %v7341_v4 = vpack.c.bf16 %v687_v52, %v687_v52  ;;  %v7350_v33 = vpack.c.bf16 %v689_v54, %v689_v54 }
 0x206   :  { %v2438_v58 = vpop.permute.xlu1 %2437  ;;  %2363 = vrot.lane.b32.xlu0 %v6502_v62, %s5669_s19 }
 0x207   :  { %4760 = vst.msk [vmem:[%s10597_s3 + $0x1ec] sm:$0xf] %vm1357_vm0, %v2438_v58  ;;  %v5507_v58 = vpop.f32.mrb[76].mxu1  ;;  %1397 = vst.msk [vmem:[%s10596_s2 + $0x9c] sm:$0xf] %vm1357_vm0, %v7341_v4 }
 0x208   :  { %v2087_v17 = vpop.permute.xlu0 %2086  ;;  %2365 = vrot.lane.b32.xlu1 %v6518_v32, %s5669_s19  ;;  %v7361_v52 = vpack.c.bf16 %v5507_v58, %v5507_v58  ;;  %v1022_v32 = vpop.f32.mrb[77].mxu1  ;;  %1717 = vst.msk [vmem:[%s10597_s3 + $0x9c] sm:$0xf] %vm1357_vm0, %v7350_v33 }
 0x209   :  { %4649 = vst.msk [vmem:[%s10596_s2 + $0x130] sm:$0xf] %vm1357_vm0, %v2087_v17  ;;  %v7370_v17 = vpack.c.bf16 %v1022_v32, %v1022_v32  ;;  %v5508_v54 = vpop.f32.mrb[78].mxu1 }
 0x20a   :  { %11004 = vst [vmem:[#allocation142_spill] sm:$0xff] %v7361_v52  ;;  %v2089_v62 = vpop.permute.xlu1 %2088  ;;  %2600 = vrot.lane.b32.xlu0 %v6539_v12, %s5669_s19  ;;  %2044 = vst.msk [vmem:[%s10598_s4 + $0xb8] sm:$0xf] %vm1357_vm0, %v7361_v52  ;;  %v7381_v58 = vpack.c.bf16 %v5508_v54, %v5508_v54  ;;  %v1025_v12 = vpop.f32.mrb[79].mxu1 }
 0x20b   :  { %11005 = vst [vmem:[#allocation143_spill] sm:$0xff] %v7370_v17  ;;  %4650 = vst.msk [vmem:[%s10596_s2 + $0x134] sm:$0xf] %vm1357_vm0, %v2089_v62  ;;  %v7390_v62 = vpack.c.bf16 %v1025_v12, %v1025_v12 }
 0x20c   :  { %11006 = vst [vmem:[#allocation144_spill] sm:$0xff] %v7381_v58  ;;  %v2183_v37 = vpop.permute.xlu0 %2182  ;;  %2602 = vrot.lane.b32.xlu1 %v6550_v23, %s5669_s19  ;;  %2042 = vst.msk [vmem:[%s10598_s4 + $0xb0] sm:$0xf] %vm1357_vm0, %v7370_v17 }
 0x20d   :  { %11007 = vst [vmem:[#allocation145_spill] sm:$0xff] %v7390_v62  ;;  %4697 = vst.msk [vmem:[%s10596_s2 + $0x1f0] sm:$0xf] %vm1357_vm0, %v2183_v37 }
 0x20e   :  { %2045 = vst.msk [vmem:[%s10598_s4 + $0xbc] sm:$0xf] %vm1357_vm0, %v7381_v58  ;;  %v2185_v32 = vpop.permute.xlu1 %2184  ;;  %2110 = vrot.lane.b32.xlu0 %v6574_v21, %s5669_s19  ;;  %2043 = vst.msk [vmem:[%s10598_s4 + $0xb4] sm:$0xf] %vm1357_vm0, %v7390_v62 }
 0x20f   :  { %4698 = vst.msk [vmem:[%s10596_s2 + $0x1f4] sm:$0xf] %vm1357_vm0, %v2185_v32  ;;  %v693_v32 = vpop.f32.mrb[80].mxu0 }
 0x210   :  { %v2858_v37 = vpop.permute.xlu0 %2857  ;;  %2112 = vrot.lane.b32.xlu1 %v6585_v43, %s5669_s19  ;;  %v695_v23 = vpop.f32.mrb[81].mxu0 }
 0x211   :  { %4841 = vst.msk [vmem:[%s10596_s2 + $0x230] sm:$0xf] %vm1357_vm0, %v2858_v37  ;;  %v7430_v37 = vpack.c.bf16 %v693_v32, %v693_v32 }
 0x212   :  { %v2860_v12 = vpop.permute.xlu1 %2859  ;;  %2612 = vrot.lane.b32.xlu0 %v6596_v22, %s5669_s19  ;;  %v7434_v22 = vpack.c.bf16 %v695_v23, %v695_v23 }
 0x213   :  { %4842 = vst.msk [vmem:[%s10596_s2 + $0x234] sm:$0xf] %vm1357_vm0, %v2860_v12  ;;  %v697_v12 = vpop.f32.mrb[82].mxu0  ;;  %1398 = vst.msk [vmem:[%s10596_s2 + $0xa0] sm:$0xf] %vm1357_vm0, %v7430_v37 }
 0x214   :  { %v2344_v54 = vpop.permute.xlu0 %2343  ;;  %2614 = vrot.lane.b32.xlu1 %v6617_v8, %s5669_s19  ;;  %v699_v32 = vpop.f32.mrb[83].mxu0  ;;  %1718 = vst.msk [vmem:[%s10597_s3 + $0xa0] sm:$0xf] %vm1357_vm0, %v7434_v22 }
 0x215   :  { %4713 = vst.msk [vmem:[%s10597_s3 + $0x130] sm:$0xf] %vm1357_vm0, %v2344_v54  ;;  %v7445_v54 = vpack.c.bf16 %v697_v12, %v697_v12  ;;  %v5511_v8 = vpop.f32.mrb[80].mxu1  ;;  %v7454_v23 = vpack.c.bf16 %v699_v32, %v699_v32 }
 0x216   :  { %v2346_v62 = vpop.permute.xlu1 %2345  ;;  %2881 = vrot.lane.b32.xlu0 %v6574_v21, %s5663_s25  ;;  %v1038_v12 = vpop.f32.mrb[81].mxu1 }
 0x217   :  { %4714 = vst.msk [vmem:[%s10597_s3 + $0x134] sm:$0xf] %vm1357_vm0, %v2346_v62  ;;  %v7456_v62 = vpack.c.bf16 %v5511_v8, %v5511_v8  ;;  %1399 = vst.msk [vmem:[%s10596_s2 + $0xa4] sm:$0xf] %vm1357_vm0, %v7445_v54  ;;  %v7479_v8 = vpack.c.bf16 %v1038_v12, %v1038_v12 }
 0x218   :  { %v2440_v17 = vpop.permute.xlu0 %2439  ;;  %2883 = vrot.lane.b32.xlu1 %v6585_v43, %s5663_s25  ;;  %1719 = vst.msk [vmem:[%s10597_s3 + $0xa4] sm:$0xf] %vm1357_vm0, %v7454_v23 }
 0x219   :  { %11008 = vst [vmem:[#allocation146_spill] sm:$0xff] %v7456_v62  ;;  %4761 = vst.msk [vmem:[%s10597_s3 + $0x1f0] sm:$0xf] %vm1357_vm0, %v2440_v17  ;;  %v5512_v17 = vpop.f32.mrb[82].mxu1 }
 0x21a   :  { %v2442_v43 = vpop.permute.xlu1 %2441  ;;  %2367 = vrot.lane.b32.xlu0 %v6578_v45, %s5669_s19  ;;  %2048 = vst.msk [vmem:[%s10598_s4 + $0xc8] sm:$0xf] %vm1357_vm0, %v7456_v62  ;;  %11009 = vst [vmem:[#allocation147_spill] sm:$0xff] %v7479_v8  ;;  %v7485_v32 = vpack.c.bf16 %v5512_v17, %v5512_v17  ;;  %v1041_v21 = vpop.f32.mrb[83].mxu1 }
 0x21b   :  { %4762 = vst.msk [vmem:[%s10597_s3 + $0x1f4] sm:$0xf] %vm1357_vm0, %v2442_v43  ;;  %2046 = vst.msk [vmem:[%s10598_s4 + $0xc0] sm:$0xf] %vm1357_vm0, %v7479_v8  ;;  %v7494_v12 = vpack.c.bf16 %v1041_v21, %v1041_v21 }
 0x21c   :  { %11010 = vst [vmem:[#allocation148_spill] sm:$0xff] %v7485_v32  ;;  %v2091_v45 = vpop.permute.xlu0 %2090  ;;  %2369 = vrot.lane.b32.xlu1 %v6594_v13, %s5669_s19  ;;  %2049 = vst.msk [vmem:[%s10598_s4 + $0xcc] sm:$0xf] %vm1357_vm0, %v7485_v32 }
 0x21d   :  { %11011 = vst [vmem:[#allocation149_spill] sm:$0xff] %v7494_v12  ;;  %4651 = vst.msk [vmem:[%s10596_s2 + $0x138] sm:$0xf] %vm1357_vm0, %v2091_v45 }
 0x21e   :  { %v2093_v43 = vpop.permute.xlu1 %2092  ;;  %2608 = vrot.lane.b32.xlu0 %v6615_v51, %s5669_s19  ;;  %2047 = vst.msk [vmem:[%s10598_s4 + $0xc4] sm:$0xf] %vm1357_vm0, %v7494_v12  ;;  %v5515_v12 = vpop.f32.mrb[84].mxu1 }
 0x21f   :  { %4652 = vst.msk [vmem:[%s10596_s2 + $0x13c] sm:$0xf] %vm1357_vm0, %v2093_v43  ;;  %v703_v43 = vpop.f32.mrb[84].mxu0 }
 0x220   :  { %v2187_v45 = vpop.permute.xlu0 %2186  ;;  %2610 = vrot.lane.b32.xlu1 %v6626_v57, %s5669_s19  ;;  %v705_v57 = vpop.f32.mrb[85].mxu0 }
 0x221   :  { %4699 = vst.msk [vmem:[%s10596_s2 + $0x1f8] sm:$0xf] %vm1357_vm0, %v2187_v45  ;;  %v7534_v45 = vpack.c.bf16 %v703_v43, %v703_v43  ;;  %v7538_v13 = vpack.c.bf16 %v705_v57, %v705_v57 }
 0x222   :  { %v2189_v21 = vpop.permute.xlu1 %2188  ;;  %2114 = vrot.lane.b32.xlu0 %v6678_v19, %s5669_s19 }
 0x223   :  { %4700 = vst.msk [vmem:[%s10596_s2 + $0x1fc] sm:$0xf] %vm1357_vm0, %v2189_v21  ;;  %v707_v21 = vpop.f32.mrb[86].mxu0  ;;  %1400 = vst.msk [vmem:[%s10596_s2 + $0xa8] sm:$0xf] %vm1357_vm0, %v7534_v45 }
 0x224   :  { %v2862_v17 = vpop.permute.xlu0 %2861  ;;  %2116 = vrot.lane.b32.xlu1 %v6693_v1, %s5669_s19  ;;  %v709_v43 = vpop.f32.mrb[87].mxu0  ;;  %1720 = vst.msk [vmem:[%s10597_s3 + $0xa8] sm:$0xf] %vm1357_vm0, %v7538_v13 }
 0x225   :  { %4843 = vst.msk [vmem:[%s10596_s2 + $0x238] sm:$0xf] %vm1357_vm0, %v2862_v17  ;;  %v7549_v17 = vpack.c.bf16 %v707_v21, %v707_v21  ;;  %v7558_v57 = vpack.c.bf16 %v709_v43, %v709_v43  ;;  %v1054_v21 = vpop.f32.mrb[85].mxu1 }
 0x226   :  { %v2864_v51 = vpop.permute.xlu1 %2863  ;;  %2620 = vrot.lane.b32.xlu0 %v6704_v20, %s5669_s19 }
 0x227   :  { %4844 = vst.msk [vmem:[%s10596_s2 + $0x23c] sm:$0xf] %vm1357_vm0, %v2864_v51  ;;  %v7560_v51 = vpack.c.bf16 %v5515_v12, %v5515_v12  ;;  %1401 = vst.msk [vmem:[%s10596_s2 + $0xac] sm:$0xf] %vm1357_vm0, %v7549_v17  ;;  %v5516_v12 = vpop.f32.mrb[86].mxu1 }
 0x228   :  { %v2348_v8 = vpop.permute.xlu0 %2347  ;;  %2622 = vrot.lane.b32.xlu1 %v6733_v49, %s5669_s19  ;;  %1721 = vst.msk [vmem:[%s10597_s3 + $0xac] sm:$0xf] %vm1357_vm0, %v7558_v57  ;;  %v7589_v43 = vpack.c.bf16 %v5516_v12, %v5516_v12 }
 0x229   :  { %11012 = vst [vmem:[#allocation150_spill] sm:$0xff] %v7560_v51  ;;  %4715 = vst.msk [vmem:[%s10597_s3 + $0x138] sm:$0xf] %vm1357_vm0, %v2348_v8  ;;  %v7583_v8 = vpack.c.bf16 %v1054_v21, %v1054_v21 }
 0x22a   :  { %v2350_v49 = vpop.permute.xlu1 %2349  ;;  %2885 = vrot.lane.b32.xlu0 %v6678_v19, %s5663_s25  ;;  %2052 = vst.msk [vmem:[%s10598_s4 + $0xd8] sm:$0xf] %vm1357_vm0, %v7560_v51  ;;  %11013 = vst [vmem:[#allocation151_spill] sm:$0xff] %v7589_v43  ;;  %v1057_v19 = vpop.f32.mrb[87].mxu1 }
 0x22b   :  { %4716 = vst.msk [vmem:[%s10597_s3 + $0x13c] sm:$0xf] %vm1357_vm0, %v2350_v49  ;;  %2050 = vst.msk [vmem:[%s10598_s4 + $0xd0] sm:$0xf] %vm1357_vm0, %v7583_v8  ;;  %v7598_v21 = vpack.c.bf16 %v1057_v19, %v1057_v19 }
 0x22c   :  { %v2444_v20 = vpop.permute.xlu0 %2443  ;;  %2887 = vrot.lane.b32.xlu1 %v6693_v1, %s5663_s25  ;;  %2053 = vst.msk [vmem:[%s10598_s4 + $0xdc] sm:$0xf] %vm1357_vm0, %v7589_v43 }
 0x22d   :  { %4763 = vst.msk [vmem:[%s10597_s3 + $0x1f8] sm:$0xf] %vm1357_vm0, %v2444_v20  ;;  %2051 = vst.msk [vmem:[%s10598_s4 + $0xd4] sm:$0xf] %vm1357_vm0, %v7598_v21 }
 0x22e   :  { %v2446_v49 = vpop.permute.xlu1 %2445  ;;  %2371 = vrot.lane.b32.xlu0 %v6682_v15, %s5669_s19 }
 0x22f   :  { %4764 = vst.msk [vmem:[%s10597_s3 + $0x1fc] sm:$0xf] %vm1357_vm0, %v2446_v49  ;;  %v713_v49 = vpop.f32.mrb[88].mxu0 }
 0x230   :  { %v2095_v19 = vpop.permute.xlu0 %2094  ;;  %2373 = vrot.lane.b32.xlu1 %v6702_v2, %s5669_s19  ;;  %v715_v1 = vpop.f32.mrb[89].mxu0 }
 0x231   :  { %4653 = vst.msk [vmem:[%s10596_s2 + $0x140] sm:$0xf] %vm1357_vm0, %v2095_v19  ;;  %v7638_v19 = vpack.c.bf16 %v713_v49, %v713_v49 }
 0x232   :  { %v2097_v20 = vpop.permute.xlu1 %2096  ;;  %2616 = vrot.lane.b32.xlu0 %v6727_v41, %s5669_s19  ;;  %v7642_v41 = vpack.c.bf16 %v715_v1, %v715_v1 }
 0x233   :  { %4654 = vst.msk [vmem:[%s10596_s2 + $0x144] sm:$0xf] %vm1357_vm0, %v2097_v20  ;;  %11014 = vst [vmem:[#allocation152_spill] sm:$0xff] %v7638_v19  ;;  %v717_v20 = vpop.f32.mrb[90].mxu0 }
 0x234   :  { %v2581_v12 = vpop.permute.xlu0 %2580  ;;  %2618 = vrot.lane.b32.xlu1 %v6742_v28, %s5669_s19  ;;  %11015 = vst [vmem:[#allocation153_spill] sm:$0xff] %v7642_v41  ;;  %1402 = vst.msk [vmem:[%s10596_s2 + $0xb0] sm:$0xf] %vm1357_vm0, %v7638_v19  ;;  %v719_v49 = vpop.f32.mrb[91].mxu0 }
 0x235   :  { %4767 = vst.msk [vmem:[%s10598_s4 + $0x108] sm:$0xf] %vm1357_vm0, %v2581_v12  ;;  %v7653_v12 = vpack.c.bf16 %v717_v20, %v717_v20  ;;  %v5519_v28 = vpop.f32.mrb[88].mxu1  ;;  %1722 = vst.msk [vmem:[%s10597_s3 + $0xb0] sm:$0xf] %vm1357_vm0, %v7642_v41  ;;  %v7662_v1 = vpack.c.bf16 %v719_v49, %v719_v49 }
 0x236   :  { %v2583_v2 = vpop.permute.xlu1 %2582  ;;  %2118 = vrot.lane.b32.xlu0 %v6794_v31, %s5669_s19  ;;  %v1070_v20 = vpop.f32.mrb[89].mxu1 }
 0x237   :  { %4768 = vst.msk [vmem:[%s10598_s4 + $0x10c] sm:$0xf] %vm1357_vm0, %v2583_v2  ;;  %v7664_v2 = vpack.c.bf16 %v5519_v28, %v5519_v28  ;;  %1403 = vst.msk [vmem:[%s10596_s2 + $0xb4] sm:$0xf] %vm1357_vm0, %v7653_v12  ;;  %v5520_v28 = vpop.f32.mrb[90].mxu1 }
 0x238   :  { %v2866_v15 = vpop.permute.xlu0 %2865  ;;  %2120 = vrot.lane.b32.xlu1 %v6809_v30, %s5669_s19  ;;  %1723 = vst.msk [vmem:[%s10597_s3 + $0xb4] sm:$0xf] %vm1357_vm0, %v7662_v1  ;;  %v7693_v49 = vpack.c.bf16 %v5520_v28, %v5520_v28 }
 0x239   :  { %11016 = vst [vmem:[#allocation154_spill] sm:$0xff] %v7664_v2  ;;  %4845 = vst.msk [vmem:[%s10596_s2 + $0x240] sm:$0xf] %vm1357_vm0, %v2866_v15  ;;  %v7687_v15 = vpack.c.bf16 %v1070_v20, %v1070_v20 }
 0x23a   :  { %v2868_v19 = vpop.permute.xlu1 %2867  ;;  %2628 = vrot.lane.b32.xlu0 %v6820_v26, %s5669_s19  ;;  %2056 = vst.msk [vmem:[%s10598_s4 + $0xe8] sm:$0xf] %vm1357_vm0, %v7664_v2  ;;  %v1073_v26 = vpop.f32.mrb[91].mxu1  ;;  %2057 = vst.msk [vmem:[%s10598_s4 + $0xec] sm:$0xf] %vm1357_vm0, %v7693_v49 }
 0x23b   :  { %11017 = vst [vmem:[#allocation155_spill] sm:$0xff] %v7687_v15  ;;  %4846 = vst.msk [vmem:[%s10596_s2 + $0x244] sm:$0xf] %vm1357_vm0, %v2868_v19  ;;  %v7702_v20 = vpack.c.bf16 %v1073_v26, %v1073_v26 }
 0x23c   :  { %v2352_v41 = vpop.permute.xlu0 %2351  ;;  %2630 = vrot.lane.b32.xlu1 %v6849_v48, %s5669_s19  ;;  %2054 = vst.msk [vmem:[%s10598_s4 + $0xe0] sm:$0xf] %vm1357_vm0, %v7687_v15 }
 0x23d   :  { %4717 = vst.msk [vmem:[%s10597_s3 + $0x140] sm:$0xf] %vm1357_vm0, %v2352_v41  ;;  %2055 = vst.msk [vmem:[%s10598_s4 + $0xe4] sm:$0xf] %vm1357_vm0, %v7702_v20 }
 0x23e   :  { %v2354_v19 = vpop.permute.xlu1 %2353  ;;  %2889 = vrot.lane.b32.xlu0 %v6794_v31, %s5663_s25 }
 0x23f   :  { %4718 = vst.msk [vmem:[%s10597_s3 + $0x144] sm:$0xf] %vm1357_vm0, %v2354_v19  ;;  %v723_v19 = vpop.f32.mrb[92].mxu0 }
 0x240   :  { %v2577_v41 = vpop.permute.xlu0 %2576  ;;  %2891 = vrot.lane.b32.xlu1 %v6809_v30, %s5663_s25  ;;  %v725_v30 = vpop.f32.mrb[93].mxu0 }
 0x241   :  { %4765 = vst.msk [vmem:[%s10598_s4 + $0x100] sm:$0xf] %vm1357_vm0, %v2577_v41  ;;  %v7742_v41 = vpack.c.bf16 %v723_v19, %v723_v19  ;;  %v7746_v48 = vpack.c.bf16 %v725_v30, %v725_v30 }
 0x242   :  { %v2579_v26 = vpop.permute.xlu1 %2578  ;;  %2375 = vrot.lane.b32.xlu0 %v6798_v34, %s5669_s19 }
 0x243   :  { %4766 = vst.msk [vmem:[%s10598_s4 + $0x104] sm:$0xf] %vm1357_vm0, %v2579_v26  ;;  %11018 = vst [vmem:[#allocation156_spill] sm:$0xff] %v7742_v41  ;;  %v727_v26 = vpop.f32.mrb[94].mxu0 }
 0x244   :  { %v2099_v28 = vpop.permute.xlu0 %2098  ;;  %2377 = vrot.lane.b32.xlu1 %v6818_v53, %s5669_s19  ;;  %11019 = vst [vmem:[#allocation157_spill] sm:$0xff] %v7746_v48  ;;  %1404 = vst.msk [vmem:[%s10596_s2 + $0xb8] sm:$0xf] %vm1357_vm0, %v7742_v41  ;;  %v729_v19 = vpop.f32.mrb[95].mxu0 }
 0x245   :  { %4655 = vst.msk [vmem:[%s10596_s2 + $0x148] sm:$0xf] %vm1357_vm0, %v2099_v28  ;;  %v7757_v28 = vpack.c.bf16 %v727_v26, %v727_v26  ;;  %v5523_v53 = vpop.f32.mrb[92].mxu1  ;;  %1724 = vst.msk [vmem:[%s10597_s3 + $0xb8] sm:$0xf] %vm1357_vm0, %v7746_v48 }
 0x246   :  { %v2101_v31 = vpop.permute.xlu1 %2100  ;;  %2624 = vrot.lane.b32.xlu0 %v6843_v61, %s5669_s19  ;;  %v7768_v30 = vpack.c.bf16 %v5523_v53, %v5523_v53  ;;  %v1086_v26 = vpop.f32.mrb[93].mxu1 }
 0x247   :  { %4656 = vst.msk [vmem:[%s10596_s2 + $0x14c] sm:$0xf] %vm1357_vm0, %v2101_v31  ;;  %11020 = vst [vmem:[#allocation158_spill] sm:$0xff] %v7757_v28  ;;  %v7766_v31 = vpack.c.bf16 %v729_v19, %v729_v19  ;;  %v5524_v53 = vpop.f32.mrb[94].mxu1 }
 0x248   :  { %v2589_v34 = vpop.permute.xlu0 %2588  ;;  %2626 = vrot.lane.b32.xlu1 %v6858_v6, %s5669_s19  ;;  %11022 = vst [vmem:[#allocation160_spill] sm:$0xff] %v7768_v30  ;;  %1405 = vst.msk [vmem:[%s10596_s2 + $0xbc] sm:$0xf] %vm1357_vm0, %v7757_v28  ;;  %v7797_v19 = vpack.c.bf16 %v5524_v53, %v5524_v53  ;;  %v1089_v61 = vpop.f32.mrb[95].mxu1 }
 0x249   :  { %11021 = vst [vmem:[#allocation159_spill] sm:$0xff] %v7766_v31  ;;  %4771 = vst.msk [vmem:[%s10598_s4 + $0x118] sm:$0xf] %vm1357_vm0, %v2589_v34  ;;  %v7791_v34 = vpack.c.bf16 %v1086_v26, %v1086_v26  ;;  %v7806_v26 = vpack.c.bf16 %v1089_v61, %v1089_v61 }
 0x24a   :  { %v2591_v6 = vpop.permute.xlu1 %2590  ;;  %2122 = vrot.lane.b32.xlu0 %v6910_v50, %s5669_s19  ;;  %1725 = vst.msk [vmem:[%s10597_s3 + $0xbc] sm:$0xf] %vm1357_vm0, %v7766_v31  ;;  %2060 = vst.msk [vmem:[%s10598_s4 + $0xf8] sm:$0xf] %vm1357_vm0, %v7768_v30 }
 0x24b   :  { %4772 = vst.msk [vmem:[%s10598_s4 + $0x11c] sm:$0xf] %vm1357_vm0, %v2591_v6  ;;  %11023 = vst [vmem:[#allocation161_spill] sm:$0xff] %v7797_v19 }
 0x24c   :  { %v2870_v50 = vpop.permute.xlu0 %2869  ;;  %2124 = vrot.lane.b32.xlu1 %v6925_v27, %s5669_s19  ;;  %2058 = vst.msk [vmem:[%s10598_s4 + $0xf0] sm:$0xf] %vm1357_vm0, %v7791_v34  ;;  %11024 = vst [vmem:[#allocation162_spill] sm:$0xff] %v7806_v26 }
 0x24d   :  { %4847 = vst.msk [vmem:[%s10596_s2 + $0x248] sm:$0xf] %vm1357_vm0, %v2870_v50  ;;  %2061 = vst.msk [vmem:[%s10598_s4 + $0xfc] sm:$0xf] %vm1357_vm0, %v7797_v19 }
 0x24e   :  { %v2872_v6 = vpop.permute.xlu1 %2871  ;;  %2636 = vrot.lane.b32.xlu0 %v6936_v42, %s5669_s19  ;;  %2059 = vst.msk [vmem:[%s10598_s4 + $0xf4] sm:$0xf] %vm1357_vm0, %v7806_v26 }
 0x24f   :  { %4848 = vst.msk [vmem:[%s10596_s2 + $0x24c] sm:$0xf] %vm1357_vm0, %v2872_v6 }
 0x250   :  { %v2356_v61 = vpop.permute.xlu0 %2355  ;;  %2638 = vrot.lane.b32.xlu1 %v6965_v36, %s5669_s19 }
 0x251   :  { %4719 = vst.msk [vmem:[%s10597_s3 + $0x148] sm:$0xf] %vm1357_vm0, %v2356_v61 }
 0x252   :  { %v2358_v50 = vpop.permute.xlu1 %2357  ;;  %2379 = vrot.lane.b32.xlu0 %v6914_v63, %s5669_s19 }
 0x253   :  { %4720 = vst.msk [vmem:[%s10597_s3 + $0x14c] sm:$0xf] %vm1357_vm0, %v2358_v50 }
 0x254   :  { %v2585_v53 = vpop.permute.xlu0 %2584  ;;  %2381 = vrot.lane.b32.xlu1 %v6934_v29, %s5669_s19 }
 0x255   :  { %4769 = vst.msk [vmem:[%s10598_s4 + $0x110] sm:$0xf] %vm1357_vm0, %v2585_v53 }
 0x256   :  { %v2587_v6 = vpop.permute.xlu1 %2586  ;;  %2632 = vrot.lane.b32.xlu0 %v6959_v0, %s5669_s19 }
 0x257   :  { %4770 = vst.msk [vmem:[%s10598_s4 + $0x114] sm:$0xf] %vm1357_vm0, %v2587_v6 }
 0x258   :  { %v2103_v61 = vpop.permute.xlu0 %2102  ;;  %2634 = vrot.lane.b32.xlu1 %v6974_v38, %s5669_s19 }
 0x259   :  { %4657 = vst.msk [vmem:[%s10596_s2 + $0x150] sm:$0xf] %vm1357_vm0, %v2103_v61 }
 0x25a   :  { %v2105_v50 = vpop.permute.xlu1 %2104  ;;  %2126 = vrot.lane.b32.xlu0 %v7014_v47, %s5669_s19 }
 0x25b   :  { %4658 = vst.msk [vmem:[%s10596_s2 + $0x154] sm:$0xf] %vm1357_vm0, %v2105_v50 }
 0x25c   :  { %v2597_v53 = vpop.permute.xlu0 %2596  ;;  %2128 = vrot.lane.b32.xlu1 %v7029_v55, %s5669_s19 }
 0x25d   :  { %4775 = vst.msk [vmem:[%s10598_s4 + $0x128] sm:$0xf] %vm1357_vm0, %v2597_v53  ;;  %v11025_v53 = vld [vmem:[#allocation129_spill] sm:$0xff] }
 0x25e   :  { %v2599_v6 = vpop.permute.xlu1 %2598  ;;  %2644 = vrot.lane.b32.xlu0 %v7049_v40, %s5669_s19 }
 0x25f   :  { %4776 = vst.msk [vmem:[%s10598_s4 + $0x12c] sm:$0xf] %vm1357_vm0, %v2599_v6 }
 0x260   :  { %v2874_v61 = vpop.permute.xlu0 %2873  ;;  %2646 = vrot.lane.b32.xlu1 %v7069_v39, %s5669_s19 }
 0x261   :  { %4849 = vst.msk [vmem:[%s10596_s2 + $0x250] sm:$0xf] %vm1357_vm0, %v2874_v61 }
 0x262   :  { %v2876_v50 = vpop.permute.xlu1 %2875  ;;  %2383 = vrot.lane.b32.xlu0 %v11025_v53, %s5669_s19 }
 0x263   :  { %4850 = vst.msk [vmem:[%s10596_s2 + $0x254] sm:$0xf] %vm1357_vm0, %v2876_v50 }
 0x264   :  { %v2360_v40 = vpop.permute.xlu0 %2359  ;;  %2385 = vrot.lane.b32.xlu1 %v7038_v25, %s5669_s19 }
 0x265   :  { %4721 = vst.msk [vmem:[%s10597_s3 + $0x150] sm:$0xf] %vm1357_vm0, %v2360_v40  ;;  %v11026_v40 = vld [vmem:[#allocation133_spill] sm:$0xff] }
 0x266   :  { %v2362_v6 = vpop.permute.xlu1 %2361  ;;  %2640 = vrot.lane.b32.xlu0 %v7058_v56, %s5669_s19 }
 0x267   :  { %4722 = vst.msk [vmem:[%s10597_s3 + $0x154] sm:$0xf] %vm1357_vm0, %v2362_v6 }
 0x268   :  { %v2593_v61 = vpop.permute.xlu0 %2592  ;;  %2642 = vrot.lane.b32.xlu1 %v7078_v46, %s5669_s19 }
 0x269   :  { %4773 = vst.msk [vmem:[%s10598_s4 + $0x120] sm:$0xf] %vm1357_vm0, %v2593_v61 }
 0x26a   :  { %v2595_v50 = vpop.permute.xlu1 %2594  ;;  %2130 = vrot.lane.b32.xlu0 %v11026_v40, %s5669_s19 }
 0x26b   :  { %4774 = vst.msk [vmem:[%s10598_s4 + $0x124] sm:$0xf] %vm1357_vm0, %v2595_v50 }
 0x26c   :  { %v2107_v39 = vpop.permute.xlu0 %2106  ;;  %2132 = vrot.lane.b32.xlu1 %v7133_v18, %s5669_s19 }
 0x26d   :  { %4659 = vst.msk [vmem:[%s10596_s2 + $0x158] sm:$0xf] %vm1357_vm0, %v2107_v39  ;;  %v11027_v39 = vld [vmem:[#allocation134_spill] sm:$0xff] }
 0x26e   :  { %v2109_v6 = vpop.permute.xlu1 %2108  ;;  %2652 = vrot.lane.b32.xlu0 %v7153_v10, %s5669_s19 }
 0x26f   :  { %4660 = vst.msk [vmem:[%s10596_s2 + $0x15c] sm:$0xf] %vm1357_vm0, %v2109_v6 }
 0x270   :  { %v2605_v61 = vpop.permute.xlu0 %2604  ;;  %2654 = vrot.lane.b32.xlu1 %v7173_v16, %s5669_s19 }
 0x271   :  { %4779 = vst.msk [vmem:[%s10598_s4 + $0x138] sm:$0xf] %vm1357_vm0, %v2605_v61 }
 0x272   :  { %v2607_v50 = vpop.permute.xlu1 %2606  ;;  %2387 = vrot.lane.b32.xlu0 %v11027_v39, %s5669_s19 }
 0x273   :  { %4780 = vst.msk [vmem:[%s10598_s4 + $0x13c] sm:$0xf] %vm1357_vm0, %v2607_v50 }
 0x274   :  { %v2878_v10 = vpop.permute.xlu0 %2877  ;;  %2389 = vrot.lane.b32.xlu1 %v7142_v3, %s5669_s19 }
 0x275   :  { %4851 = vst.msk [vmem:[%s10596_s2 + $0x258] sm:$0xf] %vm1357_vm0, %v2878_v10 }
 0x276   :  { %v2880_v6 = vpop.permute.xlu1 %2879  ;;  %2648 = vrot.lane.b32.xlu0 %v7162_v14, %s5669_s19 }
 0x277   :  { %4852 = vst.msk [vmem:[%s10596_s2 + $0x25c] sm:$0xf] %vm1357_vm0, %v2880_v6 }
 0x278   :  { %v2364_v61 = vpop.permute.xlu0 %2363  ;;  %2650 = vrot.lane.b32.xlu1 %v7182_v24, %s5669_s19 }
 0x279   :  { %4723 = vst.msk [vmem:[%s10597_s3 + $0x158] sm:$0xf] %vm1357_vm0, %v2364_v61 }
 0x27a   :  { %v2366_v50 = vpop.permute.xlu1 %2365  ;;  %2134 = vrot.lane.b32.xlu0 %v7222_v5, %s5669_s19 }
 0x27b   :  { %4724 = vst.msk [vmem:[%s10597_s3 + $0x15c] sm:$0xf] %vm1357_vm0, %v2366_v50 }
 0x27c   :  { %v2601_v10 = vpop.permute.xlu0 %2600  ;;  %2136 = vrot.lane.b32.xlu1 %v7237_v60, %s5669_s19 }
 0x27d   :  { %4777 = vst.msk [vmem:[%s10598_s4 + $0x130] sm:$0xf] %vm1357_vm0, %v2601_v10  ;;  %v11028_v10 = vld [vmem:[#allocation137_spill] sm:$0xff] }
 0x27e   :  { %v2603_v6 = vpop.permute.xlu1 %2602  ;;  %2660 = vrot.lane.b32.xlu0 %v7257_v9, %s5669_s19 }
 0x27f   :  { %4778 = vst.msk [vmem:[%s10598_s4 + $0x134] sm:$0xf] %vm1357_vm0, %v2603_v6 }
 0x280   :  { %v2111_v61 = vpop.permute.xlu0 %2110  ;;  %2662 = vrot.lane.b32.xlu1 %v7277_v59, %s5669_s19 }
 0x281   :  { %4661 = vst.msk [vmem:[%s10596_s2 + $0x160] sm:$0xf] %vm1357_vm0, %v2111_v61 }
 0x282   :  { %v2113_v50 = vpop.permute.xlu1 %2112  ;;  %2391 = vrot.lane.b32.xlu0 %v11028_v10, %s5669_s19 }
 0x283   :  { %4662 = vst.msk [vmem:[%s10596_s2 + $0x164] sm:$0xf] %vm1357_vm0, %v2113_v50 }
 0x284   :  { %v2613_v9 = vpop.permute.xlu0 %2612  ;;  %2393 = vrot.lane.b32.xlu1 %v7246_v35, %s5669_s19 }
 0x285   :  { %4783 = vst.msk [vmem:[%s10598_s4 + $0x148] sm:$0xf] %vm1357_vm0, %v2613_v9 }
 0x286   :  { %v2615_v6 = vpop.permute.xlu1 %2614  ;;  %2656 = vrot.lane.b32.xlu0 %v7266_v11, %s5669_s19 }
 0x287   :  { %4784 = vst.msk [vmem:[%s10598_s4 + $0x14c] sm:$0xf] %vm1357_vm0, %v2615_v6 }
 0x288   :  { %v2882_v61 = vpop.permute.xlu0 %2881  ;;  %2658 = vrot.lane.b32.xlu1 %v7286_v44, %s5669_s19 }
 0x289   :  { %4853 = vst.msk [vmem:[%s10596_s2 + $0x260] sm:$0xf] %vm1357_vm0, %v2882_v61 }
 0x28a   :  { %v2884_v50 = vpop.permute.xlu1 %2883  ;;  %2138 = vrot.lane.b32.xlu0 %v7326_v7, %s5669_s19 }
 0x28b   :  { %4854 = vst.msk [vmem:[%s10596_s2 + $0x264] sm:$0xf] %vm1357_vm0, %v2884_v50 }
 0x28c   :  { %v2368_v9 = vpop.permute.xlu0 %2367  ;;  %2140 = vrot.lane.b32.xlu1 %v7341_v4, %s5669_s19 }
 0x28d   :  { %4725 = vst.msk [vmem:[%s10597_s3 + $0x160] sm:$0xf] %vm1357_vm0, %v2368_v9  ;;  %v11029_v9 = vld [vmem:[#allocation141_spill] sm:$0xff] }
 0x28e   :  { %v2370_v6 = vpop.permute.xlu1 %2369  ;;  %2668 = vrot.lane.b32.xlu0 %v7361_v52, %s5669_s19 }
 0x28f   :  { %4726 = vst.msk [vmem:[%s10597_s3 + $0x164] sm:$0xf] %vm1357_vm0, %v2370_v6 }
 0x290   :  { %v2609_v61 = vpop.permute.xlu0 %2608  ;;  %2670 = vrot.lane.b32.xlu1 %v7381_v58, %s5669_s19 }
 0x291   :  { %4781 = vst.msk [vmem:[%s10598_s4 + $0x140] sm:$0xf] %vm1357_vm0, %v2609_v61  ;;  %v11030_v61 = vld [vmem:[#allocation143_spill] sm:$0xff] }
 0x292   :  { %v2611_v50 = vpop.permute.xlu1 %2610  ;;  %2395 = vrot.lane.b32.xlu0 %v11029_v9, %s5669_s19 }
 0x293   :  { %4782 = vst.msk [vmem:[%s10598_s4 + $0x144] sm:$0xf] %vm1357_vm0, %v2611_v50  ;;  %v11031_v50 = vld [vmem:[#allocation145_spill] sm:$0xff] }
 0x294   :  { %v2115_v52 = vpop.permute.xlu0 %2114  ;;  %2397 = vrot.lane.b32.xlu1 %v7350_v33, %s5669_s19 }
 0x295   :  { %4663 = vst.msk [vmem:[%s10596_s2 + $0x168] sm:$0xf] %vm1357_vm0, %v2115_v52 }
 0x296   :  { %v2117_v6 = vpop.permute.xlu1 %2116  ;;  %2664 = vrot.lane.b32.xlu0 %v11030_v61, %s5669_s19 }
 0x297   :  { %4664 = vst.msk [vmem:[%s10596_s2 + $0x16c] sm:$0xf] %vm1357_vm0, %v2117_v6 }
 0x298   :  { %v2621_v58 = vpop.permute.xlu0 %2620  ;;  %2666 = vrot.lane.b32.xlu1 %v11031_v50, %s5669_s19 }
 0x299   :  { %4787 = vst.msk [vmem:[%s10598_s4 + $0x158] sm:$0xf] %vm1357_vm0, %v2621_v58 }
 0x29a   :  { %v2623_v59 = vpop.permute.xlu1 %2622  ;;  %2142 = vrot.lane.b32.xlu0 %v7430_v37, %s5669_s19 }
 0x29b   :  { %4788 = vst.msk [vmem:[%s10598_s4 + $0x15c] sm:$0xf] %vm1357_vm0, %v2623_v59 }
 0x29c   :  { %v2886_v52 = vpop.permute.xlu0 %2885  ;;  %2144 = vrot.lane.b32.xlu1 %v7445_v54, %s5669_s19 }
 0x29d   :  { %4855 = vst.msk [vmem:[%s10596_s2 + $0x268] sm:$0xf] %vm1357_vm0, %v2886_v52 }
 0x29e   :  { %v2888_v6 = vpop.permute.xlu1 %2887  ;;  %2676 = vrot.lane.b32.xlu0 %v7456_v62, %s5669_s19 }
 0x29f   :  { %4856 = vst.msk [vmem:[%s10596_s2 + $0x26c] sm:$0xf] %vm1357_vm0, %v2888_v6 }
 0x2a0   :  { %v2372_v58 = vpop.permute.xlu0 %2371  ;;  %2678 = vrot.lane.b32.xlu1 %v7485_v32, %s5669_s19 }
 0x2a1   :  { %4727 = vst.msk [vmem:[%s10597_s3 + $0x168] sm:$0xf] %vm1357_vm0, %v2372_v58  ;;  %v11032_v58 = vld [vmem:[#allocation147_spill] sm:$0xff] }
 0x2a2   :  { %v2374_v59 = vpop.permute.xlu1 %2373  ;;  %2399 = vrot.lane.b32.xlu0 %v7434_v22, %s5669_s19 }
 0x2a3   :  { %4728 = vst.msk [vmem:[%s10597_s3 + $0x16c] sm:$0xf] %vm1357_vm0, %v2374_v59  ;;  %v11033_v59 = vld [vmem:[#allocation149_spill] sm:$0xff] }
 0x2a4   :  { %v2617_v52 = vpop.permute.xlu0 %2616  ;;  %2401 = vrot.lane.b32.xlu1 %v7454_v23, %s5669_s19 }
 0x2a5   :  { %4785 = vst.msk [vmem:[%s10598_s4 + $0x150] sm:$0xf] %vm1357_vm0, %v2617_v52 }
 0x2a6   :  { %v2619_v6 = vpop.permute.xlu1 %2618  ;;  %2672 = vrot.lane.b32.xlu0 %v11032_v58, %s5669_s19 }
 0x2a7   :  { %4786 = vst.msk [vmem:[%s10598_s4 + $0x154] sm:$0xf] %vm1357_vm0, %v2619_v6 }
 0x2a8   :  { %v2119_v32 = vpop.permute.xlu0 %2118  ;;  %2674 = vrot.lane.b32.xlu1 %v11033_v59, %s5669_s19 }
 0x2a9   :  { %4665 = vst.msk [vmem:[%s10596_s2 + $0x170] sm:$0xf] %vm1357_vm0, %v2119_v32 }
 0x2aa   :  { %v2121_v62 = vpop.permute.xlu1 %2120  ;;  %2146 = vrot.lane.b32.xlu0 %v7534_v45, %s5669_s19 }
 0x2ab   :  { %4666 = vst.msk [vmem:[%s10596_s2 + $0x174] sm:$0xf] %vm1357_vm0, %v2121_v62 }
 0x2ac   :  { %v2629_v52 = vpop.permute.xlu0 %2628  ;;  %2148 = vrot.lane.b32.xlu1 %v7549_v17, %s5669_s19 }
 0x2ad   :  { %4791 = vst.msk [vmem:[%s10598_s4 + $0x168] sm:$0xf] %vm1357_vm0, %v2629_v52 }
 0x2ae   :  { %v2631_v6 = vpop.permute.xlu1 %2630  ;;  %2684 = vrot.lane.b32.xlu0 %v7560_v51, %s5669_s19 }
 0x2af   :  { %4792 = vst.msk [vmem:[%s10598_s4 + $0x16c] sm:$0xf] %vm1357_vm0, %v2631_v6 }
 0x2b0   :  { %v2890_v32 = vpop.permute.xlu0 %2889  ;;  %2686 = vrot.lane.b32.xlu1 %v7589_v43, %s5669_s19 }
 0x2b1   :  { %4857 = vst.msk [vmem:[%s10596_s2 + $0x270] sm:$0xf] %vm1357_vm0, %v2890_v32 }
 0x2b2   :  { %v2892_v62 = vpop.permute.xlu1 %2891  ;;  %2403 = vrot.lane.b32.xlu0 %v7538_v13, %s5669_s19 }
 0x2b3   :  { %4858 = vst.msk [vmem:[%s10596_s2 + $0x274] sm:$0xf] %vm1357_vm0, %v2892_v62 }
 0x2b4   :  { %v2376_v52 = vpop.permute.xlu0 %2375  ;;  %2405 = vrot.lane.b32.xlu1 %v7558_v57, %s5669_s19 }
 0x2b5   :  { %4729 = vst.msk [vmem:[%s10597_s3 + $0x170] sm:$0xf] %vm1357_vm0, %v2376_v52  ;;  %v11034_v52 = vld [vmem:[#allocation152_spill] sm:$0xff] }
 0x2b6   :  { %v2378_v6 = vpop.permute.xlu1 %2377  ;;  %2680 = vrot.lane.b32.xlu0 %v7583_v8, %s5669_s19 }
 0x2b7   :  { %4730 = vst.msk [vmem:[%s10597_s3 + $0x174] sm:$0xf] %vm1357_vm0, %v2378_v6 }
 0x2b8   :  { %v2625_v32 = vpop.permute.xlu0 %2624  ;;  %2682 = vrot.lane.b32.xlu1 %v7598_v21, %s5669_s19 }
 0x2b9   :  { %4789 = vst.msk [vmem:[%s10598_s4 + $0x160] sm:$0xf] %vm1357_vm0, %v2625_v32 }
 0x2ba   :  { %v2627_v62 = vpop.permute.xlu1 %2626  ;;  %2150 = vrot.lane.b32.xlu0 %v11034_v52, %s5669_s19 }
 0x2bb   :  { %4790 = vst.msk [vmem:[%s10598_s4 + $0x164] sm:$0xf] %vm1357_vm0, %v2627_v62 }
 0x2bc   :  { %v2123_v43 = vpop.permute.xlu0 %2122  ;;  %2152 = vrot.lane.b32.xlu1 %v7653_v12, %s5669_s19 }
 0x2bd   :  { %4667 = vst.msk [vmem:[%s10596_s2 + $0x178] sm:$0xf] %vm1357_vm0, %v2123_v43  ;;  %v11035_v43 = vld [vmem:[#allocation153_spill] sm:$0xff] }
 0x2be   :  { %v2125_v6 = vpop.permute.xlu1 %2124  ;;  %2692 = vrot.lane.b32.xlu0 %v7664_v2, %s5669_s19 }
 0x2bf   :  { %4668 = vst.msk [vmem:[%s10596_s2 + $0x17c] sm:$0xf] %vm1357_vm0, %v2125_v6 }
 0x2c0   :  { %v2637_v32 = vpop.permute.xlu0 %2636  ;;  %2694 = vrot.lane.b32.xlu1 %v7693_v49, %s5669_s19 }
 0x2c1   :  { %4795 = vst.msk [vmem:[%s10598_s4 + $0x178] sm:$0xf] %vm1357_vm0, %v2637_v32 }
 0x2c2   :  { %v2639_v62 = vpop.permute.xlu1 %2638  ;;  %2407 = vrot.lane.b32.xlu0 %v11035_v43, %s5669_s19 }
 0x2c3   :  { %4796 = vst.msk [vmem:[%s10598_s4 + $0x17c] sm:$0xf] %vm1357_vm0, %v2639_v62 }
 0x2c4   :  { %v2380_v2 = vpop.permute.xlu0 %2379  ;;  %2409 = vrot.lane.b32.xlu1 %v7662_v1, %s5669_s19 }
 0x2c5   :  { %4731 = vst.msk [vmem:[%s10597_s3 + $0x178] sm:$0xf] %vm1357_vm0, %v2380_v2 }
 0x2c6   :  { %v2382_v6 = vpop.permute.xlu1 %2381  ;;  %2688 = vrot.lane.b32.xlu0 %v7687_v15, %s5669_s19 }
 0x2c7   :  { %4732 = vst.msk [vmem:[%s10597_s3 + $0x17c] sm:$0xf] %vm1357_vm0, %v2382_v6 }
 0x2c8   :  { %v2633_v32 = vpop.permute.xlu0 %2632  ;;  %2690 = vrot.lane.b32.xlu1 %v7702_v20, %s5669_s19 }
 0x2c9   :  { %4793 = vst.msk [vmem:[%s10598_s4 + $0x170] sm:$0xf] %vm1357_vm0, %v2633_v32 }
 0x2ca   :  { %v2635_v62 = vpop.permute.xlu1 %2634  ;;  %2154 = vrot.lane.b32.xlu0 %v7742_v41, %s5669_s19 }
 0x2cb   :  { %4794 = vst.msk [vmem:[%s10598_s4 + $0x174] sm:$0xf] %vm1357_vm0, %v2635_v62 }
 0x2cc   :  { %v2127_v2 = vpop.permute.xlu0 %2126  ;;  %2156 = vrot.lane.b32.xlu1 %v7757_v28, %s5669_s19 }
 0x2cd   :  { %4669 = vst.msk [vmem:[%s10596_s2 + $0x180] sm:$0xf] %vm1357_vm0, %v2127_v2 }
 0x2ce   :  { %v2129_v6 = vpop.permute.xlu1 %2128  ;;  %2700 = vrot.lane.b32.xlu0 %v7768_v30, %s5669_s19 }
 0x2cf   :  { %4670 = vst.msk [vmem:[%s10596_s2 + $0x184] sm:$0xf] %vm1357_vm0, %v2129_v6 }
 0x2d0   :  { %v2645_v32 = vpop.permute.xlu0 %2644  ;;  %2702 = vrot.lane.b32.xlu1 %v7797_v19, %s5669_s19 }
 0x2d1   :  { %4799 = vst.msk [vmem:[%s10598_s4 + $0x188] sm:$0xf] %vm1357_vm0, %v2645_v32 }
 0x2d2   :  { %v2647_v62 = vpop.permute.xlu1 %2646  ;;  %2411 = vrot.lane.b32.xlu0 %v7746_v48, %s5669_s19 }
 0x2d3   :  { %4800 = vst.msk [vmem:[%s10598_s4 + $0x18c] sm:$0xf] %vm1357_vm0, %v2647_v62 }
 0x2d4   :  { %v2384_v2 = vpop.permute.xlu0 %2383  ;;  %2413 = vrot.lane.b32.xlu1 %v7766_v31, %s5669_s19 }
 0x2d5   :  { %4733 = vst.msk [vmem:[%s10597_s3 + $0x180] sm:$0xf] %vm1357_vm0, %v2384_v2  ;;  %v11036_v2 = vld [vmem:[#allocation128_spill] sm:$0xff] }
 0x2d6   :  { %v2386_v6 = vpop.permute.xlu1 %2385  ;;  %2696 = vrot.lane.b32.xlu0 %v7791_v34, %s5669_s19 }
 0x2d7   :  { %4734 = vst.msk [vmem:[%s10597_s3 + $0x184] sm:$0xf] %vm1357_vm0, %v2386_v6 }
 0x2d8   :  { %v2641_v32 = vpop.permute.xlu0 %2640  ;;  %2698 = vrot.lane.b32.xlu1 %v7806_v26, %s5669_s19 }
 0x2d9   :  { %4797 = vst.msk [vmem:[%s10598_s4 + $0x180] sm:$0xf] %vm1357_vm0, %v2641_v32 }
 0x2da   :  { %v2643_v62 = vpop.permute.xlu1 %2642  ;;  %2893 = vrot.lane.b32.xlu0 %v11036_v2, %s5663_s25 }
 0x2db   :  { %4798 = vst.msk [vmem:[%s10598_s4 + $0x184] sm:$0xf] %vm1357_vm0, %v2643_v62 }
 0x2dc   :  { %v2131_v19 = vpop.permute.xlu0 %2130  ;;  %2895 = vrot.lane.b32.xlu1 %v6925_v27, %s5663_s25 }
 0x2dd   :  { %4671 = vst.msk [vmem:[%s10596_s2 + $0x188] sm:$0xf] %vm1357_vm0, %v2131_v19 }
 0x2de   :  { %v2133_v6 = vpop.permute.xlu1 %2132  ;;  %2897 = vrot.lane.b32.xlu0 %v7014_v47, %s5663_s25 }
 0x2df   :  { %4672 = vst.msk [vmem:[%s10596_s2 + $0x18c] sm:$0xf] %vm1357_vm0, %v2133_v6 }
 0x2e0   :  { %v2653_v32 = vpop.permute.xlu0 %2652  ;;  %2899 = vrot.lane.b32.xlu1 %v7029_v55, %s5663_s25 }
 0x2e1   :  { %4803 = vst.msk [vmem:[%s10598_s4 + $0x198] sm:$0xf] %vm1357_vm0, %v2653_v32 }
 0x2e2   :  { %v2655_v62 = vpop.permute.xlu1 %2654  ;;  %2901 = vrot.lane.b32.xlu0 %v11026_v40, %s5663_s25 }
 0x2e3   :  { %4804 = vst.msk [vmem:[%s10598_s4 + $0x19c] sm:$0xf] %vm1357_vm0, %v2655_v62 }
 0x2e4   :  { %v2388_v19 = vpop.permute.xlu0 %2387  ;;  %2903 = vrot.lane.b32.xlu1 %v7133_v18, %s5663_s25 }
 0x2e5   :  { %4735 = vst.msk [vmem:[%s10597_s3 + $0x188] sm:$0xf] %vm1357_vm0, %v2388_v19 }
 0x2e6   :  { %v2390_v6 = vpop.permute.xlu1 %2389  ;;  %2905 = vrot.lane.b32.xlu0 %v7222_v5, %s5663_s25 }
 0x2e7   :  { %4736 = vst.msk [vmem:[%s10597_s3 + $0x18c] sm:$0xf] %vm1357_vm0, %v2390_v6 }
 0x2e8   :  { %v2649_v32 = vpop.permute.xlu0 %2648  ;;  %2907 = vrot.lane.b32.xlu1 %v7237_v60, %s5663_s25 }
 0x2e9   :  { %4801 = vst.msk [vmem:[%s10598_s4 + $0x190] sm:$0xf] %vm1357_vm0, %v2649_v32 }
 0x2ea   :  { %v2651_v62 = vpop.permute.xlu1 %2650  ;;  %2909 = vrot.lane.b32.xlu0 %v7326_v7, %s5663_s25 }
 0x2eb   :  { %4802 = vst.msk [vmem:[%s10598_s4 + $0x194] sm:$0xf] %vm1357_vm0, %v2651_v62 }
 0x2ec   :  { %v2135_v19 = vpop.permute.xlu0 %2134  ;;  %2911 = vrot.lane.b32.xlu1 %v7341_v4, %s5663_s25 }
 0x2ed   :  { %4673 = vst.msk [vmem:[%s10596_s2 + $0x190] sm:$0xf] %vm1357_vm0, %v2135_v19 }
 0x2ee   :  { %v2137_v6 = vpop.permute.xlu1 %2136  ;;  %2913 = vrot.lane.b32.xlu0 %v7430_v37, %s5663_s25 }
 0x2ef   :  { %4674 = vst.msk [vmem:[%s10596_s2 + $0x194] sm:$0xf] %vm1357_vm0, %v2137_v6 }
 0x2f0   :  { %v2661_v32 = vpop.permute.xlu0 %2660  ;;  %2915 = vrot.lane.b32.xlu1 %v7445_v54, %s5663_s25 }
 0x2f1   :  { %4807 = vst.msk [vmem:[%s10598_s4 + $0x1a8] sm:$0xf] %vm1357_vm0, %v2661_v32 }
 0x2f2   :  { %v2663_v62 = vpop.permute.xlu1 %2662  ;;  %2917 = vrot.lane.b32.xlu0 %v7534_v45, %s5663_s25 }
 0x2f3   :  { %4808 = vst.msk [vmem:[%s10598_s4 + $0x1ac] sm:$0xf] %vm1357_vm0, %v2663_v62 }
 0x2f4   :  { %v2392_v19 = vpop.permute.xlu0 %2391  ;;  %2919 = vrot.lane.b32.xlu1 %v7549_v17, %s5663_s25 }
 0x2f5   :  { %4737 = vst.msk [vmem:[%s10597_s3 + $0x190] sm:$0xf] %vm1357_vm0, %v2392_v19 }
 0x2f6   :  { %v2394_v6 = vpop.permute.xlu1 %2393  ;;  %2921 = vrot.lane.b32.xlu0 %v11034_v52, %s5663_s25 }
 0x2f7   :  { %4738 = vst.msk [vmem:[%s10597_s3 + $0x194] sm:$0xf] %vm1357_vm0, %v2394_v6 }
 0x2f8   :  { %v2657_v32 = vpop.permute.xlu0 %2656  ;;  %2923 = vrot.lane.b32.xlu1 %v7653_v12, %s5663_s25 }
 0x2f9   :  { %4805 = vst.msk [vmem:[%s10598_s4 + $0x1a0] sm:$0xf] %vm1357_vm0, %v2657_v32  ;;  %v11037_v32 = vld [vmem:[#allocation9_spill] sm:$0xff] }
 0x2fa   :  { %v2659_v62 = vpop.permute.xlu1 %2658  ;;  %2925 = vrot.lane.b32.xlu0 %v7742_v41, %s5663_s25 }
 0x2fb   :  { %4806 = vst.msk [vmem:[%s10598_s4 + $0x1a4] sm:$0xf] %vm1357_vm0, %v2659_v62  ;;  %v11038_v62 = vld [vmem:[#allocation13_spill] sm:$0xff] }
 0x2fc   :  { %v2139_v19 = vpop.permute.xlu0 %2138  ;;  %2927 = vrot.lane.b32.xlu1 %v7757_v28, %s5663_s25 }
 0x2fd   :  { %4675 = vst.msk [vmem:[%s10596_s2 + $0x198] sm:$0xf] %vm1357_vm0, %v2139_v19  ;;  %v11039_v19 = vld [vmem:[#allocation17_spill] sm:$0xff] }
 0x2fe   :  { %v2141_v6 = vpop.permute.xlu1 %2140  ;;  %2929 = vrot.lane.b32.xlu0 %v11037_v32, %s5663_s25 }
 0x2ff   :  { %4676 = vst.msk [vmem:[%s10596_s2 + $0x19c] sm:$0xf] %vm1357_vm0, %v2141_v6  ;;  %v11040_v6 = vld [vmem:[#allocation21_spill] sm:$0xff] }
 0x300   :  { %v2669_v41 = vpop.permute.xlu0 %2668  ;;  %2931 = vrot.lane.b32.xlu1 %v11038_v62, %s5663_s25 }
 0x301   :  { %4811 = vst.msk [vmem:[%s10598_s4 + $0x1b8] sm:$0xf] %vm1357_vm0, %v2669_v41  ;;  %v11041_v41 = vld [vmem:[#allocation25_spill] sm:$0xff] }
 0x302   :  { %v2671_v28 = vpop.permute.xlu1 %2670  ;;  %2933 = vrot.lane.b32.xlu0 %v11039_v19, %s5663_s25 }
 0x303   :  { %4812 = vst.msk [vmem:[%s10598_s4 + $0x1bc] sm:$0xf] %vm1357_vm0, %v2671_v28  ;;  %v11042_v28 = vld [vmem:[#allocation29_spill] sm:$0xff] }
 0x304   :  { %v2396_v32 = vpop.permute.xlu0 %2395  ;;  %2935 = vrot.lane.b32.xlu1 %v11040_v6, %s5663_s25 }
 0x305   :  { %4739 = vst.msk [vmem:[%s10597_s3 + $0x198] sm:$0xf] %vm1357_vm0, %v2396_v32  ;;  %v11043_v32 = vld [vmem:[#allocation33_spill] sm:$0xff] }
 0x306   :  { %v2398_v62 = vpop.permute.xlu1 %2397  ;;  %2937 = vrot.lane.b32.xlu0 %v11041_v41, %s5663_s25 }
 0x307   :  { %4740 = vst.msk [vmem:[%s10597_s3 + $0x19c] sm:$0xf] %vm1357_vm0, %v2398_v62  ;;  %v11044_v62 = vld [vmem:[#allocation37_spill] sm:$0xff] }
 0x308   :  { %v2665_v19 = vpop.permute.xlu0 %2664  ;;  %2939 = vrot.lane.b32.xlu1 %v11042_v28, %s5663_s25 }
 0x309   :  { %4809 = vst.msk [vmem:[%s10598_s4 + $0x1b0] sm:$0xf] %vm1357_vm0, %v2665_v19  ;;  %v11045_v19 = vld [vmem:[#allocation41_spill] sm:$0xff] }
 0x30a   :  { %v2667_v6 = vpop.permute.xlu1 %2666  ;;  %2941 = vrot.lane.b32.xlu0 %v11043_v32, %s5663_s25 }
 0x30b   :  { %4810 = vst.msk [vmem:[%s10598_s4 + $0x1b4] sm:$0xf] %vm1357_vm0, %v2667_v6  ;;  %v11046_v6 = vld [vmem:[#allocation45_spill] sm:$0xff] }
 0x30c   :  { %v2143_v41 = vpop.permute.xlu0 %2142  ;;  %2943 = vrot.lane.b32.xlu1 %v11044_v62, %s5663_s25 }
 0x30d   :  { %4677 = vst.msk [vmem:[%s10596_s2 + $0x1a0] sm:$0xf] %vm1357_vm0, %v2143_v41  ;;  %v11047_v41 = vld [vmem:[#allocation49_spill] sm:$0xff] }
 0x30e   :  { %v2145_v28 = vpop.permute.xlu1 %2144  ;;  %2945 = vrot.lane.b32.xlu0 %v11045_v19, %s5663_s25 }
 0x30f   :  { %4678 = vst.msk [vmem:[%s10596_s2 + $0x1a4] sm:$0xf] %vm1357_vm0, %v2145_v28  ;;  %v11048_v28 = vld [vmem:[#allocation53_spill] sm:$0xff] }
 0x310   :  { %v2677_v32 = vpop.permute.xlu0 %2676  ;;  %2947 = vrot.lane.b32.xlu1 %v11046_v6, %s5663_s25 }
 0x311   :  { %4815 = vst.msk [vmem:[%s10598_s4 + $0x1c8] sm:$0xf] %vm1357_vm0, %v2677_v32  ;;  %v11049_v32 = vld [vmem:[#allocation57_spill] sm:$0xff] }
 0x312   :  { %v2679_v62 = vpop.permute.xlu1 %2678  ;;  %2949 = vrot.lane.b32.xlu0 %v11047_v41, %s5663_s25 }
 0x313   :  { %4816 = vst.msk [vmem:[%s10598_s4 + $0x1cc] sm:$0xf] %vm1357_vm0, %v2679_v62  ;;  %v11050_v62 = vld [vmem:[#allocation61_spill] sm:$0xff] }
 0x314   :  { %v2400_v19 = vpop.permute.xlu0 %2399  ;;  %2951 = vrot.lane.b32.xlu1 %v11048_v28, %s5663_s25 }
 0x315   :  { %4741 = vst.msk [vmem:[%s10597_s3 + $0x1a0] sm:$0xf] %vm1357_vm0, %v2400_v19  ;;  %v11051_v19 = vld [vmem:[#allocation65_spill] sm:$0xff] }
 0x316   :  { %v2402_v6 = vpop.permute.xlu1 %2401  ;;  %2953 = vrot.lane.b32.xlu0 %v11049_v32, %s5663_s25 }
 0x317   :  { %4742 = vst.msk [vmem:[%s10597_s3 + $0x1a4] sm:$0xf] %vm1357_vm0, %v2402_v6  ;;  %v11052_v6 = vld [vmem:[#allocation69_spill] sm:$0xff] }
 0x318   :  { %v2673_v41 = vpop.permute.xlu0 %2672  ;;  %2955 = vrot.lane.b32.xlu1 %v11050_v62, %s5663_s25 }
 0x319   :  { %4813 = vst.msk [vmem:[%s10598_s4 + $0x1c0] sm:$0xf] %vm1357_vm0, %v2673_v41  ;;  %v11053_v41 = vld [vmem:[#allocation10_spill] sm:$0xff] }
 0x31a   :  { %v2675_v28 = vpop.permute.xlu1 %2674  ;;  %2957 = vrot.lane.b32.xlu0 %v11051_v19, %s5663_s25 }
 0x31b   :  { %4814 = vst.msk [vmem:[%s10598_s4 + $0x1c4] sm:$0xf] %vm1357_vm0, %v2675_v28  ;;  %v11054_v28 = vld [vmem:[#allocation15_spill] sm:$0xff] }
 0x31c   :  { %v2147_v32 = vpop.permute.xlu0 %2146  ;;  %2959 = vrot.lane.b32.xlu1 %v11052_v6, %s5663_s25 }
 0x31d   :  { %4679 = vst.msk [vmem:[%s10596_s2 + $0x1a8] sm:$0xf] %vm1357_vm0, %v2147_v32  ;;  %v11055_v32 = vld [vmem:[#allocation18_spill] sm:$0xff] }
 0x31e   :  { %v2149_v62 = vpop.permute.xlu1 %2148  ;;  %3090 = vrot.lane.b32.xlu0 %v11053_v41, %s5663_s25 }
 0x31f   :  { %4680 = vst.msk [vmem:[%s10596_s2 + $0x1ac] sm:$0xf] %vm1357_vm0, %v2149_v62  ;;  %v11056_v62 = vld [vmem:[#allocation22_spill] sm:$0xff] }
 0x320   :  { %v2685_v19 = vpop.permute.xlu0 %2684  ;;  %3092 = vrot.lane.b32.xlu1 %v11054_v28, %s5663_s25 }
 0x321   :  { %4819 = vst.msk [vmem:[%s10598_s4 + $0x1d8] sm:$0xf] %vm1357_vm0, %v2685_v19  ;;  %v11057_v19 = vld [vmem:[#allocation26_spill] sm:$0xff] }
 0x322   :  { %v2687_v6 = vpop.permute.xlu1 %2686  ;;  %3094 = vrot.lane.b32.xlu0 %v11055_v32, %s5663_s25 }
 0x323   :  { %4820 = vst.msk [vmem:[%s10598_s4 + $0x1dc] sm:$0xf] %vm1357_vm0, %v2687_v6  ;;  %v11058_v6 = vld [vmem:[#allocation30_spill] sm:$0xff] }
 0x324   :  { %v2404_v41 = vpop.permute.xlu0 %2403  ;;  %3096 = vrot.lane.b32.xlu1 %v11056_v62, %s5663_s25 }
 0x325   :  { %4743 = vst.msk [vmem:[%s10597_s3 + $0x1a8] sm:$0xf] %vm1357_vm0, %v2404_v41  ;;  %v11059_v41 = vld [vmem:[#allocation34_spill] sm:$0xff] }
 0x326   :  { %v2406_v28 = vpop.permute.xlu1 %2405  ;;  %3098 = vrot.lane.b32.xlu0 %v11057_v19, %s5663_s25 }
 0x327   :  { %4744 = vst.msk [vmem:[%s10597_s3 + $0x1ac] sm:$0xf] %vm1357_vm0, %v2406_v28  ;;  %v11060_v28 = vld [vmem:[#allocation38_spill] sm:$0xff] }
 0x328   :  { %v2681_v32 = vpop.permute.xlu0 %2680  ;;  %3100 = vrot.lane.b32.xlu1 %v11058_v6, %s5663_s25 }
 0x329   :  { %4817 = vst.msk [vmem:[%s10598_s4 + $0x1d0] sm:$0xf] %vm1357_vm0, %v2681_v32  ;;  %v11061_v32 = vld [vmem:[#allocation42_spill] sm:$0xff] }
 0x32a   :  { %v2683_v62 = vpop.permute.xlu1 %2682  ;;  %3102 = vrot.lane.b32.xlu0 %v11059_v41, %s5663_s25 }
 0x32b   :  { %4818 = vst.msk [vmem:[%s10598_s4 + $0x1d4] sm:$0xf] %vm1357_vm0, %v2683_v62  ;;  %v11062_v62 = vld [vmem:[#allocation46_spill] sm:$0xff] }
 0x32c   :  { %v2151_v19 = vpop.permute.xlu0 %2150  ;;  %3104 = vrot.lane.b32.xlu1 %v11060_v28, %s5663_s25 }
 0x32d   :  { %4681 = vst.msk [vmem:[%s10596_s2 + $0x1b0] sm:$0xf] %vm1357_vm0, %v2151_v19  ;;  %v11063_v19 = vld [vmem:[#allocation50_spill] sm:$0xff] }
 0x32e   :  { %v2153_v6 = vpop.permute.xlu1 %2152  ;;  %3106 = vrot.lane.b32.xlu0 %v11061_v32, %s5663_s25 }
 0x32f   :  { %4682 = vst.msk [vmem:[%s10596_s2 + $0x1b4] sm:$0xf] %vm1357_vm0, %v2153_v6  ;;  %v11064_v6 = vld [vmem:[#allocation54_spill] sm:$0xff] }
 0x330   :  { %v2693_v41 = vpop.permute.xlu0 %2692  ;;  %3108 = vrot.lane.b32.xlu1 %v11062_v62, %s5663_s25 }
 0x331   :  { %4823 = vst.msk [vmem:[%s10598_s4 + $0x1e8] sm:$0xf] %vm1357_vm0, %v2693_v41  ;;  %v11065_v41 = vld [vmem:[#allocation58_spill] sm:$0xff] }
 0x332   :  { %v2695_v28 = vpop.permute.xlu1 %2694  ;;  %3110 = vrot.lane.b32.xlu0 %v11063_v19, %s5663_s25 }
 0x333   :  { %4824 = vst.msk [vmem:[%s10598_s4 + $0x1ec] sm:$0xf] %vm1357_vm0, %v2695_v28  ;;  %v11066_v28 = vld [vmem:[#allocation62_spill] sm:$0xff] }
 0x334   :  { %v2408_v32 = vpop.permute.xlu0 %2407  ;;  %3112 = vrot.lane.b32.xlu1 %v11064_v6, %s5663_s25 }
 0x335   :  { %4745 = vst.msk [vmem:[%s10597_s3 + $0x1b0] sm:$0xf] %vm1357_vm0, %v2408_v32  ;;  %v11067_v32 = vld [vmem:[#allocation66_spill] sm:$0xff] }
 0x336   :  { %v2410_v62 = vpop.permute.xlu1 %2409  ;;  %3114 = vrot.lane.b32.xlu0 %v11065_v41, %s5663_s25 }
 0x337   :  { %4746 = vst.msk [vmem:[%s10597_s3 + $0x1b4] sm:$0xf] %vm1357_vm0, %v2410_v62  ;;  %v11068_v62 = vld [vmem:[#allocation70_spill] sm:$0xff] }
 0x338   :  { %v2689_v19 = vpop.permute.xlu0 %2688  ;;  %3116 = vrot.lane.b32.xlu1 %v11066_v28, %s5663_s25 }
 0x339   :  { %4821 = vst.msk [vmem:[%s10598_s4 + $0x1e0] sm:$0xf] %vm1357_vm0, %v2689_v19  ;;  %v11069_v19 = vld [vmem:[#allocation74_spill] sm:$0xff] }
 0x33a   :  { %v2691_v6 = vpop.permute.xlu1 %2690  ;;  %3118 = vrot.lane.b32.xlu0 %v11067_v32, %s5663_s25 }
 0x33b   :  { %4822 = vst.msk [vmem:[%s10598_s4 + $0x1e4] sm:$0xf] %vm1357_vm0, %v2691_v6  ;;  %v11070_v6 = vld [vmem:[#allocation78_spill] sm:$0xff] }
 0x33c   :  { %v2155_v41 = vpop.permute.xlu0 %2154  ;;  %3120 = vrot.lane.b32.xlu1 %v11068_v62, %s5663_s25 }
 0x33d   :  { %4683 = vst.msk [vmem:[%s10596_s2 + $0x1b8] sm:$0xf] %vm1357_vm0, %v2155_v41  ;;  %v11071_v41 = vld [vmem:[#allocation82_spill] sm:$0xff] }
 0x33e   :  { %3122 = vrot.lane.b32.xlu0 %v11069_v19, %s5663_s25  ;;  %v2157_v28 = vpop.permute.xlu1 %2156 }
 0x33f   :  { %4684 = vst.msk [vmem:[%s10596_s2 + $0x1bc] sm:$0xf] %vm1357_vm0, %v2157_v28  ;;  %v11072_v28 = vld [vmem:[#allocation86_spill] sm:$0xff] }
 0x340   :  { %v2701_v32 = vpop.permute.xlu0 %2700  ;;  %3124 = vrot.lane.b32.xlu1 %v11070_v6, %s5663_s25 }
 0x341   :  { %4827 = vst.msk [vmem:[%s10598_s4 + $0x1f8] sm:$0xf] %vm1357_vm0, %v2701_v32  ;;  %v11073_v32 = vld [vmem:[#allocation90_spill] sm:$0xff] }
 0x342   :  { %3126 = vrot.lane.b32.xlu0 %v11071_v41, %s5663_s25  ;;  %v2703_v62 = vpop.permute.xlu1 %2702 }
 0x343   :  { %4828 = vst.msk [vmem:[%s10598_s4 + $0x1fc] sm:$0xf] %vm1357_vm0, %v2703_v62  ;;  %v11074_v62 = vld [vmem:[#allocation94_spill] sm:$0xff] }
 0x344   :  { %v2412_v19 = vpop.permute.xlu0 %2411  ;;  %3128 = vrot.lane.b32.xlu1 %v11072_v28, %s5663_s25 }
 0x345   :  { %4747 = vst.msk [vmem:[%s10597_s3 + $0x1b8] sm:$0xf] %vm1357_vm0, %v2412_v19  ;;  %v11075_v19 = vld [vmem:[#allocation97_spill] sm:$0xff] }
 0x346   :  { %3130 = vrot.lane.b32.xlu0 %v11073_v32, %s5663_s25  ;;  %v2414_v6 = vpop.permute.xlu1 %2413 }
 0x347   :  { %4748 = vst.msk [vmem:[%s10597_s3 + $0x1bc] sm:$0xf] %vm1357_vm0, %v2414_v6  ;;  %v11076_v6 = vld [vmem:[#allocation99_spill] sm:$0xff] }
 0x348   :  { %v2697_v41 = vpop.permute.xlu0 %2696  ;;  %3132 = vrot.lane.b32.xlu1 %v11074_v62, %s5663_s25 }
 0x349   :  { %4825 = vst.msk [vmem:[%s10598_s4 + $0x1f0] sm:$0xf] %vm1357_vm0, %v2697_v41  ;;  %v11077_v41 = vld [vmem:[#allocation105_spill] sm:$0xff] }
 0x34a   :  { %3134 = vrot.lane.b32.xlu0 %v11075_v19, %s5663_s25  ;;  %v2699_v28 = vpop.permute.xlu1 %2698 }
 0x34b   :  { %4826 = vst.msk [vmem:[%s10598_s4 + $0x1f4] sm:$0xf] %vm1357_vm0, %v2699_v28  ;;  %v11078_v28 = vld [vmem:[#allocation107_spill] sm:$0xff] }
 0x34c   :  { %v2894_v32 = vpop.permute.xlu0 %2893  ;;  %3136 = vrot.lane.b32.xlu1 %v11076_v6, %s5663_s25 }
 0x34d   :  { %4859 = vst.msk [vmem:[%s10596_s2 + $0x278] sm:$0xf] %vm1357_vm0, %v2894_v32  ;;  %v11079_v32 = vld [vmem:[#allocation113_spill] sm:$0xff] }
 0x34e   :  { %3138 = vrot.lane.b32.xlu0 %v11077_v41, %s5663_s25  ;;  %v2896_v62 = vpop.permute.xlu1 %2895 }
 0x34f   :  { %4860 = vst.msk [vmem:[%s10596_s2 + $0x27c] sm:$0xf] %vm1357_vm0, %v2896_v62  ;;  %v11080_v62 = vld [vmem:[#allocation115_spill] sm:$0xff] }
 0x350   :  { %v2898_v19 = vpop.permute.xlu0 %2897  ;;  %3140 = vrot.lane.b32.xlu1 %v11078_v28, %s5663_s25 }
 0x351   :  { %4861 = vst.msk [vmem:[%s10596_s2 + $0x280] sm:$0xf] %vm1357_vm0, %v2898_v19  ;;  %v11081_v19 = vld [vmem:[#allocation121_spill] sm:$0xff] }
 0x352   :  { %3142 = vrot.lane.b32.xlu0 %v11079_v32, %s5663_s25  ;;  %v2900_v6 = vpop.permute.xlu1 %2899 }
 0x353   :  { %4862 = vst.msk [vmem:[%s10596_s2 + $0x284] sm:$0xf] %vm1357_vm0, %v2900_v6  ;;  %v11082_v6 = vld [vmem:[#allocation123_spill] sm:$0xff] }
 0x354   :  { %v2902_v41 = vpop.permute.xlu0 %2901  ;;  %3144 = vrot.lane.b32.xlu1 %v11080_v62, %s5663_s25 }
 0x355   :  { %4863 = vst.msk [vmem:[%s10596_s2 + $0x288] sm:$0xf] %vm1357_vm0, %v2902_v41 }
 0x356   :  { %3146 = vrot.lane.b32.xlu0 %v11081_v19, %s5663_s25  ;;  %v2904_v28 = vpop.permute.xlu1 %2903 }
 0x357   :  { %4864 = vst.msk [vmem:[%s10596_s2 + $0x28c] sm:$0xf] %vm1357_vm0, %v2904_v28 }
 0x358   :  { %v2906_v32 = vpop.permute.xlu0 %2905  ;;  %3148 = vrot.lane.b32.xlu1 %v11082_v6, %s5663_s25 }
 0x359   :  { %4865 = vst.msk [vmem:[%s10596_s2 + $0x290] sm:$0xf] %vm1357_vm0, %v2906_v32 }
 0x35a   :  { %3150 = vrot.lane.b32.xlu0 %v6914_v63, %s5663_s25  ;;  %v2908_v41 = vpop.permute.xlu1 %2907 }
 0x35b   :  { %4866 = vst.msk [vmem:[%s10596_s2 + $0x294] sm:$0xf] %vm1357_vm0, %v2908_v41 }
 0x35c   :  { %v2910_v19 = vpop.permute.xlu0 %2909  ;;  %3152 = vrot.lane.b32.xlu1 %v6934_v29, %s5663_s25 }
 0x35d   :  { %4867 = vst.msk [vmem:[%s10596_s2 + $0x298] sm:$0xf] %vm1357_vm0, %v2910_v19 }
 0x35e   :  { %3154 = vrot.lane.b32.xlu0 %v11025_v53, %s5663_s25  ;;  %v2912_v28 = vpop.permute.xlu1 %2911 }
 0x35f   :  { %4868 = vst.msk [vmem:[%s10596_s2 + $0x29c] sm:$0xf] %vm1357_vm0, %v2912_v28 }
 0x360   :  { %v2914_v32 = vpop.permute.xlu0 %2913  ;;  %3156 = vrot.lane.b32.xlu1 %v7038_v25, %s5663_s25 }
 0x361   :  { %4869 = vst.msk [vmem:[%s10596_s2 + $0x2a0] sm:$0xf] %vm1357_vm0, %v2914_v32 }
 0x362   :  { %3158 = vrot.lane.b32.xlu0 %v11027_v39, %s5663_s25  ;;  %v2916_v19 = vpop.permute.xlu1 %2915 }
 0x363   :  { %4870 = vst.msk [vmem:[%s10596_s2 + $0x2a4] sm:$0xf] %vm1357_vm0, %v2916_v19 }
 0x364   :  { %v2918_v41 = vpop.permute.xlu0 %2917  ;;  %3160 = vrot.lane.b32.xlu1 %v7142_v3, %s5663_s25 }
 0x365   :  { %4871 = vst.msk [vmem:[%s10596_s2 + $0x2a8] sm:$0xf] %vm1357_vm0, %v2918_v41 }
 0x366   :  { %3162 = vrot.lane.b32.xlu0 %v11028_v10, %s5663_s25  ;;  %v2920_v28 = vpop.permute.xlu1 %2919 }
 0x367   :  { %4872 = vst.msk [vmem:[%s10596_s2 + $0x2ac] sm:$0xf] %vm1357_vm0, %v2920_v28 }
 0x368   :  { %v2922_v32 = vpop.permute.xlu0 %2921  ;;  %3164 = vrot.lane.b32.xlu1 %v7246_v35, %s5663_s25 }
 0x369   :  { %4873 = vst.msk [vmem:[%s10596_s2 + $0x2b0] sm:$0xf] %vm1357_vm0, %v2922_v32 }
 0x36a   :  { %3166 = vrot.lane.b32.xlu0 %v11029_v9, %s5663_s25  ;;  %v2924_v19 = vpop.permute.xlu1 %2923 }
 0x36b   :  { %4874 = vst.msk [vmem:[%s10596_s2 + $0x2b4] sm:$0xf] %vm1357_vm0, %v2924_v19 }
 0x36c   :  { %v2926_v41 = vpop.permute.xlu0 %2925  ;;  %3168 = vrot.lane.b32.xlu1 %v7350_v33, %s5663_s25 }
 0x36d   :  { %4875 = vst.msk [vmem:[%s10596_s2 + $0x2b8] sm:$0xf] %vm1357_vm0, %v2926_v41 }
 0x36e   :  { %3170 = vrot.lane.b32.xlu0 %v7434_v22, %s5663_s25  ;;  %v2928_v28 = vpop.permute.xlu1 %2927 }
 0x36f   :  { %4876 = vst.msk [vmem:[%s10596_s2 + $0x2bc] sm:$0xf] %vm1357_vm0, %v2928_v28 }
 0x370   :  { %v2930_v32 = vpop.permute.xlu0 %2929  ;;  %3172 = vrot.lane.b32.xlu1 %v7454_v23, %s5663_s25 }
 0x371   :  { %4877 = vst.msk [vmem:[%s10596_s2 + $0x2c0] sm:$0xf] %vm1357_vm0, %v2930_v32 }
 0x372   :  { %3174 = vrot.lane.b32.xlu0 %v7538_v13, %s5663_s25  ;;  %v2932_v19 = vpop.permute.xlu1 %2931 }
 0x373   :  { %4878 = vst.msk [vmem:[%s10596_s2 + $0x2c4] sm:$0xf] %vm1357_vm0, %v2932_v19 }
 0x374   :  { %v2934_v41 = vpop.permute.xlu0 %2933  ;;  %3176 = vrot.lane.b32.xlu1 %v7558_v57, %s5663_s25 }
 0x375   :  { %4879 = vst.msk [vmem:[%s10596_s2 + $0x2c8] sm:$0xf] %vm1357_vm0, %v2934_v41 }
 0x376   :  { %3178 = vrot.lane.b32.xlu0 %v11035_v43, %s5663_s25  ;;  %v2936_v28 = vpop.permute.xlu1 %2935 }
 0x377   :  { %4880 = vst.msk [vmem:[%s10596_s2 + $0x2cc] sm:$0xf] %vm1357_vm0, %v2936_v28  ;;  %v11083_v28 = vld [vmem:[#allocation11_spill] sm:$0xff] }
 0x378   :  { %v2938_v32 = vpop.permute.xlu0 %2937  ;;  %3180 = vrot.lane.b32.xlu1 %v7662_v1, %s5663_s25 }
 0x379   :  { %4881 = vst.msk [vmem:[%s10596_s2 + $0x2d0] sm:$0xf] %vm1357_vm0, %v2938_v32 }
 0x37a   :  { %3182 = vrot.lane.b32.xlu0 %v7746_v48, %s5663_s25  ;;  %v2940_v19 = vpop.permute.xlu1 %2939 }
 0x37b   :  { %4882 = vst.msk [vmem:[%s10596_s2 + $0x2d4] sm:$0xf] %vm1357_vm0, %v2940_v19  ;;  %v11084_v19 = vld [vmem:[#allocation14_spill] sm:$0xff] }
 0x37c   :  { %v2942_v41 = vpop.permute.xlu0 %2941  ;;  %3184 = vrot.lane.b32.xlu1 %v7766_v31, %s5663_s25 }
 0x37d   :  { %4883 = vst.msk [vmem:[%s10596_s2 + $0x2d8] sm:$0xf] %vm1357_vm0, %v2942_v41  ;;  %v11085_v41 = vld [vmem:[#allocation19_spill] sm:$0xff] }
 0x37e   :  { %3186 = vrot.lane.b32.xlu0 %v11083_v28, %s5663_s25  ;;  %v2944_v32 = vpop.permute.xlu1 %2943 }
 0x37f   :  { %4884 = vst.msk [vmem:[%s10596_s2 + $0x2dc] sm:$0xf] %vm1357_vm0, %v2944_v32  ;;  %v11086_v32 = vld [vmem:[#allocation23_spill] sm:$0xff] }
 0x380   :  { %v2946_v48 = vpop.permute.xlu0 %2945  ;;  %3188 = vrot.lane.b32.xlu1 %v11084_v19, %s5663_s25 }
 0x381   :  { %4885 = vst.msk [vmem:[%s10596_s2 + $0x2e0] sm:$0xf] %vm1357_vm0, %v2946_v48  ;;  %v11087_v48 = vld [vmem:[#allocation27_spill] sm:$0xff] }
 0x382   :  { %3190 = vrot.lane.b32.xlu0 %v11085_v41, %s5663_s25  ;;  %v2948_v31 = vpop.permute.xlu1 %2947 }
 0x383   :  { %4886 = vst.msk [vmem:[%s10596_s2 + $0x2e4] sm:$0xf] %vm1357_vm0, %v2948_v31  ;;  %v11088_v31 = vld [vmem:[#allocation31_spill] sm:$0xff] }
 0x384   :  { %v2950_v28 = vpop.permute.xlu0 %2949  ;;  %3192 = vrot.lane.b32.xlu1 %v11086_v32, %s5663_s25 }
 0x385   :  { %4887 = vst.msk [vmem:[%s10596_s2 + $0x2e8] sm:$0xf] %vm1357_vm0, %v2950_v28  ;;  %v11089_v28 = vld [vmem:[#allocation35_spill] sm:$0xff] }
 0x386   :  { %3194 = vrot.lane.b32.xlu0 %v11087_v48, %s5663_s25  ;;  %v2952_v19 = vpop.permute.xlu1 %2951 }
 0x387   :  { %4888 = vst.msk [vmem:[%s10596_s2 + $0x2ec] sm:$0xf] %vm1357_vm0, %v2952_v19  ;;  %v11090_v19 = vld [vmem:[#allocation39_spill] sm:$0xff] }
 0x388   :  { %v2954_v41 = vpop.permute.xlu0 %2953  ;;  %3196 = vrot.lane.b32.xlu1 %v11088_v31, %s5663_s25 }
 0x389   :  { %4889 = vst.msk [vmem:[%s10596_s2 + $0x2f0] sm:$0xf] %vm1357_vm0, %v2954_v41  ;;  %v11091_v41 = vld [vmem:[#allocation43_spill] sm:$0xff] }
 0x38a   :  { %3198 = vrot.lane.b32.xlu0 %v11089_v28, %s5663_s25  ;;  %v2956_v32 = vpop.permute.xlu1 %2955 }
 0x38b   :  { %4890 = vst.msk [vmem:[%s10596_s2 + $0x2f4] sm:$0xf] %vm1357_vm0, %v2956_v32  ;;  %v11092_v32 = vld [vmem:[#allocation47_spill] sm:$0xff] }
 0x38c   :  { %v2958_v48 = vpop.permute.xlu0 %2957  ;;  %3200 = vrot.lane.b32.xlu1 %v11090_v19, %s5663_s25 }
 0x38d   :  { %4891 = vst.msk [vmem:[%s10596_s2 + $0x2f8] sm:$0xf] %vm1357_vm0, %v2958_v48  ;;  %v11093_v48 = vld [vmem:[#allocation51_spill] sm:$0xff] }
 0x38e   :  { %3202 = vrot.lane.b32.xlu0 %v11091_v41, %s5663_s25  ;;  %v2960_v31 = vpop.permute.xlu1 %2959 }
 0x38f   :  { %4892 = vst.msk [vmem:[%s10596_s2 + $0x2fc] sm:$0xf] %vm1357_vm0, %v2960_v31  ;;  %v11094_v31 = vld [vmem:[#allocation55_spill] sm:$0xff] }
 0x390   :  { %v3091_v28 = vpop.permute.xlu0 %3090  ;;  %3204 = vrot.lane.b32.xlu1 %v11092_v32, %s5663_s25 }
 0x391   :  { %4893 = vst.msk [vmem:[%s10597_s3 + $0x200] sm:$0xf] %vm1357_vm0, %v3091_v28  ;;  %v11095_v28 = vld [vmem:[#allocation59_spill] sm:$0xff] }
 0x392   :  { %3206 = vrot.lane.b32.xlu0 %v11093_v48, %s5663_s25  ;;  %v3093_v19 = vpop.permute.xlu1 %3092 }
 0x393   :  { %4894 = vst.msk [vmem:[%s10597_s3 + $0x204] sm:$0xf] %vm1357_vm0, %v3093_v19  ;;  %v11096_v19 = vld [vmem:[#allocation63_spill] sm:$0xff] }
 0x394   :  { %v3095_v41 = vpop.permute.xlu0 %3094  ;;  %3208 = vrot.lane.b32.xlu1 %v11094_v31, %s5663_s25 }
 0x395   :  { %4895 = vst.msk [vmem:[%s10597_s3 + $0x208] sm:$0xf] %vm1357_vm0, %v3095_v41  ;;  %v11097_v41 = vld [vmem:[#allocation67_spill] sm:$0xff] }
 0x396   :  { %3210 = vrot.lane.b32.xlu0 %v11095_v28, %s5663_s25  ;;  %v3097_v32 = vpop.permute.xlu1 %3096 }
 0x397   :  { %4896 = vst.msk [vmem:[%s10597_s3 + $0x20c] sm:$0xf] %vm1357_vm0, %v3097_v32  ;;  %v11098_v32 = vld [vmem:[#allocation71_spill] sm:$0xff] }
 0x398   :  { %v3099_v48 = vpop.permute.xlu0 %3098  ;;  %3212 = vrot.lane.b32.xlu1 %v11096_v19, %s5663_s25 }
 0x399   :  { %4897 = vst.msk [vmem:[%s10597_s3 + $0x210] sm:$0xf] %vm1357_vm0, %v3099_v48  ;;  %v11099_v48 = vld [vmem:[#allocation75_spill] sm:$0xff] }
 0x39a   :  { %3214 = vrot.lane.b32.xlu0 %v11097_v41, %s5663_s25  ;;  %v3101_v31 = vpop.permute.xlu1 %3100 }
 0x39b   :  { %4898 = vst.msk [vmem:[%s10597_s3 + $0x214] sm:$0xf] %vm1357_vm0, %v3101_v31  ;;  %v11100_v31 = vld [vmem:[#allocation79_spill] sm:$0xff] }
 0x39c   :  { %v3103_v28 = vpop.permute.xlu0 %3102  ;;  %3216 = vrot.lane.b32.xlu1 %v11098_v32, %s5663_s25 }
 0x39d   :  { %4899 = vst.msk [vmem:[%s10597_s3 + $0x218] sm:$0xf] %vm1357_vm0, %v3103_v28  ;;  %v11101_v28 = vld [vmem:[#allocation73_spill] sm:$0xff] }
 0x39e   :  { %3347 = vrot.lane.b32.xlu0 %v11099_v48, %s5663_s25  ;;  %v3105_v19 = vpop.permute.xlu1 %3104 }
 0x39f   :  { %4900 = vst.msk [vmem:[%s10597_s3 + $0x21c] sm:$0xf] %vm1357_vm0, %v3105_v19  ;;  %v11102_v19 = vld [vmem:[#allocation77_spill] sm:$0xff] }
 0x3a0   :  { %v3107_v41 = vpop.permute.xlu0 %3106  ;;  %3349 = vrot.lane.b32.xlu1 %v11100_v31, %s5663_s25 }
 0x3a1   :  { %4901 = vst.msk [vmem:[%s10597_s3 + $0x220] sm:$0xf] %vm1357_vm0, %v3107_v41  ;;  %v11103_v41 = vld [vmem:[#allocation83_spill] sm:$0xff] }
 0x3a2   :  { %3351 = vrot.lane.b32.xlu0 %v11101_v28, %s5663_s25  ;;  %v3109_v32 = vpop.permute.xlu1 %3108 }
 0x3a3   :  { %4902 = vst.msk [vmem:[%s10597_s3 + $0x224] sm:$0xf] %vm1357_vm0, %v3109_v32  ;;  %v11104_v32 = vld [vmem:[#allocation87_spill] sm:$0xff] }
 0x3a4   :  { %v3111_v48 = vpop.permute.xlu0 %3110  ;;  %3353 = vrot.lane.b32.xlu1 %v11102_v19, %s5663_s25 }
 0x3a5   :  { %4903 = vst.msk [vmem:[%s10597_s3 + $0x228] sm:$0xf] %vm1357_vm0, %v3111_v48  ;;  %v11105_v48 = vld [vmem:[#allocation81_spill] sm:$0xff] }
 0x3a6   :  { %3355 = vrot.lane.b32.xlu0 %v11103_v41, %s5663_s25  ;;  %v3113_v31 = vpop.permute.xlu1 %3112 }
 0x3a7   :  { %4904 = vst.msk [vmem:[%s10597_s3 + $0x22c] sm:$0xf] %vm1357_vm0, %v3113_v31  ;;  %v11106_v31 = vld [vmem:[#allocation85_spill] sm:$0xff] }
 0x3a8   :  { %v3115_v28 = vpop.permute.xlu0 %3114  ;;  %3357 = vrot.lane.b32.xlu1 %v11104_v32, %s5663_s25 }
 0x3a9   :  { %4905 = vst.msk [vmem:[%s10597_s3 + $0x230] sm:$0xf] %vm1357_vm0, %v3115_v28  ;;  %v11107_v28 = vld [vmem:[#allocation91_spill] sm:$0xff] }
 0x3aa   :  { %3359 = vrot.lane.b32.xlu0 %v11105_v48, %s5663_s25  ;;  %v3117_v19 = vpop.permute.xlu1 %3116 }
 0x3ab   :  { %4906 = vst.msk [vmem:[%s10597_s3 + $0x234] sm:$0xf] %vm1357_vm0, %v3117_v19  ;;  %v11108_v19 = vld [vmem:[#allocation95_spill] sm:$0xff] }
 0x3ac   :  { %v3119_v41 = vpop.permute.xlu0 %3118  ;;  %3361 = vrot.lane.b32.xlu1 %v11106_v31, %s5663_s25 }
 0x3ad   :  { %4907 = vst.msk [vmem:[%s10597_s3 + $0x238] sm:$0xf] %vm1357_vm0, %v3119_v41  ;;  %v11109_v41 = vld [vmem:[#allocation89_spill] sm:$0xff] }
 0x3ae   :  { %3363 = vrot.lane.b32.xlu0 %v11107_v28, %s5663_s25  ;;  %v3121_v32 = vpop.permute.xlu1 %3120 }
 0x3af   :  { %4908 = vst.msk [vmem:[%s10597_s3 + $0x23c] sm:$0xf] %vm1357_vm0, %v3121_v32  ;;  %v11110_v32 = vld [vmem:[#allocation93_spill] sm:$0xff] }
 0x3b0   :  { %v3123_v48 = vpop.permute.xlu0 %3122  ;;  %3365 = vrot.lane.b32.xlu1 %v11108_v19, %s5663_s25 }
 0x3b1   :  { %4909 = vst.msk [vmem:[%s10597_s3 + $0x240] sm:$0xf] %vm1357_vm0, %v3123_v48  ;;  %v11111_v48 = vld [vmem:[#allocation101_spill] sm:$0xff] }
 0x3b2   :  { %3367 = vrot.lane.b32.xlu0 %v11109_v41, %s5663_s25  ;;  %v3125_v31 = vpop.permute.xlu1 %3124 }
 0x3b3   :  { %4910 = vst.msk [vmem:[%s10597_s3 + $0x244] sm:$0xf] %vm1357_vm0, %v3125_v31  ;;  %v11112_v31 = vld [vmem:[#allocation103_spill] sm:$0xff] }
 0x3b4   :  { %v3127_v28 = vpop.permute.xlu0 %3126  ;;  %3369 = vrot.lane.b32.xlu1 %v11110_v32, %s5663_s25 }
 0x3b5   :  { %4911 = vst.msk [vmem:[%s10597_s3 + $0x248] sm:$0xf] %vm1357_vm0, %v3127_v28  ;;  %v11113_v28 = vld [vmem:[#allocation100_spill] sm:$0xff] }
 0x3b6   :  { %3371 = vrot.lane.b32.xlu0 %v11111_v48, %s5663_s25  ;;  %v3129_v19 = vpop.permute.xlu1 %3128 }
 0x3b7   :  { %4912 = vst.msk [vmem:[%s10597_s3 + $0x24c] sm:$0xf] %vm1357_vm0, %v3129_v19  ;;  %v11114_v19 = vld [vmem:[#allocation102_spill] sm:$0xff] }
 0x3b8   :  { %v3131_v41 = vpop.permute.xlu0 %3130  ;;  %3373 = vrot.lane.b32.xlu1 %v11112_v31, %s5663_s25 }
 0x3b9   :  { %4913 = vst.msk [vmem:[%s10597_s3 + $0x250] sm:$0xf] %vm1357_vm0, %v3131_v41  ;;  %v11115_v41 = vld [vmem:[#allocation109_spill] sm:$0xff] }
 0x3ba   :  { %3375 = vrot.lane.b32.xlu0 %v11113_v28, %s5663_s25  ;;  %v3133_v32 = vpop.permute.xlu1 %3132 }
 0x3bb   :  { %4914 = vst.msk [vmem:[%s10597_s3 + $0x254] sm:$0xf] %vm1357_vm0, %v3133_v32  ;;  %v11116_v32 = vld [vmem:[#allocation111_spill] sm:$0xff] }
 0x3bc   :  { %v3135_v48 = vpop.permute.xlu0 %3134  ;;  %3377 = vrot.lane.b32.xlu1 %v11114_v19, %s5663_s25 }
 0x3bd   :  { %4915 = vst.msk [vmem:[%s10597_s3 + $0x258] sm:$0xf] %vm1357_vm0, %v3135_v48  ;;  %v11117_v48 = vld [vmem:[#allocation108_spill] sm:$0xff] }
 0x3be   :  { %3379 = vrot.lane.b32.xlu0 %v11115_v41, %s5663_s25  ;;  %v3137_v31 = vpop.permute.xlu1 %3136 }
 0x3bf   :  { %4916 = vst.msk [vmem:[%s10597_s3 + $0x25c] sm:$0xf] %vm1357_vm0, %v3137_v31  ;;  %v11118_v31 = vld [vmem:[#allocation110_spill] sm:$0xff] }
 0x3c0   :  { %v3139_v28 = vpop.permute.xlu0 %3138  ;;  %3381 = vrot.lane.b32.xlu1 %v11116_v32, %s5663_s25 }
 0x3c1   :  { %4917 = vst.msk [vmem:[%s10597_s3 + $0x260] sm:$0xf] %vm1357_vm0, %v3139_v28  ;;  %v11119_v28 = vld [vmem:[#allocation117_spill] sm:$0xff] }
 0x3c2   :  { %3383 = vrot.lane.b32.xlu0 %v11117_v48, %s5663_s25  ;;  %v3141_v19 = vpop.permute.xlu1 %3140 }
 0x3c3   :  { %4918 = vst.msk [vmem:[%s10597_s3 + $0x264] sm:$0xf] %vm1357_vm0, %v3141_v19  ;;  %v11120_v19 = vld [vmem:[#allocation119_spill] sm:$0xff] }
 0x3c4   :  { %v3143_v41 = vpop.permute.xlu0 %3142  ;;  %3385 = vrot.lane.b32.xlu1 %v11118_v31, %s5663_s25 }
 0x3c5   :  { %4919 = vst.msk [vmem:[%s10597_s3 + $0x268] sm:$0xf] %vm1357_vm0, %v3143_v41  ;;  %v11121_v41 = vld [vmem:[#allocation116_spill] sm:$0xff] }
 0x3c6   :  { %3387 = vrot.lane.b32.xlu0 %v11119_v28, %s5663_s25  ;;  %v3145_v32 = vpop.permute.xlu1 %3144 }
 0x3c7   :  { %4920 = vst.msk [vmem:[%s10597_s3 + $0x26c] sm:$0xf] %vm1357_vm0, %v3145_v32  ;;  %v11122_v32 = vld [vmem:[#allocation118_spill] sm:$0xff] }
 0x3c8   :  { %v3147_v48 = vpop.permute.xlu0 %3146  ;;  %3389 = vrot.lane.b32.xlu1 %v11120_v19, %s5663_s25 }
 0x3c9   :  { %4921 = vst.msk [vmem:[%s10597_s3 + $0x270] sm:$0xf] %vm1357_vm0, %v3147_v48  ;;  %v11123_v48 = vld [vmem:[#allocation125_spill] sm:$0xff] }
 0x3ca   :  { %3391 = vrot.lane.b32.xlu0 %v11121_v41, %s5663_s25  ;;  %v3149_v31 = vpop.permute.xlu1 %3148 }
 0x3cb   :  { %4922 = vst.msk [vmem:[%s10597_s3 + $0x274] sm:$0xf] %vm1357_vm0, %v3149_v31  ;;  %v11124_v31 = vld [vmem:[#allocation127_spill] sm:$0xff] }
 0x3cc   :  { %v3151_v28 = vpop.permute.xlu0 %3150  ;;  %3393 = vrot.lane.b32.xlu1 %v11122_v32, %s5663_s25 }
 0x3cd   :  { %4923 = vst.msk [vmem:[%s10597_s3 + $0x278] sm:$0xf] %vm1357_vm0, %v3151_v28  ;;  %v11125_v28 = vld [vmem:[#allocation124_spill] sm:$0xff] }
 0x3ce   :  { %3395 = vrot.lane.b32.xlu0 %v11123_v48, %s5663_s25  ;;  %v3153_v19 = vpop.permute.xlu1 %3152 }
 0x3cf   :  { %4924 = vst.msk [vmem:[%s10597_s3 + $0x27c] sm:$0xf] %vm1357_vm0, %v3153_v19  ;;  %v11126_v19 = vld [vmem:[#allocation126_spill] sm:$0xff] }
 0x3d0   :  { %v3155_v41 = vpop.permute.xlu0 %3154  ;;  %3397 = vrot.lane.b32.xlu1 %v11124_v31, %s5663_s25 }
 0x3d1   :  { %4925 = vst.msk [vmem:[%s10597_s3 + $0x280] sm:$0xf] %vm1357_vm0, %v3155_v41 }
 0x3d2   :  { %3399 = vrot.lane.b32.xlu0 %v11125_v28, %s5663_s25  ;;  %v3157_v32 = vpop.permute.xlu1 %3156 }
 0x3d3   :  { %4926 = vst.msk [vmem:[%s10597_s3 + $0x284] sm:$0xf] %vm1357_vm0, %v3157_v32 }
 0x3d4   :  { %v3159_v48 = vpop.permute.xlu0 %3158  ;;  %3401 = vrot.lane.b32.xlu1 %v11126_v19, %s5663_s25 }
 0x3d5   :  { %4927 = vst.msk [vmem:[%s10597_s3 + $0x288] sm:$0xf] %vm1357_vm0, %v3159_v48 }
 0x3d6   :  { %3403 = vrot.lane.b32.xlu0 %v6959_v0, %s5663_s25  ;;  %v3161_v41 = vpop.permute.xlu1 %3160 }
 0x3d7   :  { %4928 = vst.msk [vmem:[%s10597_s3 + $0x28c] sm:$0xf] %vm1357_vm0, %v3161_v41 }
 0x3d8   :  { %v3163_v28 = vpop.permute.xlu0 %3162  ;;  %3405 = vrot.lane.b32.xlu1 %v6974_v38, %s5663_s25 }
 0x3d9   :  { %4929 = vst.msk [vmem:[%s10597_s3 + $0x290] sm:$0xf] %vm1357_vm0, %v3163_v28 }
 0x3da   :  { %3407 = vrot.lane.b32.xlu0 %v6936_v42, %s5663_s25  ;;  %v3165_v32 = vpop.permute.xlu1 %3164 }
 0x3db   :  { %4930 = vst.msk [vmem:[%s10597_s3 + $0x294] sm:$0xf] %vm1357_vm0, %v3165_v32  ;;  %v11127_v32 = vld [vmem:[#allocation130_spill] sm:$0xff] }
 0x3dc   :  { %v3167_v48 = vpop.permute.xlu0 %3166  ;;  %3409 = vrot.lane.b32.xlu1 %v6965_v36, %s5663_s25 }
 0x3dd   :  { %4931 = vst.msk [vmem:[%s10597_s3 + $0x298] sm:$0xf] %vm1357_vm0, %v3167_v48 }
 0x3de   :  { %3411 = vrot.lane.b32.xlu0 %v7058_v56, %s5663_s25  ;;  %v3169_v28 = vpop.permute.xlu1 %3168 }
 0x3df   :  { %4932 = vst.msk [vmem:[%s10597_s3 + $0x29c] sm:$0xf] %vm1357_vm0, %v3169_v28  ;;  %v11128_v28 = vld [vmem:[#allocation132_spill] sm:$0xff] }
 0x3e0   :  { %v3171_v41 = vpop.permute.xlu0 %3170  ;;  %3413 = vrot.lane.b32.xlu1 %v7078_v46, %s5663_s25 }
 0x3e1   :  { %4933 = vst.msk [vmem:[%s10597_s3 + $0x2a0] sm:$0xf] %vm1357_vm0, %v3171_v41 }
 0x3e2   :  { %3415 = vrot.lane.b32.xlu0 %v11127_v32, %s5663_s25  ;;  %v3173_v48 = vpop.permute.xlu1 %3172 }
 0x3e3   :  { %4934 = vst.msk [vmem:[%s10597_s3 + $0x2a4] sm:$0xf] %vm1357_vm0, %v3173_v48 }
 0x3e4   :  { %v3175_v56 = vpop.permute.xlu0 %3174  ;;  %3417 = vrot.lane.b32.xlu1 %v11128_v28, %s5663_s25 }
 0x3e5   :  { %4935 = vst.msk [vmem:[%s10597_s3 + $0x2a8] sm:$0xf] %vm1357_vm0, %v3175_v56  ;;  %v11129_v56 = vld [vmem:[#allocation135_spill] sm:$0xff] }
 0x3e6   :  { %3419 = vrot.lane.b32.xlu0 %v7162_v14, %s5663_s25  ;;  %v3177_v41 = vpop.permute.xlu1 %3176 }
 0x3e7   :  { %4936 = vst.msk [vmem:[%s10597_s3 + $0x2ac] sm:$0xf] %vm1357_vm0, %v3177_v41 }
 0x3e8   :  { %v3179_v32 = vpop.permute.xlu0 %3178  ;;  %3421 = vrot.lane.b32.xlu1 %v7182_v24, %s5663_s25 }
 0x3e9   :  { %4937 = vst.msk [vmem:[%s10597_s3 + $0x2b0] sm:$0xf] %vm1357_vm0, %v3179_v32 }
 0x3ea   :  { %3423 = vrot.lane.b32.xlu0 %v11129_v56, %s5663_s25  ;;  %v3181_v48 = vpop.permute.xlu1 %3180 }
 0x3eb   :  { %4938 = vst.msk [vmem:[%s10597_s3 + $0x2b4] sm:$0xf] %vm1357_vm0, %v3181_v48 }
 0x3ec   :  { %v3183_v14 = vpop.permute.xlu0 %3182  ;;  %3425 = vrot.lane.b32.xlu1 %v7173_v16, %s5663_s25 }
 0x3ed   :  { %4939 = vst.msk [vmem:[%s10597_s3 + $0x2b8] sm:$0xf] %vm1357_vm0, %v3183_v14  ;;  %v11130_v14 = vld [vmem:[#allocation138_spill] sm:$0xff] }
 0x3ee   :  { %3427 = vrot.lane.b32.xlu0 %v7266_v11, %s5663_s25  ;;  %v3185_v32 = vpop.permute.xlu1 %3184 }
 0x3ef   :  { %4940 = vst.msk [vmem:[%s10597_s3 + $0x2bc] sm:$0xf] %vm1357_vm0, %v3185_v32  ;;  %v11131_v32 = vld [vmem:[#allocation140_spill] sm:$0xff] }
 0x3f0   :  { %v3187_v41 = vpop.permute.xlu0 %3186  ;;  %3429 = vrot.lane.b32.xlu1 %v7286_v44, %s5663_s25 }
 0x3f1   :  { %4941 = vst.msk [vmem:[%s10597_s3 + $0x2c0] sm:$0xf] %vm1357_vm0, %v3187_v41 }
 0x3f2   :  { %3431 = vrot.lane.b32.xlu0 %v11130_v14, %s5663_s25  ;;  %v3189_v48 = vpop.permute.xlu1 %3188 }
 0x3f3   :  { %4942 = vst.msk [vmem:[%s10597_s3 + $0x2c4] sm:$0xf] %vm1357_vm0, %v3189_v48 }
 0x3f4   :  { %v3191_v11 = vpop.permute.xlu0 %3190  ;;  %3433 = vrot.lane.b32.xlu1 %v11131_v32, %s5663_s25 }
 0x3f5   :  { %4943 = vst.msk [vmem:[%s10597_s3 + $0x2c8] sm:$0xf] %vm1357_vm0, %v3191_v11  ;;  %v11132_v11 = vld [vmem:[#allocation142_spill] sm:$0xff] }
 0x3f6   :  { %3435 = vrot.lane.b32.xlu0 %v11030_v61, %s5663_s25  ;;  %v3193_v41 = vpop.permute.xlu1 %3192 }
 0x3f7   :  { %4944 = vst.msk [vmem:[%s10597_s3 + $0x2cc] sm:$0xf] %vm1357_vm0, %v3193_v41  ;;  %v11133_v41 = vld [vmem:[#allocation144_spill] sm:$0xff] }
 0x3f8   :  { %v3195_v14 = vpop.permute.xlu0 %3194  ;;  %3437 = vrot.lane.b32.xlu1 %v11031_v50, %s5663_s25 }
 0x3f9   :  { %4945 = vst.msk [vmem:[%s10597_s3 + $0x2d0] sm:$0xf] %vm1357_vm0, %v3195_v14 }
 0x3fa   :  { %3439 = vrot.lane.b32.xlu0 %v11132_v11, %s5663_s25  ;;  %v3197_v48 = vpop.permute.xlu1 %3196 }
 0x3fb   :  { %4946 = vst.msk [vmem:[%s10597_s3 + $0x2d4] sm:$0xf] %vm1357_vm0, %v3197_v48 }
 0x3fc   :  { %v3199_v61 = vpop.permute.xlu0 %3198  ;;  %3441 = vrot.lane.b32.xlu1 %v11133_v41, %s5663_s25 }
 0x3fd   :  { %4947 = vst.msk [vmem:[%s10597_s3 + $0x2d8] sm:$0xf] %vm1357_vm0, %v3199_v61  ;;  %v11134_v61 = vld [vmem:[#allocation146_spill] sm:$0xff] }
 0x3fe   :  { %3443 = vrot.lane.b32.xlu0 %v11032_v58, %s5663_s25  ;;  %v3201_v14 = vpop.permute.xlu1 %3200 }
 0x3ff   :  { %4948 = vst.msk [vmem:[%s10597_s3 + $0x2dc] sm:$0xf] %vm1357_vm0, %v3201_v14  ;;  %v11135_v14 = vld [vmem:[#allocation148_spill] sm:$0xff] }
 0x400   :  { %v3203_v11 = vpop.permute.xlu0 %3202  ;;  %3445 = vrot.lane.b32.xlu1 %v11033_v59, %s5663_s25 }
 0x401   :  { %4949 = vst.msk [vmem:[%s10597_s3 + $0x2e0] sm:$0xf] %vm1357_vm0, %v3203_v11 }
 0x402   :  { %3447 = vrot.lane.b32.xlu0 %v11134_v61, %s5663_s25  ;;  %v3205_v48 = vpop.permute.xlu1 %3204 }
 0x403   :  { %4950 = vst.msk [vmem:[%s10597_s3 + $0x2e4] sm:$0xf] %vm1357_vm0, %v3205_v48 }
 0x404   :  { %v3207_v58 = vpop.permute.xlu0 %3206  ;;  %3449 = vrot.lane.b32.xlu1 %v11135_v14, %s5663_s25 }
 0x405   :  { %4951 = vst.msk [vmem:[%s10597_s3 + $0x2e8] sm:$0xf] %vm1357_vm0, %v3207_v58 }
 0x406   :  { %3451 = vrot.lane.b32.xlu0 %v7583_v8, %s5663_s25  ;;  %v3209_v11 = vpop.permute.xlu1 %3208 }
 0x407   :  { %4952 = vst.msk [vmem:[%s10597_s3 + $0x2ec] sm:$0xf] %vm1357_vm0, %v3209_v11  ;;  %v11136_v11 = vld [vmem:[#allocation151_spill] sm:$0xff] }
 0x408   :  { %v3211_v61 = vpop.permute.xlu0 %3210  ;;  %3453 = vrot.lane.b32.xlu1 %v7598_v21, %s5663_s25 }
 0x409   :  { %4953 = vst.msk [vmem:[%s10597_s3 + $0x2f0] sm:$0xf] %vm1357_vm0, %v3211_v61 }
 0x40a   :  { %3455 = vrot.lane.b32.xlu0 %v7560_v51, %s5663_s25  ;;  %v3213_v58 = vpop.permute.xlu1 %3212 }
 0x40b   :  { %4954 = vst.msk [vmem:[%s10597_s3 + $0x2f4] sm:$0xf] %vm1357_vm0, %v3213_v58  ;;  %v11137_v58 = vld [vmem:[#allocation154_spill] sm:$0xff] }
 0x40c   :  { %v3215_v48 = vpop.permute.xlu0 %3214  ;;  %3457 = vrot.lane.b32.xlu1 %v11136_v11, %s5663_s25 }
 0x40d   :  { %4955 = vst.msk [vmem:[%s10597_s3 + $0x2f8] sm:$0xf] %vm1357_vm0, %v3215_v48 }
 0x40e   :  { %3459 = vrot.lane.b32.xlu0 %v7687_v15, %s5663_s25  ;;  %v3217_v61 = vpop.permute.xlu1 %3216 }
 0x40f   :  { %4956 = vst.msk [vmem:[%s10597_s3 + $0x2fc] sm:$0xf] %vm1357_vm0, %v3217_v61 }
 0x410   :  { %v3348_v51 = vpop.permute.xlu0 %3347  ;;  %3461 = vrot.lane.b32.xlu1 %v7702_v20, %s5663_s25 }
 0x411   :  { %4957 = vst.msk [vmem:[%s10598_s4 + $0x200] sm:$0xf] %vm1357_vm0, %v3348_v51 }
 0x412   :  { %3463 = vrot.lane.b32.xlu0 %v11137_v58, %s5663_s25  ;;  %v3350_v48 = vpop.permute.xlu1 %3349 }
 0x413   :  { %4958 = vst.msk [vmem:[%s10598_s4 + $0x204] sm:$0xf] %vm1357_vm0, %v3350_v48 }
 0x414   :  { %v3352_v15 = vpop.permute.xlu0 %3351  ;;  %3465 = vrot.lane.b32.xlu1 %v7693_v49, %s5663_s25 }
 0x415   :  { %4959 = vst.msk [vmem:[%s10598_s4 + $0x208] sm:$0xf] %vm1357_vm0, %v3352_v15 }
 0x416   :  { %3467 = vrot.lane.b32.xlu0 %v7791_v34, %s5663_s25  ;;  %v3354_v51 = vpop.permute.xlu1 %3353 }
 0x417   :  { %4960 = vst.msk [vmem:[%s10598_s4 + $0x20c] sm:$0xf] %vm1357_vm0, %v3354_v51  ;;  %v11138_v51 = vld [vmem:[#allocation161_spill] sm:$0xff] }
 0x418   :  { %v3356_v61 = vpop.permute.xlu0 %3355  ;;  %3469 = vrot.lane.b32.xlu1 %v7806_v26, %s5663_s25  ;;  %v11140_v26 = vld [vmem:[#allocation12_spill] sm:$0xff] }
 0x419   :  { %4961 = vst.msk [vmem:[%s10598_s4 + $0x210] sm:$0xf] %vm1357_vm0, %v3356_v61  ;;  %v11139_v61 = vld [vmem:[#allocation8_spill] sm:$0xff] }
 0x41a   :  { %3471 = vrot.lane.b32.xlu0 %v7768_v30, %s5663_s25  ;;  %v3358_v15 = vpop.permute.xlu1 %3357 }
 0x41b   :  { %4962 = vst.msk [vmem:[%s10598_s4 + $0x214] sm:$0xf] %vm1357_vm0, %v3358_v15 }
 0x41c   :  { %v3360_v48 = vpop.permute.xlu0 %3359  ;;  %3473 = vrot.lane.b32.xlu1 %v11138_v51, %s5663_s25 }
 0x41d   :  { %4963 = vst.msk [vmem:[%s10598_s4 + $0x218] sm:$0xf] %vm1357_vm0, %v3360_v48  ;;  %v11141_v48 = vld [vmem:[#allocation16_spill] sm:$0xff] }
 0x41e   :  { %3604 = vrot.lane.b32.xlu0 %v11139_v61, %s5670_s29  ;;  %v3362_v30 = vpop.permute.xlu1 %3361 }
 0x41f   :  { %4964 = vst.msk [vmem:[%s10598_s4 + $0x21c] sm:$0xf] %vm1357_vm0, %v3362_v30  ;;  %v11142_v30 = vld [vmem:[#allocation20_spill] sm:$0xff] }
 0x420   :  { %v3364_v15 = vpop.permute.xlu0 %3363  ;;  %3606 = vrot.lane.b32.xlu1 %v11140_v26, %s5670_s29  ;;  %v11143_v26 = vld [vmem:[#allocation24_spill] sm:$0xff] }
 0x421   :  { %4965 = vst.msk [vmem:[%s10598_s4 + $0x220] sm:$0xf] %vm1357_vm0, %v3364_v15 }
 0x422   :  { %3608 = vrot.lane.b32.xlu0 %v11141_v48, %s5670_s29  ;;  %v3366_v51 = vpop.permute.xlu1 %3365 }
 0x423   :  { %4966 = vst.msk [vmem:[%s10598_s4 + $0x224] sm:$0xf] %vm1357_vm0, %v3366_v51  ;;  %v11144_v51 = vld [vmem:[#allocation28_spill] sm:$0xff] }
 0x424   :  { %v3368_v61 = vpop.permute.xlu0 %3367  ;;  %3610 = vrot.lane.b32.xlu1 %v11142_v30, %s5670_s29 }
 0x425   :  { %4967 = vst.msk [vmem:[%s10598_s4 + $0x228] sm:$0xf] %vm1357_vm0, %v3368_v61  ;;  %v11145_v61 = vld [vmem:[#allocation32_spill] sm:$0xff] }
 0x426   :  { %3612 = vrot.lane.b32.xlu0 %v11143_v26, %s5670_s29  ;;  %v3370_v15 = vpop.permute.xlu1 %3369 }
 0x427   :  { %4968 = vst.msk [vmem:[%s10598_s4 + $0x22c] sm:$0xf] %vm1357_vm0, %v3370_v15  ;;  %v11146_v15 = vld [vmem:[#allocation36_spill] sm:$0xff] }
 0x428   :  { %v3372_v48 = vpop.permute.xlu0 %3371  ;;  %3614 = vrot.lane.b32.xlu1 %v11144_v51, %s5670_s29 }
 0x429   :  { %4969 = vst.msk [vmem:[%s10598_s4 + $0x230] sm:$0xf] %vm1357_vm0, %v3372_v48  ;;  %v11147_v48 = vld [vmem:[#allocation40_spill] sm:$0xff] }
 0x42a   :  { %3616 = vrot.lane.b32.xlu0 %v11145_v61, %s5670_s29  ;;  %v3374_v30 = vpop.permute.xlu1 %3373 }
 0x42b   :  { %4970 = vst.msk [vmem:[%s10598_s4 + $0x234] sm:$0xf] %vm1357_vm0, %v3374_v30  ;;  %v11148_v30 = vld [vmem:[#allocation44_spill] sm:$0xff] }
 0x42c   :  { %v3376_v26 = vpop.permute.xlu0 %3375  ;;  %3618 = vrot.lane.b32.xlu1 %v11146_v15, %s5670_s29 }
 0x42d   :  { %4971 = vst.msk [vmem:[%s10598_s4 + $0x238] sm:$0xf] %vm1357_vm0, %v3376_v26  ;;  %v11149_v26 = vld [vmem:[#allocation48_spill] sm:$0xff] }
 0x42e   :  { %3620 = vrot.lane.b32.xlu0 %v11147_v48, %s5670_s29  ;;  %v3378_v51 = vpop.permute.xlu1 %3377 }
 0x42f   :  { %4972 = vst.msk [vmem:[%s10598_s4 + $0x23c] sm:$0xf] %vm1357_vm0, %v3378_v51  ;;  %v11150_v51 = vld [vmem:[#allocation52_spill] sm:$0xff] }
 0x430   :  { %v3380_v61 = vpop.permute.xlu0 %3379  ;;  %3622 = vrot.lane.b32.xlu1 %v11148_v30, %s5670_s29 }
 0x431   :  { %4973 = vst.msk [vmem:[%s10598_s4 + $0x240] sm:$0xf] %vm1357_vm0, %v3380_v61  ;;  %v11151_v61 = vld [vmem:[#allocation56_spill] sm:$0xff] }
 0x432   :  { %3624 = vrot.lane.b32.xlu0 %v11149_v26, %s5670_s29  ;;  %v3382_v15 = vpop.permute.xlu1 %3381 }
 0x433   :  { %4974 = vst.msk [vmem:[%s10598_s4 + $0x244] sm:$0xf] %vm1357_vm0, %v3382_v15  ;;  %v11152_v15 = vld [vmem:[#allocation60_spill] sm:$0xff] }
 0x434   :  { %v3384_v48 = vpop.permute.xlu0 %3383  ;;  %3626 = vrot.lane.b32.xlu1 %v11150_v51, %s5670_s29 }
 0x435   :  { %4975 = vst.msk [vmem:[%s10598_s4 + $0x248] sm:$0xf] %vm1357_vm0, %v3384_v48  ;;  %v11153_v48 = vld [vmem:[#allocation64_spill] sm:$0xff] }
 0x436   :  { %3628 = vrot.lane.b32.xlu0 %v11151_v61, %s5670_s29  ;;  %v3386_v30 = vpop.permute.xlu1 %3385 }
 0x437   :  { %4976 = vst.msk [vmem:[%s10598_s4 + $0x24c] sm:$0xf] %vm1357_vm0, %v3386_v30  ;;  %v11154_v30 = vld [vmem:[#allocation68_spill] sm:$0xff] }
 0x438   :  { %v3388_v26 = vpop.permute.xlu0 %3387  ;;  %3630 = vrot.lane.b32.xlu1 %v11152_v15, %s5670_s29 }
 0x439   :  { %4977 = vst.msk [vmem:[%s10598_s4 + $0x250] sm:$0xf] %vm1357_vm0, %v3388_v26  ;;  %v11155_v26 = vld [vmem:[#allocation72_spill] sm:$0xff] }
 0x43a   :  { %3632 = vrot.lane.b32.xlu0 %v11153_v48, %s5670_s29  ;;  %v3390_v51 = vpop.permute.xlu1 %3389 }
 0x43b   :  { %4978 = vst.msk [vmem:[%s10598_s4 + $0x254] sm:$0xf] %vm1357_vm0, %v3390_v51  ;;  %v11156_v51 = vld [vmem:[#allocation76_spill] sm:$0xff] }
 0x43c   :  { %v3392_v61 = vpop.permute.xlu0 %3391  ;;  %3634 = vrot.lane.b32.xlu1 %v11154_v30, %s5670_s29 }
 0x43d   :  { %4979 = vst.msk [vmem:[%s10598_s4 + $0x258] sm:$0xf] %vm1357_vm0, %v3392_v61  ;;  %v11157_v61 = vld [vmem:[#allocation80_spill] sm:$0xff] }
 0x43e   :  { %3636 = vrot.lane.b32.xlu0 %v11155_v26, %s5670_s29  ;;  %v3394_v15 = vpop.permute.xlu1 %3393 }
 0x43f   :  { %4980 = vst.msk [vmem:[%s10598_s4 + $0x25c] sm:$0xf] %vm1357_vm0, %v3394_v15  ;;  %v11158_v15 = vld [vmem:[#allocation84_spill] sm:$0xff] }
 0x440   :  { %v3396_v48 = vpop.permute.xlu0 %3395  ;;  %3638 = vrot.lane.b32.xlu1 %v11156_v51, %s5670_s29 }
 0x441   :  { %4981 = vst.msk [vmem:[%s10598_s4 + $0x260] sm:$0xf] %vm1357_vm0, %v3396_v48  ;;  %v11159_v48 = vld [vmem:[#allocation88_spill] sm:$0xff] }
 0x442   :  { %3640 = vrot.lane.b32.xlu0 %v11157_v61, %s5670_s29  ;;  %v3398_v30 = vpop.permute.xlu1 %3397 }
 0x443   :  { %4982 = vst.msk [vmem:[%s10598_s4 + $0x264] sm:$0xf] %vm1357_vm0, %v3398_v30  ;;  %v11160_v30 = vld [vmem:[#allocation92_spill] sm:$0xff] }
 0x444   :  { %v3400_v26 = vpop.permute.xlu0 %3399  ;;  %3642 = vrot.lane.b32.xlu1 %v11158_v15, %s5670_s29 }
 0x445   :  { %4983 = vst.msk [vmem:[%s10598_s4 + $0x268] sm:$0xf] %vm1357_vm0, %v3400_v26  ;;  %v11161_v26 = vld [vmem:[#allocation96_spill] sm:$0xff] }
 0x446   :  { %3644 = vrot.lane.b32.xlu0 %v11159_v48, %s5670_s29  ;;  %v3402_v51 = vpop.permute.xlu1 %3401 }
 0x447   :  { %4984 = vst.msk [vmem:[%s10598_s4 + $0x26c] sm:$0xf] %vm1357_vm0, %v3402_v51  ;;  %v11162_v51 = vld [vmem:[#allocation98_spill] sm:$0xff] }
 0x448   :  { %v3404_v61 = vpop.permute.xlu0 %3403  ;;  %3646 = vrot.lane.b32.xlu1 %v11160_v30, %s5670_s29 }
 0x449   :  { %4985 = vst.msk [vmem:[%s10598_s4 + $0x270] sm:$0xf] %vm1357_vm0, %v3404_v61  ;;  %v11163_v61 = vld [vmem:[#allocation104_spill] sm:$0xff] }
 0x44a   :  { %3648 = vrot.lane.b32.xlu0 %v11161_v26, %s5670_s29  ;;  %v3406_v15 = vpop.permute.xlu1 %3405 }
 0x44b   :  { %4986 = vst.msk [vmem:[%s10598_s4 + $0x274] sm:$0xf] %vm1357_vm0, %v3406_v15  ;;  %v11164_v15 = vld [vmem:[#allocation106_spill] sm:$0xff] }
 0x44c   :  { %v3408_v48 = vpop.permute.xlu0 %3407  ;;  %3650 = vrot.lane.b32.xlu1 %v11162_v51, %s5670_s29 }
 0x44d   :  { %4987 = vst.msk [vmem:[%s10598_s4 + $0x278] sm:$0xf] %vm1357_vm0, %v3408_v48  ;;  %v11165_v48 = vld [vmem:[#allocation112_spill] sm:$0xff] }
 0x44e   :  { %3652 = vrot.lane.b32.xlu0 %v11163_v61, %s5670_s29  ;;  %v3410_v30 = vpop.permute.xlu1 %3409 }
 0x44f   :  { %4988 = vst.msk [vmem:[%s10598_s4 + $0x27c] sm:$0xf] %vm1357_vm0, %v3410_v30  ;;  %v11166_v30 = vld [vmem:[#allocation114_spill] sm:$0xff] }
 0x450   :  { %v3412_v26 = vpop.permute.xlu0 %3411  ;;  %3654 = vrot.lane.b32.xlu1 %v11164_v15, %s5670_s29 }
 0x451   :  { %4989 = vst.msk [vmem:[%s10598_s4 + $0x280] sm:$0xf] %vm1357_vm0, %v3412_v26  ;;  %v11167_v26 = vld [vmem:[#allocation120_spill] sm:$0xff] }
 0x452   :  { %3656 = vrot.lane.b32.xlu0 %v11165_v48, %s5670_s29  ;;  %v3414_v51 = vpop.permute.xlu1 %3413 }
 0x453   :  { %4990 = vst.msk [vmem:[%s10598_s4 + $0x284] sm:$0xf] %vm1357_vm0, %v3414_v51  ;;  %v11168_v51 = vld [vmem:[#allocation122_spill] sm:$0xff] }
 0x454   :  { %v3416_v61 = vpop.permute.xlu0 %3415  ;;  %3658 = vrot.lane.b32.xlu1 %v11166_v30, %s5670_s29 }
 0x455   :  { %4991 = vst.msk [vmem:[%s10598_s4 + $0x288] sm:$0xf] %vm1357_vm0, %v3416_v61 }
 0x456   :  { %3660 = vrot.lane.b32.xlu0 %v11167_v26, %s5670_s29  ;;  %v3418_v15 = vpop.permute.xlu1 %3417 }
 0x457   :  { %4992 = vst.msk [vmem:[%s10598_s4 + $0x28c] sm:$0xf] %vm1357_vm0, %v3418_v15 }
 0x458   :  { %v3420_v48 = vpop.permute.xlu0 %3419  ;;  %3662 = vrot.lane.b32.xlu1 %v11168_v51, %s5670_s29 }
 0x459   :  { %4993 = vst.msk [vmem:[%s10598_s4 + $0x290] sm:$0xf] %vm1357_vm0, %v3420_v48  ;;  %v11170_v48 = vld [vmem:[#allocation158_spill] sm:$0xff] }
 0x45a   :  { %3664 = vrot.lane.b32.xlu0 %v11036_v2, %s5670_s29  ;;  %v3422_v61 = vpop.permute.xlu1 %3421 }
 0x45b   :  { %4994 = vst.msk [vmem:[%s10598_s4 + $0x294] sm:$0xf] %vm1357_vm0, %v3422_v61 }
 0x45c   :  { %v3424_v30 = vpop.permute.xlu0 %3423  ;;  %3666 = vrot.lane.b32.xlu1 %v6925_v27, %s5670_s29 }
 0x45d   :  { %4995 = vst.msk [vmem:[%s10598_s4 + $0x298] sm:$0xf] %vm1357_vm0, %v3424_v30  ;;  %v11172_v30 = vld [vmem:[#allocation13_spill] sm:$0xff] }
 0x45e   :  { %3668 = vrot.lane.b32.xlu0 %v7014_v47, %s5670_s29  ;;  %v3426_v26 = vpop.permute.xlu1 %3425 }
 0x45f   :  { %4996 = vst.msk [vmem:[%s10598_s4 + $0x29c] sm:$0xf] %vm1357_vm0, %v3426_v26  ;;  %v11173_v26 = vld [vmem:[#allocation17_spill] sm:$0xff] }
 0x460   :  { %v3428_v2 = vpop.permute.xlu0 %3427  ;;  %3670 = vrot.lane.b32.xlu1 %v7029_v55, %s5670_s29 }
 0x461   :  { %4997 = vst.msk [vmem:[%s10598_s4 + $0x2a0] sm:$0xf] %vm1357_vm0, %v3428_v2 }
 0x462   :  { %3672 = vrot.lane.b32.xlu0 %v11026_v40, %s5670_s29  ;;  %v3430_v27 = vpop.permute.xlu1 %3429 }
 0x463   :  { %4998 = vst.msk [vmem:[%s10598_s4 + $0x2a4] sm:$0xf] %vm1357_vm0, %v3430_v27 }
 0x464   :  { %v3432_v47 = vpop.permute.xlu0 %3431  ;;  %3674 = vrot.lane.b32.xlu1 %v7133_v18, %s5670_s29 }
 0x465   :  { %4999 = vst.msk [vmem:[%s10598_s4 + $0x2a8] sm:$0xf] %vm1357_vm0, %v3432_v47  ;;  %v11174_v47 = vld [vmem:[#allocation21_spill] sm:$0xff] }
 0x466   :  { %3676 = vrot.lane.b32.xlu0 %v7222_v5, %s5670_s29  ;;  %v3434_v55 = vpop.permute.xlu1 %3433 }
 0x467   :  { %5000 = vst.msk [vmem:[%s10598_s4 + $0x2ac] sm:$0xf] %vm1357_vm0, %v3434_v55  ;;  %v11175_v55 = vld [vmem:[#allocation25_spill] sm:$0xff] }
 0x468   :  { %v3436_v40 = vpop.permute.xlu0 %3435  ;;  %3678 = vrot.lane.b32.xlu1 %v7237_v60, %s5670_s29 }
 0x469   :  { %5001 = vst.msk [vmem:[%s10598_s4 + $0x2b0] sm:$0xf] %vm1357_vm0, %v3436_v40 }
 0x46a   :  { %3680 = vrot.lane.b32.xlu0 %v7326_v7, %s5670_s29  ;;  %v3438_v18 = vpop.permute.xlu1 %3437 }
 0x46b   :  { %5002 = vst.msk [vmem:[%s10598_s4 + $0x2b4] sm:$0xf] %vm1357_vm0, %v3438_v18 }
 0x46c   :  { %v3440_v5 = vpop.permute.xlu0 %3439  ;;  %3682 = vrot.lane.b32.xlu1 %v7341_v4, %s5670_s29 }
 0x46d   :  { %5003 = vst.msk [vmem:[%s10598_s4 + $0x2b8] sm:$0xf] %vm1357_vm0, %v3440_v5  ;;  %v11176_v5 = vld [vmem:[#allocation29_spill] sm:$0xff] }
 0x46e   :  { %3684 = vrot.lane.b32.xlu0 %v7430_v37, %s5670_s29  ;;  %v3442_v60 = vpop.permute.xlu1 %3441 }
 0x46f   :  { %5004 = vst.msk [vmem:[%s10598_s4 + $0x2bc] sm:$0xf] %vm1357_vm0, %v3442_v60  ;;  %v11177_v60 = vld [vmem:[#allocation33_spill] sm:$0xff] }
 0x470   :  { %v3444_v7 = vpop.permute.xlu0 %3443  ;;  %3686 = vrot.lane.b32.xlu1 %v7445_v54, %s5670_s29 }
 0x471   :  { %5005 = vst.msk [vmem:[%s10598_s4 + $0x2c0] sm:$0xf] %vm1357_vm0, %v3444_v7 }
 0x472   :  { %3688 = vrot.lane.b32.xlu0 %v7534_v45, %s5670_s29  ;;  %v3446_v4 = vpop.permute.xlu1 %3445 }
 0x473   :  { %5006 = vst.msk [vmem:[%s10598_s4 + $0x2c4] sm:$0xf] %vm1357_vm0, %v3446_v4 }
 0x474   :  { %v3448_v37 = vpop.permute.xlu0 %3447  ;;  %3690 = vrot.lane.b32.xlu1 %v7549_v17, %s5670_s29  ;;  %v11169_v17 = vld [vmem:[#allocation156_spill] sm:$0xff] }
 0x475   :  { %5007 = vst.msk [vmem:[%s10598_s4 + $0x2c8] sm:$0xf] %vm1357_vm0, %v3448_v37  ;;  %v11178_v37 = vld [vmem:[#allocation37_spill] sm:$0xff] }
 0x476   :  { %3692 = vrot.lane.b32.xlu0 %v11034_v52, %s5670_s29  ;;  %v3450_v54 = vpop.permute.xlu1 %3449 }
 0x477   :  { %5008 = vst.msk [vmem:[%s10598_s4 + $0x2cc] sm:$0xf] %vm1357_vm0, %v3450_v54  ;;  %v11179_v54 = vld [vmem:[#allocation41_spill] sm:$0xff] }
 0x478   :  { %v3452_v45 = vpop.permute.xlu0 %3451  ;;  %3694 = vrot.lane.b32.xlu1 %v7653_v12, %s5670_s29  ;;  %v11171_v12 = vld [vmem:[#allocation9_spill] sm:$0xff] }
 0x479   :  { %5009 = vst.msk [vmem:[%s10598_s4 + $0x2d0] sm:$0xf] %vm1357_vm0, %v3452_v45 }
 0x47a   :  { %3696 = vrot.lane.b32.xlu0 %v11169_v17, %s5670_s29  ;;  %v3454_v15 = vpop.permute.xlu1 %3453 }
 0x47b   :  { %5010 = vst.msk [vmem:[%s10598_s4 + $0x2d4] sm:$0xf] %vm1357_vm0, %v3454_v15  ;;  %v11180_v15 = vld [vmem:[#allocation45_spill] sm:$0xff] }
 0x47c   :  { %v3456_v52 = vpop.permute.xlu0 %3455  ;;  %3698 = vrot.lane.b32.xlu1 %v11170_v48, %s5670_s29 }
 0x47d   :  { %5011 = vst.msk [vmem:[%s10598_s4 + $0x2d8] sm:$0xf] %vm1357_vm0, %v3456_v52  ;;  %v11181_v52 = vld [vmem:[#allocation49_spill] sm:$0xff] }
 0x47e   :  { %3700 = vrot.lane.b32.xlu0 %v11171_v12, %s5670_s29  ;;  %v3458_v51 = vpop.permute.xlu1 %3457 }
 0x47f   :  { %5012 = vst.msk [vmem:[%s10598_s4 + $0x2dc] sm:$0xf] %vm1357_vm0, %v3458_v51  ;;  %v11182_v51 = vld [vmem:[#allocation53_spill] sm:$0xff] }
 0x480   :  { %v3460_v61 = vpop.permute.xlu0 %3459  ;;  %3702 = vrot.lane.b32.xlu1 %v11172_v30, %s5670_s29 }
 0x481   :  { %5013 = vst.msk [vmem:[%s10598_s4 + $0x2e0] sm:$0xf] %vm1357_vm0, %v3460_v61  ;;  %v11183_v61 = vld [vmem:[#allocation57_spill] sm:$0xff] }
 0x482   :  { %3704 = vrot.lane.b32.xlu0 %v11173_v26, %s5670_s29  ;;  %v3462_v2 = vpop.permute.xlu1 %3461 }
 0x483   :  { %5014 = vst.msk [vmem:[%s10598_s4 + $0x2e4] sm:$0xf] %vm1357_vm0, %v3462_v2  ;;  %v11184_v2 = vld [vmem:[#allocation61_spill] sm:$0xff] }
 0x484   :  { %v3464_v27 = vpop.permute.xlu0 %3463  ;;  %3706 = vrot.lane.b32.xlu1 %v11174_v47, %s5670_s29 }
 0x485   :  { %5015 = vst.msk [vmem:[%s10598_s4 + $0x2e8] sm:$0xf] %vm1357_vm0, %v3464_v27  ;;  %v11185_v27 = vld [vmem:[#allocation65_spill] sm:$0xff] }
 0x486   :  { %3708 = vrot.lane.b32.xlu0 %v11175_v55, %s5670_s29  ;;  %v3466_v40 = vpop.permute.xlu1 %3465 }
 0x487   :  { %5016 = vst.msk [vmem:[%s10598_s4 + $0x2ec] sm:$0xf] %vm1357_vm0, %v3466_v40  ;;  %v11186_v40 = vld [vmem:[#allocation69_spill] sm:$0xff] }
 0x488   :  { %v3468_v18 = vpop.permute.xlu0 %3467  ;;  %3710 = vrot.lane.b32.xlu1 %v11176_v5, %s5670_s29 }
 0x489   :  { %5017 = vst.msk [vmem:[%s10598_s4 + $0x2f0] sm:$0xf] %vm1357_vm0, %v3468_v18  ;;  %v11187_v18 = vld [vmem:[#allocation10_spill] sm:$0xff] }
 0x48a   :  { %3712 = vrot.lane.b32.xlu0 %v11177_v60, %s5670_s29  ;;  %v3470_v7 = vpop.permute.xlu1 %3469 }
 0x48b   :  { %5018 = vst.msk [vmem:[%s10598_s4 + $0x2f4] sm:$0xf] %vm1357_vm0, %v3470_v7  ;;  %v11188_v7 = vld [vmem:[#allocation15_spill] sm:$0xff] }
 0x48c   :  { %v3472_v4 = vpop.permute.xlu0 %3471  ;;  %3714 = vrot.lane.b32.xlu1 %v11178_v37, %s5670_s29 }
 0x48d   :  { %5019 = vst.msk [vmem:[%s10598_s4 + $0x2f8] sm:$0xf] %vm1357_vm0, %v3472_v4  ;;  %v11189_v4 = vld [vmem:[#allocation18_spill] sm:$0xff] }
 0x48e   :  { %3716 = vrot.lane.b32.xlu0 %v11179_v54, %s5670_s29  ;;  %v3474_v45 = vpop.permute.xlu1 %3473 }
 0x48f   :  { %5020 = vst.msk [vmem:[%s10598_s4 + $0x2fc] sm:$0xf] %vm1357_vm0, %v3474_v45  ;;  %v11190_v45 = vld [vmem:[#allocation22_spill] sm:$0xff] }
 0x490   :  { %v3605_v17 = vpop.permute.xlu0 %3604  ;;  %3718 = vrot.lane.b32.xlu1 %v11180_v15, %s5670_s29 }
 0x491   :  { %5021 = vst.msk [vmem:[%s10596_s2 + $0x300] sm:$0xf] %vm1357_vm0, %v3605_v17  ;;  %v11191_v17 = vld [vmem:[#allocation26_spill] sm:$0xff] }
 0x492   :  { %3720 = vrot.lane.b32.xlu0 %v11181_v52, %s5670_s29  ;;  %v3607_v48 = vpop.permute.xlu1 %3606 }
 0x493   :  { %5022 = vst.msk [vmem:[%s10596_s2 + $0x304] sm:$0xf] %vm1357_vm0, %v3607_v48  ;;  %v11192_v48 = vld [vmem:[#allocation30_spill] sm:$0xff] }
 0x494   :  { %v3609_v12 = vpop.permute.xlu0 %3608  ;;  %3722 = vrot.lane.b32.xlu1 %v11182_v51, %s5670_s29 }
 0x495   :  { %5023 = vst.msk [vmem:[%s10596_s2 + $0x308] sm:$0xf] %vm1357_vm0, %v3609_v12  ;;  %v11193_v12 = vld [vmem:[#allocation34_spill] sm:$0xff] }
 0x496   :  { %3724 = vrot.lane.b32.xlu0 %v11183_v61, %s5670_s29  ;;  %v3611_v30 = vpop.permute.xlu1 %3610 }
 0x497   :  { %5024 = vst.msk [vmem:[%s10596_s2 + $0x30c] sm:$0xf] %vm1357_vm0, %v3611_v30  ;;  %v11194_v30 = vld [vmem:[#allocation38_spill] sm:$0xff] }
 0x498   :  { %v3613_v26 = vpop.permute.xlu0 %3612  ;;  %3726 = vrot.lane.b32.xlu1 %v11184_v2, %s5670_s29 }
 0x499   :  { %5025 = vst.msk [vmem:[%s10596_s2 + $0x310] sm:$0xf] %vm1357_vm0, %v3613_v26  ;;  %v11195_v26 = vld [vmem:[#allocation42_spill] sm:$0xff] }
 0x49a   :  { %3728 = vrot.lane.b32.xlu0 %v11185_v27, %s5670_s29  ;;  %v3615_v47 = vpop.permute.xlu1 %3614 }
 0x49b   :  { %5026 = vst.msk [vmem:[%s10596_s2 + $0x314] sm:$0xf] %vm1357_vm0, %v3615_v47  ;;  %v11196_v47 = vld [vmem:[#allocation46_spill] sm:$0xff] }
 0x49c   :  { %v3617_v55 = vpop.permute.xlu0 %3616  ;;  %3730 = vrot.lane.b32.xlu1 %v11186_v40, %s5670_s29 }
 0x49d   :  { %5027 = vst.msk [vmem:[%s10596_s2 + $0x318] sm:$0xf] %vm1357_vm0, %v3617_v55  ;;  %v11197_v55 = vld [vmem:[#allocation50_spill] sm:$0xff] }
 0x49e   :  { %3861 = vrot.lane.b32.xlu0 %v11187_v18, %s5670_s29  ;;  %v3619_v5 = vpop.permute.xlu1 %3618 }
 0x49f   :  { %5028 = vst.msk [vmem:[%s10596_s2 + $0x31c] sm:$0xf] %vm1357_vm0, %v3619_v5  ;;  %v11198_v5 = vld [vmem:[#allocation54_spill] sm:$0xff] }
 0x4a0   :  { %v3621_v60 = vpop.permute.xlu0 %3620  ;;  %3863 = vrot.lane.b32.xlu1 %v11188_v7, %s5670_s29 }
 0x4a1   :  { %5029 = vst.msk [vmem:[%s10596_s2 + $0x320] sm:$0xf] %vm1357_vm0, %v3621_v60  ;;  %v11199_v60 = vld [vmem:[#allocation58_spill] sm:$0xff] }
 0x4a2   :  { %3865 = vrot.lane.b32.xlu0 %v11189_v4, %s5670_s29  ;;  %v3623_v37 = vpop.permute.xlu1 %3622 }
 0x4a3   :  { %5030 = vst.msk [vmem:[%s10596_s2 + $0x324] sm:$0xf] %vm1357_vm0, %v3623_v37  ;;  %v11200_v37 = vld [vmem:[#allocation62_spill] sm:$0xff] }
 0x4a4   :  { %v3625_v54 = vpop.permute.xlu0 %3624  ;;  %3867 = vrot.lane.b32.xlu1 %v11190_v45, %s5670_s29 }
 0x4a5   :  { %5031 = vst.msk [vmem:[%s10596_s2 + $0x328] sm:$0xf] %vm1357_vm0, %v3625_v54  ;;  %v11201_v54 = vld [vmem:[#allocation66_spill] sm:$0xff] }
 0x4a6   :  { %3869 = vrot.lane.b32.xlu0 %v11191_v17, %s5670_s29  ;;  %v3627_v15 = vpop.permute.xlu1 %3626 }
 0x4a7   :  { %5032 = vst.msk [vmem:[%s10596_s2 + $0x32c] sm:$0xf] %vm1357_vm0, %v3627_v15  ;;  %v11202_v15 = vld [vmem:[#allocation70_spill] sm:$0xff] }
 0x4a8   :  { %v3629_v52 = vpop.permute.xlu0 %3628  ;;  %3871 = vrot.lane.b32.xlu1 %v11192_v48, %s5670_s29 }
 0x4a9   :  { %5033 = vst.msk [vmem:[%s10596_s2 + $0x330] sm:$0xf] %vm1357_vm0, %v3629_v52  ;;  %v11203_v52 = vld [vmem:[#allocation74_spill] sm:$0xff] }
 0x4aa   :  { %3873 = vrot.lane.b32.xlu0 %v11193_v12, %s5670_s29  ;;  %v3631_v51 = vpop.permute.xlu1 %3630 }
 0x4ab   :  { %5034 = vst.msk [vmem:[%s10596_s2 + $0x334] sm:$0xf] %vm1357_vm0, %v3631_v51  ;;  %v11204_v51 = vld [vmem:[#allocation78_spill] sm:$0xff] }
 0x4ac   :  { %v3633_v61 = vpop.permute.xlu0 %3632  ;;  %3875 = vrot.lane.b32.xlu1 %v11194_v30, %s5670_s29 }
 0x4ad   :  { %5035 = vst.msk [vmem:[%s10596_s2 + $0x338] sm:$0xf] %vm1357_vm0, %v3633_v61  ;;  %v11205_v61 = vld [vmem:[#allocation82_spill] sm:$0xff] }
 0x4ae   :  { %3877 = vrot.lane.b32.xlu0 %v11195_v26, %s5670_s29  ;;  %v3635_v2 = vpop.permute.xlu1 %3634 }
 0x4af   :  { %5036 = vst.msk [vmem:[%s10596_s2 + $0x33c] sm:$0xf] %vm1357_vm0, %v3635_v2  ;;  %v11206_v2 = vld [vmem:[#allocation86_spill] sm:$0xff] }
 0x4b0   :  { %v3637_v27 = vpop.permute.xlu0 %3636  ;;  %3879 = vrot.lane.b32.xlu1 %v11196_v47, %s5670_s29 }
 0x4b1   :  { %5037 = vst.msk [vmem:[%s10596_s2 + $0x340] sm:$0xf] %vm1357_vm0, %v3637_v27  ;;  %v11207_v27 = vld [vmem:[#allocation90_spill] sm:$0xff] }
 0x4b2   :  { %3881 = vrot.lane.b32.xlu0 %v11197_v55, %s5670_s29  ;;  %v3639_v40 = vpop.permute.xlu1 %3638 }
 0x4b3   :  { %5038 = vst.msk [vmem:[%s10596_s2 + $0x344] sm:$0xf] %vm1357_vm0, %v3639_v40  ;;  %v11208_v40 = vld [vmem:[#allocation94_spill] sm:$0xff] }
 0x4b4   :  { %v3641_v18 = vpop.permute.xlu0 %3640  ;;  %3883 = vrot.lane.b32.xlu1 %v11198_v5, %s5670_s29 }
 0x4b5   :  { %5039 = vst.msk [vmem:[%s10596_s2 + $0x348] sm:$0xf] %vm1357_vm0, %v3641_v18  ;;  %v11209_v18 = vld [vmem:[#allocation97_spill] sm:$0xff] }
 0x4b6   :  { %3885 = vrot.lane.b32.xlu0 %v11199_v60, %s5670_s29  ;;  %v3643_v7 = vpop.permute.xlu1 %3642 }
 0x4b7   :  { %5040 = vst.msk [vmem:[%s10596_s2 + $0x34c] sm:$0xf] %vm1357_vm0, %v3643_v7  ;;  %v11210_v7 = vld [vmem:[#allocation99_spill] sm:$0xff] }
 0x4b8   :  { %v3645_v4 = vpop.permute.xlu0 %3644  ;;  %3887 = vrot.lane.b32.xlu1 %v11200_v37, %s5670_s29 }
 0x4b9   :  { %5041 = vst.msk [vmem:[%s10596_s2 + $0x350] sm:$0xf] %vm1357_vm0, %v3645_v4  ;;  %v11211_v4 = vld [vmem:[#allocation105_spill] sm:$0xff] }
 0x4ba   :  { %3889 = vrot.lane.b32.xlu0 %v11201_v54, %s5670_s29  ;;  %v3647_v45 = vpop.permute.xlu1 %3646 }
 0x4bb   :  { %5042 = vst.msk [vmem:[%s10596_s2 + $0x354] sm:$0xf] %vm1357_vm0, %v3647_v45  ;;  %v11212_v45 = vld [vmem:[#allocation107_spill] sm:$0xff] }
 0x4bc   :  { %v3649_v17 = vpop.permute.xlu0 %3648  ;;  %3891 = vrot.lane.b32.xlu1 %v11202_v15, %s5670_s29 }
 0x4bd   :  { %5043 = vst.msk [vmem:[%s10596_s2 + $0x358] sm:$0xf] %vm1357_vm0, %v3649_v17  ;;  %v11213_v17 = vld [vmem:[#allocation113_spill] sm:$0xff] }
 0x4be   :  { %3893 = vrot.lane.b32.xlu0 %v11203_v52, %s5670_s29  ;;  %v3651_v48 = vpop.permute.xlu1 %3650 }
 0x4bf   :  { %5044 = vst.msk [vmem:[%s10596_s2 + $0x35c] sm:$0xf] %vm1357_vm0, %v3651_v48  ;;  %v11214_v48 = vld [vmem:[#allocation121_spill] sm:$0xff] }
 0x4c0   :  { %v3653_v12 = vpop.permute.xlu0 %3652  ;;  %3895 = vrot.lane.b32.xlu1 %v11204_v51, %s5670_s29 }
 0x4c1   :  { %5045 = vst.msk [vmem:[%s10596_s2 + $0x360] sm:$0xf] %vm1357_vm0, %v3653_v12 }
 0x4c2   :  { %3897 = vrot.lane.b32.xlu0 %v11205_v61, %s5670_s29  ;;  %v3655_v30 = vpop.permute.xlu1 %3654 }
 0x4c3   :  { %5046 = vst.msk [vmem:[%s10596_s2 + $0x364] sm:$0xf] %vm1357_vm0, %v3655_v30 }
 0x4c4   :  { %v3657_v26 = vpop.permute.xlu0 %3656  ;;  %3899 = vrot.lane.b32.xlu1 %v11206_v2, %s5670_s29 }
 0x4c5   :  { %5047 = vst.msk [vmem:[%s10596_s2 + $0x368] sm:$0xf] %vm1357_vm0, %v3657_v26  ;;  %v11216_v26 = vld [vmem:[#allocation159_spill] sm:$0xff] }
 0x4c6   :  { %3901 = vrot.lane.b32.xlu0 %v11207_v27, %s5670_s29  ;;  %v3659_v47 = vpop.permute.xlu1 %3658 }
 0x4c7   :  { %5048 = vst.msk [vmem:[%s10596_s2 + $0x36c] sm:$0xf] %vm1357_vm0, %v3659_v47  ;;  %v11218_v47 = vld [vmem:[#allocation14_spill] sm:$0xff] }
 0x4c8   :  { %v3661_v55 = vpop.permute.xlu0 %3660  ;;  %3903 = vrot.lane.b32.xlu1 %v11208_v40, %s5670_s29 }
 0x4c9   :  { %5049 = vst.msk [vmem:[%s10596_s2 + $0x370] sm:$0xf] %vm1357_vm0, %v3661_v55  ;;  %v11219_v55 = vld [vmem:[#allocation19_spill] sm:$0xff] }
 0x4ca   :  { %3905 = vrot.lane.b32.xlu0 %v11209_v18, %s5670_s29  ;;  %v3663_v5 = vpop.permute.xlu1 %3662 }
 0x4cb   :  { %5050 = vst.msk [vmem:[%s10596_s2 + $0x374] sm:$0xf] %vm1357_vm0, %v3663_v5  ;;  %v11220_v5 = vld [vmem:[#allocation23_spill] sm:$0xff] }
 0x4cc   :  { %v3665_v60 = vpop.permute.xlu0 %3664  ;;  %3907 = vrot.lane.b32.xlu1 %v11210_v7, %s5670_s29 }
 0x4cd   :  { %5051 = vst.msk [vmem:[%s10596_s2 + $0x378] sm:$0xf] %vm1357_vm0, %v3665_v60  ;;  %v11221_v60 = vld [vmem:[#allocation27_spill] sm:$0xff] }
 0x4ce   :  { %3909 = vrot.lane.b32.xlu0 %v11211_v4, %s5670_s29  ;;  %v3667_v37 = vpop.permute.xlu1 %3666 }
 0x4cf   :  { %5052 = vst.msk [vmem:[%s10596_s2 + $0x37c] sm:$0xf] %vm1357_vm0, %v3667_v37  ;;  %v11222_v37 = vld [vmem:[#allocation31_spill] sm:$0xff] }
 0x4d0   :  { %v3669_v54 = vpop.permute.xlu0 %3668  ;;  %3911 = vrot.lane.b32.xlu1 %v11212_v45, %s5670_s29 }
 0x4d1   :  { %5053 = vst.msk [vmem:[%s10596_s2 + $0x380] sm:$0xf] %vm1357_vm0, %v3669_v54  ;;  %v11223_v54 = vld [vmem:[#allocation35_spill] sm:$0xff] }
 0x4d2   :  { %3913 = vrot.lane.b32.xlu0 %v11213_v17, %s5670_s29  ;;  %v3671_v15 = vpop.permute.xlu1 %3670 }
 0x4d3   :  { %5054 = vst.msk [vmem:[%s10596_s2 + $0x384] sm:$0xf] %vm1357_vm0, %v3671_v15  ;;  %v11224_v15 = vld [vmem:[#allocation39_spill] sm:$0xff] }
 0x4d4   :  { %v3673_v52 = vpop.permute.xlu0 %3672  ;;  %3915 = vrot.lane.b32.xlu1 %v11080_v62, %s5670_s29 }
 0x4d5   :  { %5055 = vst.msk [vmem:[%s10596_s2 + $0x388] sm:$0xf] %vm1357_vm0, %v3673_v52  ;;  %v11225_v52 = vld [vmem:[#allocation43_spill] sm:$0xff] }
 0x4d6   :  { %3917 = vrot.lane.b32.xlu0 %v11214_v48, %s5670_s29  ;;  %v3675_v12 = vpop.permute.xlu1 %3674 }
 0x4d7   :  { %5056 = vst.msk [vmem:[%s10596_s2 + $0x38c] sm:$0xf] %vm1357_vm0, %v3675_v12 }
 0x4d8   :  { %v3677_v51 = vpop.permute.xlu0 %3676  ;;  %3919 = vrot.lane.b32.xlu1 %v11082_v6, %s5670_s29 }
 0x4d9   :  { %5057 = vst.msk [vmem:[%s10596_s2 + $0x390] sm:$0xf] %vm1357_vm0, %v3677_v51  ;;  %v11226_v51 = vld [vmem:[#allocation47_spill] sm:$0xff] }
 0x4da   :  { %3921 = vrot.lane.b32.xlu0 %v6914_v63, %s5670_s29  ;;  %v3679_v62 = vpop.permute.xlu1 %3678 }
 0x4db   :  { %5058 = vst.msk [vmem:[%s10596_s2 + $0x394] sm:$0xf] %vm1357_vm0, %v3679_v62  ;;  %v11227_v62 = vld [vmem:[#allocation51_spill] sm:$0xff] }
 0x4dc   :  { %v3681_v61 = vpop.permute.xlu0 %3680  ;;  %3923 = vrot.lane.b32.xlu1 %v6934_v29, %s5670_s29 }
 0x4dd   :  { %5059 = vst.msk [vmem:[%s10596_s2 + $0x398] sm:$0xf] %vm1357_vm0, %v3681_v61 }
 0x4de   :  { %3925 = vrot.lane.b32.xlu0 %v11025_v53, %s5670_s29  ;;  %v3683_v6 = vpop.permute.xlu1 %3682 }
 0x4df   :  { %5060 = vst.msk [vmem:[%s10596_s2 + $0x39c] sm:$0xf] %vm1357_vm0, %v3683_v6 }
 0x4e0   :  { %v3685_v63 = vpop.permute.xlu0 %3684  ;;  %3927 = vrot.lane.b32.xlu1 %v7038_v25, %s5670_s29 }
 0x4e1   :  { %5061 = vst.msk [vmem:[%s10596_s2 + $0x3a0] sm:$0xf] %vm1357_vm0, %v3685_v63  ;;  %v11228_v63 = vld [vmem:[#allocation55_spill] sm:$0xff] }
 0x4e2   :  { %3929 = vrot.lane.b32.xlu0 %v11027_v39, %s5670_s29  ;;  %v3687_v29 = vpop.permute.xlu1 %3686 }
 0x4e3   :  { %5062 = vst.msk [vmem:[%s10596_s2 + $0x3a4] sm:$0xf] %vm1357_vm0, %v3687_v29  ;;  %v11229_v29 = vld [vmem:[#allocation59_spill] sm:$0xff] }
 0x4e4   :  { %v3689_v53 = vpop.permute.xlu0 %3688  ;;  %3931 = vrot.lane.b32.xlu1 %v7142_v3, %s5670_s29 }
 0x4e5   :  { %5063 = vst.msk [vmem:[%s10596_s2 + $0x3a8] sm:$0xf] %vm1357_vm0, %v3689_v53 }
 0x4e6   :  { %3933 = vrot.lane.b32.xlu0 %v11028_v10, %s5670_s29  ;;  %v3691_v25 = vpop.permute.xlu1 %3690 }
 0x4e7   :  { %5064 = vst.msk [vmem:[%s10596_s2 + $0x3ac] sm:$0xf] %vm1357_vm0, %v3691_v25 }
 0x4e8   :  { %v3693_v39 = vpop.permute.xlu0 %3692  ;;  %3935 = vrot.lane.b32.xlu1 %v7246_v35, %s5670_s29 }
 0x4e9   :  { %5065 = vst.msk [vmem:[%s10596_s2 + $0x3b0] sm:$0xf] %vm1357_vm0, %v3693_v39  ;;  %v11230_v39 = vld [vmem:[#allocation63_spill] sm:$0xff] }
 0x4ea   :  { %3937 = vrot.lane.b32.xlu0 %v11029_v9, %s5670_s29  ;;  %v3695_v3 = vpop.permute.xlu1 %3694 }
 0x4eb   :  { %5066 = vst.msk [vmem:[%s10596_s2 + $0x3b4] sm:$0xf] %vm1357_vm0, %v3695_v3  ;;  %v11231_v3 = vld [vmem:[#allocation67_spill] sm:$0xff] }
 0x4ec   :  { %v3697_v10 = vpop.permute.xlu0 %3696  ;;  %3939 = vrot.lane.b32.xlu1 %v7350_v33, %s5670_s29 }
 0x4ed   :  { %5067 = vst.msk [vmem:[%s10596_s2 + $0x3b8] sm:$0xf] %vm1357_vm0, %v3697_v10 }
 0x4ee   :  { %3941 = vrot.lane.b32.xlu0 %v7434_v22, %s5670_s29  ;;  %v3699_v35 = vpop.permute.xlu1 %3698 }
 0x4ef   :  { %5068 = vst.msk [vmem:[%s10596_s2 + $0x3bc] sm:$0xf] %vm1357_vm0, %v3699_v35 }
 0x4f0   :  { %v3701_v9 = vpop.permute.xlu0 %3700  ;;  %3943 = vrot.lane.b32.xlu1 %v7454_v23, %s5670_s29 }
 0x4f1   :  { %5069 = vst.msk [vmem:[%s10596_s2 + $0x3c0] sm:$0xf] %vm1357_vm0, %v3701_v9  ;;  %v11232_v9 = vld [vmem:[#allocation71_spill] sm:$0xff] }
 0x4f2   :  { %3945 = vrot.lane.b32.xlu0 %v7538_v13, %s5670_s29  ;;  %v3703_v33 = vpop.permute.xlu1 %3702 }
 0x4f3   :  { %5070 = vst.msk [vmem:[%s10596_s2 + $0x3c4] sm:$0xf] %vm1357_vm0, %v3703_v33  ;;  %v11233_v33 = vld [vmem:[#allocation75_spill] sm:$0xff] }
 0x4f4   :  { %v3705_v22 = vpop.permute.xlu0 %3704  ;;  %3947 = vrot.lane.b32.xlu1 %v7558_v57, %s5670_s29  ;;  %v11215_v57 = vld [vmem:[#allocation157_spill] sm:$0xff] }
 0x4f5   :  { %5071 = vst.msk [vmem:[%s10596_s2 + $0x3c8] sm:$0xf] %vm1357_vm0, %v3705_v22 }
 0x4f6   :  { %3949 = vrot.lane.b32.xlu0 %v11035_v43, %s5670_s29  ;;  %v3707_v23 = vpop.permute.xlu1 %3706 }
 0x4f7   :  { %5072 = vst.msk [vmem:[%s10596_s2 + $0x3cc] sm:$0xf] %vm1357_vm0, %v3707_v23 }
 0x4f8   :  { %v3709_v13 = vpop.permute.xlu0 %3708  ;;  %3951 = vrot.lane.b32.xlu1 %v7662_v1, %s5670_s29  ;;  %v11217_v1 = vld [vmem:[#allocation11_spill] sm:$0xff] }
 0x4f9   :  { %5073 = vst.msk [vmem:[%s10596_s2 + $0x3d0] sm:$0xf] %vm1357_vm0, %v3709_v13  ;;  %v11234_v13 = vld [vmem:[#allocation79_spill] sm:$0xff] }
 0x4fa   :  { %3953 = vrot.lane.b32.xlu0 %v11215_v57, %s5670_s29  ;;  %v3711_v30 = vpop.permute.xlu1 %3710  ;;  %v11235_v57 = vld [vmem:[#allocation73_spill] sm:$0xff] }
 0x4fb   :  { %5074 = vst.msk [vmem:[%s10596_s2 + $0x3d4] sm:$0xf] %vm1357_vm0, %v3711_v30 }
 0x4fc   :  { %v3713_v43 = vpop.permute.xlu0 %3712  ;;  %3955 = vrot.lane.b32.xlu1 %v11216_v26, %s5670_s29  ;;  %v11236_v26 = vld [vmem:[#allocation77_spill] sm:$0xff] }
 0x4fd   :  { %5075 = vst.msk [vmem:[%s10596_s2 + $0x3d8] sm:$0xf] %vm1357_vm0, %v3713_v43 }
 0x4fe   :  { %3957 = vrot.lane.b32.xlu0 %v11217_v1, %s5670_s29  ;;  %v3715_v2 = vpop.permute.xlu1 %3714  ;;  %v11237_v1 = vld [vmem:[#allocation83_spill] sm:$0xff] }
 0x4ff   :  { %5076 = vst.msk [vmem:[%s10596_s2 + $0x3dc] sm:$0xf] %vm1357_vm0, %v3715_v2 }
 0x500   :  { %v3717_v27 = vpop.permute.xlu0 %3716  ;;  %3959 = vrot.lane.b32.xlu1 %v11218_v47, %s5670_s29  ;;  %v11238_v47 = vld [vmem:[#allocation87_spill] sm:$0xff] }
 0x501   :  { %5077 = vst.msk [vmem:[%s10596_s2 + $0x3e0] sm:$0xf] %vm1357_vm0, %v3717_v27 }
 0x502   :  { %3961 = vrot.lane.b32.xlu0 %v11219_v55, %s5670_s29  ;;  %v3719_v40 = vpop.permute.xlu1 %3718  ;;  %v11239_v55 = vld [vmem:[#allocation81_spill] sm:$0xff] }
 0x503   :  { %5078 = vst.msk [vmem:[%s10596_s2 + $0x3e4] sm:$0xf] %vm1357_vm0, %v3719_v40 }
 0x504   :  { %v3721_v18 = vpop.permute.xlu0 %3720  ;;  %3963 = vrot.lane.b32.xlu1 %v11220_v5, %s5670_s29  ;;  %v11240_v5 = vld [vmem:[#allocation85_spill] sm:$0xff] }
 0x505   :  { %5079 = vst.msk [vmem:[%s10596_s2 + $0x3e8] sm:$0xf] %vm1357_vm0, %v3721_v18 }
 0x506   :  { %3965 = vrot.lane.b32.xlu0 %v11221_v60, %s5670_s29  ;;  %v3723_v7 = vpop.permute.xlu1 %3722  ;;  %v11241_v60 = vld [vmem:[#allocation91_spill] sm:$0xff] }
 0x507   :  { %5080 = vst.msk [vmem:[%s10596_s2 + $0x3ec] sm:$0xf] %vm1357_vm0, %v3723_v7 }
 0x508   :  { %v3725_v4 = vpop.permute.xlu0 %3724  ;;  %3967 = vrot.lane.b32.xlu1 %v11222_v37, %s5670_s29  ;;  %v11242_v37 = vld [vmem:[#allocation95_spill] sm:$0xff] }
 0x509   :  { %5081 = vst.msk [vmem:[%s10596_s2 + $0x3f0] sm:$0xf] %vm1357_vm0, %v3725_v4 }
 0x50a   :  { %3969 = vrot.lane.b32.xlu0 %v11223_v54, %s5670_s29  ;;  %v3727_v45 = vpop.permute.xlu1 %3726  ;;  %v11243_v54 = vld [vmem:[#allocation89_spill] sm:$0xff] }
 0x50b   :  { %5082 = vst.msk [vmem:[%s10596_s2 + $0x3f4] sm:$0xf] %vm1357_vm0, %v3727_v45 }
 0x50c   :  { %v3729_v17 = vpop.permute.xlu0 %3728  ;;  %3971 = vrot.lane.b32.xlu1 %v11224_v15, %s5670_s29  ;;  %v11244_v15 = vld [vmem:[#allocation93_spill] sm:$0xff] }
 0x50d   :  { %5083 = vst.msk [vmem:[%s10596_s2 + $0x3f8] sm:$0xf] %vm1357_vm0, %v3729_v17 }
 0x50e   :  { %3973 = vrot.lane.b32.xlu0 %v11225_v52, %s5670_s29  ;;  %v3731_v48 = vpop.permute.xlu1 %3730  ;;  %v11245_v52 = vld [vmem:[#allocation101_spill] sm:$0xff] }
 0x50f   :  { %5084 = vst.msk [vmem:[%s10596_s2 + $0x3fc] sm:$0xf] %vm1357_vm0, %v3731_v48 }
 0x510   :  { %v3862_v12 = vpop.permute.xlu0 %3861  ;;  %3975 = vrot.lane.b32.xlu1 %v11226_v51, %s5670_s29  ;;  %v11246_v51 = vld [vmem:[#allocation103_spill] sm:$0xff] }
 0x511   :  { %5085 = vst.msk [vmem:[%s10597_s3 + $0x300] sm:$0xf] %vm1357_vm0, %v3862_v12 }
 0x512   :  { %3977 = vrot.lane.b32.xlu0 %v11227_v62, %s5670_s29  ;;  %v3864_v61 = vpop.permute.xlu1 %3863  ;;  %v11247_v62 = vld [vmem:[#allocation100_spill] sm:$0xff] }
 0x513   :  { %5086 = vst.msk [vmem:[%s10597_s3 + $0x304] sm:$0xf] %vm1357_vm0, %v3864_v61 }
 0x514   :  { %v3866_v6 = vpop.permute.xlu0 %3865  ;;  %3979 = vrot.lane.b32.xlu1 %v11228_v63, %s5670_s29  ;;  %v11248_v63 = vld [vmem:[#allocation102_spill] sm:$0xff] }
 0x515   :  { %5087 = vst.msk [vmem:[%s10597_s3 + $0x308] sm:$0xf] %vm1357_vm0, %v3866_v6 }
 0x516   :  { %3981 = vrot.lane.b32.xlu0 %v11229_v29, %s5670_s29  ;;  %v3868_v53 = vpop.permute.xlu1 %3867  ;;  %v11249_v29 = vld [vmem:[#allocation109_spill] sm:$0xff] }
 0x517   :  { %5088 = vst.msk [vmem:[%s10597_s3 + $0x30c] sm:$0xf] %vm1357_vm0, %v3868_v53 }
 0x518   :  { %v3870_v25 = vpop.permute.xlu0 %3869  ;;  %3983 = vrot.lane.b32.xlu1 %v11230_v39, %s5670_s29  ;;  %v11250_v39 = vld [vmem:[#allocation111_spill] sm:$0xff] }
 0x519   :  { %5089 = vst.msk [vmem:[%s10597_s3 + $0x310] sm:$0xf] %vm1357_vm0, %v3870_v25 }
 0x51a   :  { %3985 = vrot.lane.b32.xlu0 %v11231_v3, %s5670_s29  ;;  %v3872_v10 = vpop.permute.xlu1 %3871  ;;  %v11251_v3 = vld [vmem:[#allocation108_spill] sm:$0xff] }
 0x51b   :  { %5090 = vst.msk [vmem:[%s10597_s3 + $0x314] sm:$0xf] %vm1357_vm0, %v3872_v10 }
 0x51c   :  { %v3874_v35 = vpop.permute.xlu0 %3873  ;;  %3987 = vrot.lane.b32.xlu1 %v11232_v9, %s5670_s29  ;;  %v11252_v9 = vld [vmem:[#allocation110_spill] sm:$0xff] }
 0x51d   :  { %5091 = vst.msk [vmem:[%s10597_s3 + $0x318] sm:$0xf] %vm1357_vm0, %v3874_v35 }
 0x51e   :  { %4118 = vrot.lane.b32.xlu0 %v11233_v33, %s5670_s29  ;;  %v3876_v22 = vpop.permute.xlu1 %3875  ;;  %v11253_v33 = vld [vmem:[#allocation117_spill] sm:$0xff] }
 0x51f   :  { %5092 = vst.msk [vmem:[%s10597_s3 + $0x31c] sm:$0xf] %vm1357_vm0, %v3876_v22 }
 0x520   :  { %v3878_v23 = vpop.permute.xlu0 %3877  ;;  %4120 = vrot.lane.b32.xlu1 %v11234_v13, %s5670_s29  ;;  %v11254_v13 = vld [vmem:[#allocation119_spill] sm:$0xff] }
 0x521   :  { %5093 = vst.msk [vmem:[%s10597_s3 + $0x320] sm:$0xf] %vm1357_vm0, %v3878_v23 }
 0x522   :  { %4122 = vrot.lane.b32.xlu0 %v11235_v57, %s5670_s29  ;;  %v3880_v30 = vpop.permute.xlu1 %3879  ;;  %v11255_v57 = vld [vmem:[#allocation116_spill] sm:$0xff] }
 0x523   :  { %5094 = vst.msk [vmem:[%s10597_s3 + $0x324] sm:$0xf] %vm1357_vm0, %v3880_v30 }
 0x524   :  { %v3882_v43 = vpop.permute.xlu0 %3881  ;;  %4124 = vrot.lane.b32.xlu1 %v11236_v26, %s5670_s29  ;;  %v11256_v26 = vld [vmem:[#allocation118_spill] sm:$0xff] }
 0x525   :  { %5095 = vst.msk [vmem:[%s10597_s3 + $0x328] sm:$0xf] %vm1357_vm0, %v3882_v43 }
 0x526   :  { %4126 = vrot.lane.b32.xlu0 %v11237_v1, %s5670_s29  ;;  %v3884_v2 = vpop.permute.xlu1 %3883  ;;  %v11257_v1 = vld [vmem:[#allocation125_spill] sm:$0xff] }
 0x527   :  { %5096 = vst.msk [vmem:[%s10597_s3 + $0x32c] sm:$0xf] %vm1357_vm0, %v3884_v2 }
 0x528   :  { %v3886_v27 = vpop.permute.xlu0 %3885  ;;  %4128 = vrot.lane.b32.xlu1 %v11238_v47, %s5670_s29  ;;  %v11258_v47 = vld [vmem:[#allocation124_spill] sm:$0xff] }
 0x529   :  { %5097 = vst.msk [vmem:[%s10597_s3 + $0x330] sm:$0xf] %vm1357_vm0, %v3886_v27 }
 0x52a   :  { %4130 = vrot.lane.b32.xlu0 %v11239_v55, %s5670_s29  ;;  %v3888_v40 = vpop.permute.xlu1 %3887 }
 0x52b   :  { %5098 = vst.msk [vmem:[%s10597_s3 + $0x334] sm:$0xf] %vm1357_vm0, %v3888_v40 }
 0x52c   :  { %v3890_v18 = vpop.permute.xlu0 %3889  ;;  %4132 = vrot.lane.b32.xlu1 %v11240_v5, %s5670_s29 }
 0x52d   :  { %5099 = vst.msk [vmem:[%s10597_s3 + $0x338] sm:$0xf] %vm1357_vm0, %v3890_v18 }
 0x52e   :  { %4134 = vrot.lane.b32.xlu0 %v11241_v60, %s5670_s29  ;;  %v3892_v7 = vpop.permute.xlu1 %3891 }
 0x52f   :  { %5100 = vst.msk [vmem:[%s10597_s3 + $0x33c] sm:$0xf] %vm1357_vm0, %v3892_v7 }
 0x530   :  { %v3894_v4 = vpop.permute.xlu0 %3893  ;;  %4136 = vrot.lane.b32.xlu1 %v11242_v37, %s5670_s29 }
 0x531   :  { %5101 = vst.msk [vmem:[%s10597_s3 + $0x340] sm:$0xf] %vm1357_vm0, %v3894_v4 }
 0x532   :  { %4138 = vrot.lane.b32.xlu0 %v11243_v54, %s5670_s29  ;;  %v3896_v45 = vpop.permute.xlu1 %3895 }
 0x533   :  { %5102 = vst.msk [vmem:[%s10597_s3 + $0x344] sm:$0xf] %vm1357_vm0, %v3896_v45 }
 0x534   :  { %v3898_v17 = vpop.permute.xlu0 %3897  ;;  %4140 = vrot.lane.b32.xlu1 %v11244_v15, %s5670_s29 }
 0x535   :  { %5103 = vst.msk [vmem:[%s10597_s3 + $0x348] sm:$0xf] %vm1357_vm0, %v3898_v17 }
 0x536   :  { %4142 = vrot.lane.b32.xlu0 %v11245_v52, %s5670_s29  ;;  %v3900_v48 = vpop.permute.xlu1 %3899 }
 0x537   :  { %5104 = vst.msk [vmem:[%s10597_s3 + $0x34c] sm:$0xf] %vm1357_vm0, %v3900_v48 }
 0x538   :  { %v3902_v12 = vpop.permute.xlu0 %3901  ;;  %4144 = vrot.lane.b32.xlu1 %v11246_v51, %s5670_s29 }
 0x539   :  { %5105 = vst.msk [vmem:[%s10597_s3 + $0x350] sm:$0xf] %vm1357_vm0, %v3902_v12 }
 0x53a   :  { %4146 = vrot.lane.b32.xlu0 %v11247_v62, %s5670_s29  ;;  %v3904_v61 = vpop.permute.xlu1 %3903 }
 0x53b   :  { %5106 = vst.msk [vmem:[%s10597_s3 + $0x354] sm:$0xf] %vm1357_vm0, %v3904_v61 }
 0x53c   :  { %v3906_v6 = vpop.permute.xlu0 %3905  ;;  %4148 = vrot.lane.b32.xlu1 %v11248_v63, %s5670_s29 }
 0x53d   :  { %5107 = vst.msk [vmem:[%s10597_s3 + $0x358] sm:$0xf] %vm1357_vm0, %v3906_v6 }
 0x53e   :  { %4150 = vrot.lane.b32.xlu0 %v11249_v29, %s5670_s29  ;;  %v3908_v53 = vpop.permute.xlu1 %3907 }
 0x53f   :  { %5108 = vst.msk [vmem:[%s10597_s3 + $0x35c] sm:$0xf] %vm1357_vm0, %v3908_v53 }
 0x540   :  { %v3910_v25 = vpop.permute.xlu0 %3909  ;;  %4152 = vrot.lane.b32.xlu1 %v11250_v39, %s5670_s29 }
 0x541   :  { %5109 = vst.msk [vmem:[%s10597_s3 + $0x360] sm:$0xf] %vm1357_vm0, %v3910_v25 }
 0x542   :  { %4154 = vrot.lane.b32.xlu0 %v11251_v3, %s5670_s29  ;;  %v3912_v10 = vpop.permute.xlu1 %3911 }
 0x543   :  { %5110 = vst.msk [vmem:[%s10597_s3 + $0x364] sm:$0xf] %vm1357_vm0, %v3912_v10  ;;  %v11270_v10 = vld [vmem:[#allocation162_spill] sm:$0xff] }
 0x544   :  { %v3914_v35 = vpop.permute.xlu0 %3913  ;;  %4156 = vrot.lane.b32.xlu1 %v11252_v9, %s5670_s29  ;;  %v11272_v9 = vld [vmem:[#allocation161_spill] sm:$0xff] }
 0x545   :  { %5111 = vst.msk [vmem:[%s10597_s3 + $0x368] sm:$0xf] %vm1357_vm0, %v3914_v35 }
 0x546   :  { %4158 = vrot.lane.b32.xlu0 %v11253_v33, %s5670_s29  ;;  %v3916_v22 = vpop.permute.xlu1 %3915 }
 0x547   :  { %5112 = vst.msk [vmem:[%s10597_s3 + $0x36c] sm:$0xf] %vm1357_vm0, %v3916_v22 }
 0x548   :  { %v3918_v23 = vpop.permute.xlu0 %3917  ;;  %4160 = vrot.lane.b32.xlu1 %v11254_v13, %s5670_s29 }
 0x549   :  { %5113 = vst.msk [vmem:[%s10597_s3 + $0x370] sm:$0xf] %vm1357_vm0, %v3918_v23 }
 0x54a   :  { %4162 = vrot.lane.b32.xlu0 %v11255_v57, %s5670_s29  ;;  %v3920_v30 = vpop.permute.xlu1 %3919 }
 0x54b   :  { %5114 = vst.msk [vmem:[%s10597_s3 + $0x374] sm:$0xf] %vm1357_vm0, %v3920_v30 }
 0x54c   :  { %v3922_v43 = vpop.permute.xlu0 %3921  ;;  %4164 = vrot.lane.b32.xlu1 %v11256_v26, %s5670_s29 }
 0x54d   :  { %5115 = vst.msk [vmem:[%s10597_s3 + $0x378] sm:$0xf] %vm1357_vm0, %v3922_v43 }
 0x54e   :  { %4166 = vrot.lane.b32.xlu0 %v11257_v1, %s5670_s29  ;;  %v3924_v2 = vpop.permute.xlu1 %3923 }
 0x54f   :  { %5116 = vst.msk [vmem:[%s10597_s3 + $0x37c] sm:$0xf] %vm1357_vm0, %v3924_v2 }
 0x550   :  { %v3926_v27 = vpop.permute.xlu0 %3925  ;;  %4168 = vrot.lane.b32.xlu1 %v11124_v31, %s5670_s29 }
 0x551   :  { %5117 = vst.msk [vmem:[%s10597_s3 + $0x380] sm:$0xf] %vm1357_vm0, %v3926_v27 }
 0x552   :  { %4170 = vrot.lane.b32.xlu0 %v11258_v47, %s5670_s29  ;;  %v3928_v55 = vpop.permute.xlu1 %3927 }
 0x553   :  { %5118 = vst.msk [vmem:[%s10597_s3 + $0x384] sm:$0xf] %vm1357_vm0, %v3928_v55 }
 0x554   :  { %v3930_v40 = vpop.permute.xlu0 %3929  ;;  %4172 = vrot.lane.b32.xlu1 %v11126_v19, %s5670_s29 }
 0x555   :  { %5119 = vst.msk [vmem:[%s10597_s3 + $0x388] sm:$0xf] %vm1357_vm0, %v3930_v40 }
 0x556   :  { %4174 = vrot.lane.b32.xlu0 %v6959_v0, %s5670_s29  ;;  %v3932_v31 = vpop.permute.xlu1 %3931 }
 0x557   :  { %5120 = vst.msk [vmem:[%s10597_s3 + $0x38c] sm:$0xf] %vm1357_vm0, %v3932_v31 }
 0x558   :  { %v3934_v18 = vpop.permute.xlu0 %3933  ;;  %4176 = vrot.lane.b32.xlu1 %v6974_v38, %s5670_s29  ;;  %v11259_v38 = vld [vmem:[#allocation131_spill] sm:$0xff] }
 0x559   :  { %5121 = vst.msk [vmem:[%s10597_s3 + $0x390] sm:$0xf] %vm1357_vm0, %v3934_v18 }
 0x55a   :  { %4178 = vrot.lane.b32.xlu0 %v6936_v42, %s5670_s29  ;;  %v3936_v19 = vpop.permute.xlu1 %3935 }
 0x55b   :  { %5122 = vst.msk [vmem:[%s10597_s3 + $0x394] sm:$0xf] %vm1357_vm0, %v3936_v19 }
 0x55c   :  { %v3938_v0 = vpop.permute.xlu0 %3937  ;;  %4180 = vrot.lane.b32.xlu1 %v6965_v36, %s5670_s29  ;;  %v11260_v36 = vld [vmem:[#allocation130_spill] sm:$0xff] }
 0x55d   :  { %5123 = vst.msk [vmem:[%s10597_s3 + $0x398] sm:$0xf] %vm1357_vm0, %v3938_v0 }
 0x55e   :  { %4182 = vrot.lane.b32.xlu0 %v11259_v38, %s5670_s29  ;;  %v3940_v5 = vpop.permute.xlu1 %3939 }
 0x55f   :  { %5124 = vst.msk [vmem:[%s10597_s3 + $0x39c] sm:$0xf] %vm1357_vm0, %v3940_v5 }
 0x560   :  { %v3942_v42 = vpop.permute.xlu0 %3941  ;;  %4184 = vrot.lane.b32.xlu1 %v7078_v46, %s5670_s29  ;;  %v11261_v46 = vld [vmem:[#allocation136_spill] sm:$0xff] }
 0x561   :  { %5125 = vst.msk [vmem:[%s10597_s3 + $0x3a0] sm:$0xf] %vm1357_vm0, %v3942_v42 }
 0x562   :  { %4186 = vrot.lane.b32.xlu0 %v11260_v36, %s5670_s29  ;;  %v3944_v60 = vpop.permute.xlu1 %3943 }
 0x563   :  { %5126 = vst.msk [vmem:[%s10597_s3 + $0x3a4] sm:$0xf] %vm1357_vm0, %v3944_v60 }
 0x564   :  { %v3946_v7 = vpop.permute.xlu0 %3945  ;;  %4188 = vrot.lane.b32.xlu1 %v11128_v28, %s5670_s29 }
 0x565   :  { %5127 = vst.msk [vmem:[%s10597_s3 + $0x3a8] sm:$0xf] %vm1357_vm0, %v3946_v7 }
 0x566   :  { %4190 = vrot.lane.b32.xlu0 %v11261_v46, %s5670_s29  ;;  %v3948_v4 = vpop.permute.xlu1 %3947 }
 0x567   :  { %5128 = vst.msk [vmem:[%s10597_s3 + $0x3ac] sm:$0xf] %vm1357_vm0, %v3948_v4 }
 0x568   :  { %v3950_v37 = vpop.permute.xlu0 %3949  ;;  %4192 = vrot.lane.b32.xlu1 %v7182_v24, %s5670_s29  ;;  %v11262_v24 = vld [vmem:[#allocation139_spill] sm:$0xff] }
 0x569   :  { %5129 = vst.msk [vmem:[%s10597_s3 + $0x3b0] sm:$0xf] %vm1357_vm0, %v3950_v37 }
 0x56a   :  { %4194 = vrot.lane.b32.xlu0 %v11129_v56, %s5670_s29  ;;  %v3952_v28 = vpop.permute.xlu1 %3951 }
 0x56b   :  { %5130 = vst.msk [vmem:[%s10597_s3 + $0x3b4] sm:$0xf] %vm1357_vm0, %v3952_v28 }
 0x56c   :  { %v3954_v54 = vpop.permute.xlu0 %3953  ;;  %4196 = vrot.lane.b32.xlu1 %v7173_v16, %s5670_s29  ;;  %v11263_v16 = vld [vmem:[#allocation138_spill] sm:$0xff] }
 0x56d   :  { %5131 = vst.msk [vmem:[%s10597_s3 + $0x3b8] sm:$0xf] %vm1357_vm0, %v3954_v54 }
 0x56e   :  { %4198 = vrot.lane.b32.xlu0 %v11262_v24, %s5670_s29  ;;  %v3956_v45 = vpop.permute.xlu1 %3955 }
 0x56f   :  { %5132 = vst.msk [vmem:[%s10597_s3 + $0x3bc] sm:$0xf] %vm1357_vm0, %v3956_v45 }
 0x570   :  { %v3958_v56 = vpop.permute.xlu0 %3957  ;;  %4200 = vrot.lane.b32.xlu1 %v7286_v44, %s5670_s29  ;;  %v11264_v44 = vld [vmem:[#allocation143_spill] sm:$0xff] }
 0x571   :  { %5133 = vst.msk [vmem:[%s10597_s3 + $0x3c0] sm:$0xf] %vm1357_vm0, %v3958_v56 }
 0x572   :  { %4202 = vrot.lane.b32.xlu0 %v11263_v16, %s5670_s29  ;;  %v3960_v17 = vpop.permute.xlu1 %3959 }
 0x573   :  { %5134 = vst.msk [vmem:[%s10597_s3 + $0x3c4] sm:$0xf] %vm1357_vm0, %v3960_v17 }
 0x574   :  { %v3962_v15 = vpop.permute.xlu0 %3961  ;;  %4204 = vrot.lane.b32.xlu1 %v11131_v32, %s5670_s29  ;;  %v11265_v32 = vld [vmem:[#allocation142_spill] sm:$0xff] }
 0x575   :  { %5135 = vst.msk [vmem:[%s10597_s3 + $0x3c8] sm:$0xf] %vm1357_vm0, %v3962_v15 }
 0x576   :  { %4206 = vrot.lane.b32.xlu0 %v11264_v44, %s5670_s29  ;;  %v3964_v52 = vpop.permute.xlu1 %3963 }
 0x577   :  { %5136 = vst.msk [vmem:[%s10597_s3 + $0x3cc] sm:$0xf] %vm1357_vm0, %v3964_v52 }
 0x578   :  { %v3966_v48 = vpop.permute.xlu0 %3965  ;;  %4208 = vrot.lane.b32.xlu1 %v11031_v50, %s5670_s29  ;;  %v11266_v50 = vld [vmem:[#allocation147_spill] sm:$0xff] }
 0x579   :  { %5137 = vst.msk [vmem:[%s10597_s3 + $0x3d0] sm:$0xf] %vm1357_vm0, %v3966_v48 }
 0x57a   :  { %4210 = vrot.lane.b32.xlu0 %v11265_v32, %s5670_s29  ;;  %v3968_v12 = vpop.permute.xlu1 %3967 }
 0x57b   :  { %5138 = vst.msk [vmem:[%s10597_s3 + $0x3d4] sm:$0xf] %vm1357_vm0, %v3968_v12 }
 0x57c   :  { %v3970_v51 = vpop.permute.xlu0 %3969  ;;  %4212 = vrot.lane.b32.xlu1 %v11133_v41, %s5670_s29  ;;  %v11267_v41 = vld [vmem:[#allocation146_spill] sm:$0xff] }
 0x57d   :  { %5139 = vst.msk [vmem:[%s10597_s3 + $0x3d8] sm:$0xf] %vm1357_vm0, %v3970_v51 }
 0x57e   :  { %4214 = vrot.lane.b32.xlu0 %v11266_v50, %s5670_s29  ;;  %v3972_v62 = vpop.permute.xlu1 %3971 }
 0x57f   :  { %5140 = vst.msk [vmem:[%s10597_s3 + $0x3dc] sm:$0xf] %vm1357_vm0, %v3972_v62 }
 0x580   :  { %v3974_v61 = vpop.permute.xlu0 %3973  ;;  %4216 = vrot.lane.b32.xlu1 %v11033_v59, %s5670_s29 }
 0x581   :  { %5141 = vst.msk [vmem:[%s10597_s3 + $0x3e0] sm:$0xf] %vm1357_vm0, %v3974_v61 }
 0x582   :  { %4218 = vrot.lane.b32.xlu0 %v11267_v41, %s5670_s29  ;;  %v3976_v6 = vpop.permute.xlu1 %3975 }
 0x583   :  { %5142 = vst.msk [vmem:[%s10597_s3 + $0x3e4] sm:$0xf] %vm1357_vm0, %v3976_v6 }
 0x584   :  { %v3978_v63 = vpop.permute.xlu0 %3977  ;;  %4220 = vrot.lane.b32.xlu1 %v11135_v14, %s5670_s29  ;;  %v11268_v14 = vld [vmem:[#allocation150_spill] sm:$0xff] }
 0x585   :  { %5143 = vst.msk [vmem:[%s10597_s3 + $0x3e8] sm:$0xf] %vm1357_vm0, %v3978_v63 }
 0x586   :  { %4222 = vrot.lane.b32.xlu0 %v7583_v8, %s5670_s29  ;;  %v3980_v59 = vpop.permute.xlu1 %3979 }
 0x587   :  { %5144 = vst.msk [vmem:[%s10597_s3 + $0x3ec] sm:$0xf] %vm1357_vm0, %v3980_v59 }
 0x588   :  { %v3982_v29 = vpop.permute.xlu0 %3981  ;;  %4224 = vrot.lane.b32.xlu1 %v7598_v21, %s5670_s29  ;;  %v11269_v21 = vld [vmem:[#allocation155_spill] sm:$0xff] }
 0x589   :  { %5145 = vst.msk [vmem:[%s10597_s3 + $0x3f0] sm:$0xf] %vm1357_vm0, %v3982_v29 }
 0x58a   :  { %4226 = vrot.lane.b32.xlu0 %v11268_v14, %s5670_s29  ;;  %v3984_v53 = vpop.permute.xlu1 %3983 }
 0x58b   :  { %5146 = vst.msk [vmem:[%s10597_s3 + $0x3f4] sm:$0xf] %vm1357_vm0, %v3984_v53 }
 0x58c   :  { %v3986_v8 = vpop.permute.xlu0 %3985  ;;  %4228 = vrot.lane.b32.xlu1 %v11136_v11, %s5670_s29 }
 0x58d   :  { %5147 = vst.msk [vmem:[%s10597_s3 + $0x3f8] sm:$0xf] %vm1357_vm0, %v3986_v8 }
 0x58e   :  { %4230 = vrot.lane.b32.xlu0 %v11269_v21, %s5670_s29  ;;  %v3988_v25 = vpop.permute.xlu1 %3987 }
 0x58f   :  { %5148 = vst.msk [vmem:[%s10597_s3 + $0x3fc] sm:$0xf] %vm1357_vm0, %v3988_v25 }
 0x590   :  { %v4119_v39 = vpop.permute.xlu0 %4118  ;;  %4232 = vrot.lane.b32.xlu1 %v7702_v20, %s5670_s29 }
 0x591   :  { %5149 = vst.msk [vmem:[%s10598_s4 + $0x300] sm:$0xf] %vm1357_vm0, %v4119_v39 }
 0x592   :  { %4234 = vrot.lane.b32.xlu0 %v11137_v58, %s5670_s29  ;;  %v4121_v11 = vpop.permute.xlu1 %4120 }
 0x593   :  { %5150 = vst.msk [vmem:[%s10598_s4 + $0x304] sm:$0xf] %vm1357_vm0, %v4121_v11 }
 0x594   :  { %v4123_v3 = vpop.permute.xlu0 %4122  ;;  %4236 = vrot.lane.b32.xlu1 %v7693_v49, %s5670_s29  ;;  %v11271_v49 = vld [vmem:[#allocation160_spill] sm:$0xff] }
 0x595   :  { %5151 = vst.msk [vmem:[%s10598_s4 + $0x308] sm:$0xf] %vm1357_vm0, %v4123_v3 }
 0x596   :  { %4238 = vrot.lane.b32.xlu0 %v7791_v34, %s5670_s29  ;;  %v4125_v20 = vpop.permute.xlu1 %4124 }
 0x597   :  { %5152 = vst.msk [vmem:[%s10598_s4 + $0x30c] sm:$0xf] %vm1357_vm0, %v4125_v20 }
 0x598   :  { %v4127_v58 = vpop.permute.xlu0 %4126  ;;  %4240 = vrot.lane.b32.xlu1 %v11270_v10, %s5670_s29 }
 0x599   :  { %5153 = vst.msk [vmem:[%s10598_s4 + $0x310] sm:$0xf] %vm1357_vm0, %v4127_v58 }
 0x59a   :  { %4242 = vrot.lane.b32.xlu0 %v11271_v49, %s5670_s29  ;;  %v4129_v35 = vpop.permute.xlu1 %4128 }
 0x59b   :  { %5154 = vst.msk [vmem:[%s10598_s4 + $0x314] sm:$0xf] %vm1357_vm0, %v4129_v35 }
 0x59c   :  { %v4131_v34 = vpop.permute.xlu0 %4130  ;;  %4244 = vrot.lane.b32.xlu1 %v11272_v9, %s5670_s29 }
 0x59d   :  { %5155 = vst.msk [vmem:[%s10598_s4 + $0x318] sm:$0xf] %vm1357_vm0, %v4131_v34 }
 0x59e   :  { %v4133_v33 = vpop.permute.xlu1 %4132 }
 0x59f   :  { %5156 = vst.msk [vmem:[%s10598_s4 + $0x31c] sm:$0xf] %vm1357_vm0, %v4133_v33 }
 0x5a0   :  { %v4135_v22 = vpop.permute.xlu0 %4134 }
 0x5a1   :  { %5157 = vst.msk [vmem:[%s10598_s4 + $0x320] sm:$0xf] %vm1357_vm0, %v4135_v22 }
 0x5a2   :  { %v4137_v23 = vpop.permute.xlu1 %4136 }
 0x5a3   :  { %5158 = vst.msk [vmem:[%s10598_s4 + $0x324] sm:$0xf] %vm1357_vm0, %v4137_v23 }
 0x5a4   :  { %v4139_v13 = vpop.permute.xlu0 %4138 }
 0x5a5   :  { %5159 = vst.msk [vmem:[%s10598_s4 + $0x328] sm:$0xf] %vm1357_vm0, %v4139_v13 }
 0x5a6   :  { %v4141_v57 = vpop.permute.xlu1 %4140 }
 0x5a7   :  { %5160 = vst.msk [vmem:[%s10598_s4 + $0x32c] sm:$0xf] %vm1357_vm0, %v4141_v57 }
 0x5a8   :  { %v4143_v30 = vpop.permute.xlu0 %4142 }
 0x5a9   :  { %5161 = vst.msk [vmem:[%s10598_s4 + $0x330] sm:$0xf] %vm1357_vm0, %v4143_v30 }
 0x5aa   :  { %v4145_v43 = vpop.permute.xlu1 %4144 }
 0x5ab   :  { %5162 = vst.msk [vmem:[%s10598_s4 + $0x334] sm:$0xf] %vm1357_vm0, %v4145_v43 }
 0x5ac   :  { %v4147_v26 = vpop.permute.xlu0 %4146 }
 0x5ad   :  { %5163 = vst.msk [vmem:[%s10598_s4 + $0x338] sm:$0xf] %vm1357_vm0, %v4147_v26 }
 0x5ae   :  { %v4149_v1 = vpop.permute.xlu1 %4148 }
 0x5af   :  { %5164 = vst.msk [vmem:[%s10598_s4 + $0x33c] sm:$0xf] %vm1357_vm0, %v4149_v1 }
 0x5b0   :  { %v4151_v2 = vpop.permute.xlu0 %4150 }
 0x5b1   :  { %5165 = vst.msk [vmem:[%s10598_s4 + $0x340] sm:$0xf] %vm1357_vm0, %v4151_v2 }
 0x5b2   :  { %v4153_v27 = vpop.permute.xlu1 %4152 }
 0x5b3   :  { %5166 = vst.msk [vmem:[%s10598_s4 + $0x344] sm:$0xf] %vm1357_vm0, %v4153_v27 }
 0x5b4   :  { %v4155_v47 = vpop.permute.xlu0 %4154 }
 0x5b5   :  { %5167 = vst.msk [vmem:[%s10598_s4 + $0x348] sm:$0xf] %vm1357_vm0, %v4155_v47 }
 0x5b6   :  { %v4157_v55 = vpop.permute.xlu1 %4156 }
 0x5b7   :  { %5168 = vst.msk [vmem:[%s10598_s4 + $0x34c] sm:$0xf] %vm1357_vm0, %v4157_v55 }
 0x5b8   :  { %v4159_v40 = vpop.permute.xlu0 %4158 }
 0x5b9   :  { %5169 = vst.msk [vmem:[%s10598_s4 + $0x350] sm:$0xf] %vm1357_vm0, %v4159_v40 }
 0x5ba   :  { %v4161_v31 = vpop.permute.xlu1 %4160 }
 0x5bb   :  { %5170 = vst.msk [vmem:[%s10598_s4 + $0x354] sm:$0xf] %vm1357_vm0, %v4161_v31 }
 0x5bc   :  { %v4163_v18 = vpop.permute.xlu0 %4162 }
 0x5bd   :  { %5171 = vst.msk [vmem:[%s10598_s4 + $0x358] sm:$0xf] %vm1357_vm0, %v4163_v18 }
 0x5be   :  { %v4165_v19 = vpop.permute.xlu1 %4164 }
 0x5bf   :  { %5172 = vst.msk [vmem:[%s10598_s4 + $0x35c] sm:$0xf] %vm1357_vm0, %v4165_v19 }
 0x5c0   :  { %v4167_v0 = vpop.permute.xlu0 %4166 }
 0x5c1   :  { %5173 = vst.msk [vmem:[%s10598_s4 + $0x360] sm:$0xf] %vm1357_vm0, %v4167_v0 }
 0x5c2   :  { %v4169_v38 = vpop.permute.xlu1 %4168 }
 0x5c3   :  { %5174 = vst.msk [vmem:[%s10598_s4 + $0x364] sm:$0xf] %vm1357_vm0, %v4169_v38 }
 0x5c4   :  { %v4171_v5 = vpop.permute.xlu0 %4170 }
 0x5c5   :  { %5175 = vst.msk [vmem:[%s10598_s4 + $0x368] sm:$0xf] %vm1357_vm0, %v4171_v5 }
 0x5c6   :  { %v4173_v42 = vpop.permute.xlu1 %4172 }
 0x5c7   :  { %5176 = vst.msk [vmem:[%s10598_s4 + $0x36c] sm:$0xf] %vm1357_vm0, %v4173_v42 }
 0x5c8   :  { %v4175_v36 = vpop.permute.xlu0 %4174 }
 0x5c9   :  { %5177 = vst.msk [vmem:[%s10598_s4 + $0x370] sm:$0xf] %vm1357_vm0, %v4175_v36 }
 0x5ca   :  { %v4177_v60 = vpop.permute.xlu1 %4176 }
 0x5cb   :  { %5178 = vst.msk [vmem:[%s10598_s4 + $0x374] sm:$0xf] %vm1357_vm0, %v4177_v60 }
 0x5cc   :  { %v4179_v7 = vpop.permute.xlu0 %4178 }
 0x5cd   :  { %5179 = vst.msk [vmem:[%s10598_s4 + $0x378] sm:$0xf] %vm1357_vm0, %v4179_v7 }
 0x5ce   :  { %v4181_v46 = vpop.permute.xlu1 %4180 }
 0x5cf   :  { %5180 = vst.msk [vmem:[%s10598_s4 + $0x37c] sm:$0xf] %vm1357_vm0, %v4181_v46 }
 0x5d0   :  { %v4183_v4 = vpop.permute.xlu0 %4182 }
 0x5d1   :  { %5181 = vst.msk [vmem:[%s10598_s4 + $0x380] sm:$0xf] %vm1357_vm0, %v4183_v4 }
 0x5d2   :  { %v4185_v37 = vpop.permute.xlu1 %4184 }
 0x5d3   :  { %5182 = vst.msk [vmem:[%s10598_s4 + $0x384] sm:$0xf] %vm1357_vm0, %v4185_v37 }
 0x5d4   :  { %v4187_v28 = vpop.permute.xlu0 %4186 }
 0x5d5   :  { %5183 = vst.msk [vmem:[%s10598_s4 + $0x388] sm:$0xf] %vm1357_vm0, %v4187_v28 }
 0x5d6   :  { %v4189_v54 = vpop.permute.xlu1 %4188 }
 0x5d7   :  { %5184 = vst.msk [vmem:[%s10598_s4 + $0x38c] sm:$0xf] %vm1357_vm0, %v4189_v54 }
 0x5d8   :  { %v4191_v24 = vpop.permute.xlu0 %4190 }
 0x5d9   :  { %5185 = vst.msk [vmem:[%s10598_s4 + $0x390] sm:$0xf] %vm1357_vm0, %v4191_v24 }
 0x5da   :  { %v4193_v45 = vpop.permute.xlu1 %4192 }
 0x5db   :  { %5186 = vst.msk [vmem:[%s10598_s4 + $0x394] sm:$0xf] %vm1357_vm0, %v4193_v45 }
 0x5dc   :  { %v4195_v56 = vpop.permute.xlu0 %4194 }
 0x5dd   :  { %5187 = vst.msk [vmem:[%s10598_s4 + $0x398] sm:$0xf] %vm1357_vm0, %v4195_v56 }
 0x5de   :  { %v4197_v16 = vpop.permute.xlu1 %4196 }
 0x5df   :  { %5188 = vst.msk [vmem:[%s10598_s4 + $0x39c] sm:$0xf] %vm1357_vm0, %v4197_v16 }
 0x5e0   :  { %v4199_v17 = vpop.permute.xlu0 %4198 }
 0x5e1   :  { %5189 = vst.msk [vmem:[%s10598_s4 + $0x3a0] sm:$0xf] %vm1357_vm0, %v4199_v17 }
 0x5e2   :  { %v4201_v15 = vpop.permute.xlu1 %4200 }
 0x5e3   :  { %5190 = vst.msk [vmem:[%s10598_s4 + $0x3a4] sm:$0xf] %vm1357_vm0, %v4201_v15 }
 0x5e4   :  { %v4203_v44 = vpop.permute.xlu0 %4202 }
 0x5e5   :  { %5191 = vst.msk [vmem:[%s10598_s4 + $0x3a8] sm:$0xf] %vm1357_vm0, %v4203_v44 }
 0x5e6   :  { %v4205_v52 = vpop.permute.xlu1 %4204 }
 0x5e7   :  { %5192 = vst.msk [vmem:[%s10598_s4 + $0x3ac] sm:$0xf] %vm1357_vm0, %v4205_v52 }
 0x5e8   :  { %v4207_v48 = vpop.permute.xlu0 %4206 }
 0x5e9   :  { %5193 = vst.msk [vmem:[%s10598_s4 + $0x3b0] sm:$0xf] %vm1357_vm0, %v4207_v48 }
 0x5ea   :  { %v4209_v32 = vpop.permute.xlu1 %4208 }
 0x5eb   :  { %5194 = vst.msk [vmem:[%s10598_s4 + $0x3b4] sm:$0xf] %vm1357_vm0, %v4209_v32 }
 0x5ec   :  { %v4211_v12 = vpop.permute.xlu0 %4210 }
 0x5ed   :  { %5195 = vst.msk [vmem:[%s10598_s4 + $0x3b8] sm:$0xf] %vm1357_vm0, %v4211_v12 }
 0x5ee   :  { %v4213_v51 = vpop.permute.xlu1 %4212 }
 0x5ef   :  { %5196 = vst.msk [vmem:[%s10598_s4 + $0x3bc] sm:$0xf] %vm1357_vm0, %v4213_v51 }
 0x5f0   :  { %v4215_v50 = vpop.permute.xlu0 %4214 }
 0x5f1   :  { %5197 = vst.msk [vmem:[%s10598_s4 + $0x3c0] sm:$0xf] %vm1357_vm0, %v4215_v50 }
 0x5f2   :  { %v4217_v62 = vpop.permute.xlu1 %4216 }
 0x5f3   :  { %5198 = vst.msk [vmem:[%s10598_s4 + $0x3c4] sm:$0xf] %vm1357_vm0, %v4217_v62 }
 0x5f4   :  { %v4219_v61 = vpop.permute.xlu0 %4218 }
 0x5f5   :  { %5199 = vst.msk [vmem:[%s10598_s4 + $0x3c8] sm:$0xf] %vm1357_vm0, %v4219_v61 }
 0x5f6   :  { %v4221_v41 = vpop.permute.xlu1 %4220 }
 0x5f7   :  { %5200 = vst.msk [vmem:[%s10598_s4 + $0x3cc] sm:$0xf] %vm1357_vm0, %v4221_v41 }
 0x5f8   :  { %v4223_v6 = vpop.permute.xlu0 %4222 }
 0x5f9   :  { %5201 = vst.msk [vmem:[%s10598_s4 + $0x3d0] sm:$0xf] %vm1357_vm0, %v4223_v6 }
 0x5fa   :  { %v4225_v63 = vpop.permute.xlu1 %4224 }
 0x5fb   :  { %5202 = vst.msk [vmem:[%s10598_s4 + $0x3d4] sm:$0xf] %vm1357_vm0, %v4225_v63 }
 0x5fc   :  { %v4227_v59 = vpop.permute.xlu0 %4226 }
 0x5fd   :  { %5203 = vst.msk [vmem:[%s10598_s4 + $0x3d8] sm:$0xf] %vm1357_vm0, %v4227_v59 }
 0x5fe   :  { %v4229_v29 = vpop.permute.xlu1 %4228 }
 0x5ff   :  { %5204 = vst.msk [vmem:[%s10598_s4 + $0x3dc] sm:$0xf] %vm1357_vm0, %v4229_v29 }
 0x600   :  { %v4231_v14 = vpop.permute.xlu0 %4230 }
 0x601   :  { %5205 = vst.msk [vmem:[%s10598_s4 + $0x3e0] sm:$0xf] %vm1357_vm0, %v4231_v14 }
 0x602   :  { %v4233_v53 = vpop.permute.xlu1 %4232 }
 0x603   :  { %5206 = vst.msk [vmem:[%s10598_s4 + $0x3e4] sm:$0xf] %vm1357_vm0, %v4233_v53 }
 0x604   :  { %v4235_v8 = vpop.permute.xlu0 %4234 }
 0x605   :  { %5207 = vst.msk [vmem:[%s10598_s4 + $0x3e8] sm:$0xf] %vm1357_vm0, %v4235_v8 }
 0x606   :  { %v4237_v21 = vpop.permute.xlu1 %4236 }
 0x607   :  { %5208 = vst.msk [vmem:[%s10598_s4 + $0x3ec] sm:$0xf] %vm1357_vm0, %v4237_v21 }
 0x608   :  { %v4239_v25 = vpop.permute.xlu0 %4238 }
 0x609   :  { %5209 = vst.msk [vmem:[%s10598_s4 + $0x3f0] sm:$0xf] %vm1357_vm0, %v4239_v25 }
 0x60a   :  { %v4241_v39 = vpop.permute.xlu1 %4240 }
 0x60b   :  { %5210 = vst.msk [vmem:[%s10598_s4 + $0x3f4] sm:$0xf] %vm1357_vm0, %v4241_v39 }
 0x60c   :  { %v4243_v11 = vpop.permute.xlu0 %4242 }
 0x60d   :  { %5211 = vst.msk [vmem:[%s10598_s4 + $0x3f8] sm:$0xf] %vm1357_vm0, %v4243_v11 }
 0x60e   :  { %v4245_v3 = vpop.permute.xlu1 %4244 }
 0x60f   :  { %5212 = vst.msk [vmem:[%s10598_s4 + $0x3fc] sm:$0xf] %vm1357_vm0, %v4245_v3 }
 0x610   :  { %4387 = vsyncpa [#allocation3], 1 }
 0x611   :  { %4388 = vsyncpa [#allocation5], 1 }

</bundles_post_ra>
